<compile_context>
chip_gen: v7x
topology: tpu7x:2x2x1
jax: 0.10.0
libtpu: 0.0.40
codegen_flags: <defaults>
</compile_context>

<pallas_src>
import math
import jax
import jax.numpy as jnp
from jax.experimental import pallas as pl
from jax.experimental.pallas import tpu as pltpu

# ---------------- model hyper-params (small synthetic sizes) ----------------
B = 2            # batch
C_IN = 3         # image channels
H = W = 16       # spatial
HW = H * W
C_FEAT = 128     # backbone feature channels (stand-in for 1280)
EMB = 128        # embedding_size (stand-in for 512)
N_CLASSES = 256  # output_dim (stand-in for 15587)
TILE_N = 128     # class tile (production: 2048 — multiple of 256 on v6e/v7x)

GEM_EPS = 1e-6
ARC_S = 30.0
ARC_M = 0.5
COS_M = math.cos(ARC_M)
SIN_M = math.sin(ARC_M)
TH = math.cos(math.pi - ARC_M)
MM = math.sin(math.pi - ARC_M) * ARC_M
NORM_EPS = 1e-12  # F.normalize default eps


# ---------------- fused kernel ------------------------------------------------
def fused_kernel(p_ref, x_ref, wback_ref, bback_ref, wemb_ref, bemb_ref,
                 label_ref, warc_ref, winv_ref, out_ref, embn_ref):
    # p_ref:     SMEM (1,)              f32   GeM p
    # x_ref:     (B_PAD*HW, C_IN)       bf16  image, channels on lane axis
    # wback_ref: (C_IN, C_FEAT)         bf16  backbone stand-in 1x1 conv
    # bback_ref: (1, C_FEAT)            f32
    # wemb_ref:  (C_FEAT, EMB)          bf16  embedding Linear weight (transposed)
    # bemb_ref:  (1, EMB)               f32
    # label_ref: (B_PAD, 1)             i32
    # warc_ref:  (EMB, TILE_N)          bf16  ArcFace weight tile (transposed)
    # winv_ref:  (1, TILE_N)            f32   precomputed 1/||w_class||
    # out_ref:   (B_PAD, TILE_N)        f32   logits tile
    # embn_ref:  VMEM scratch (B_PAD, EMB) f32, persists across class tiles
    j = pl.program_id(0)
    tile_n = out_ref.shape[1]

    # ---- x-only work: run once (first class tile), reuse for all tiles ------
    @pl.when(j == 0)
    def _():
        b = label_ref.shape[0]
        bhw = x_ref.shape[0]
        hw = bhw // b
        p = p_ref[0]

        # backbone stand-in: 1x1 conv (channel projection) + ReLU.
        # TODO(synk): K=C_IN=3 underfills the MXU; kept as matmul for robustness —
        # becomes moot once a real backbone produces the feature map.
        feat = jnp.dot(x_ref[...], wback_ref[...],
                       preferred_element_type=jnp.float32)            # (BHW, C_FEAT)
        feat = jnp.maximum(feat + bback_ref[...], 0.0)

        # GeM pooling: mean over H*W of clamp(x,eps)^p, then ^(1/p).
        powed = jnp.exp(p * jnp.log(jnp.maximum(feat, GEM_EPS)))      # clamp(eps)**p
        # per-batch spatial mean via an MXU segment matmul (bf16 operands, f32 acc)
        row = jax.lax.broadcasted_iota(jnp.int32, (b, bhw), 0)
        col = jax.lax.broadcasted_iota(jnp.int32, (b, bhw), 1)
        seg = jnp.where((col >= row * hw) & (col < (row + 1) * hw),
                        1.0 / hw, 0.0).astype(jnp.bfloat16)           # (B, BHW)
        mean = jnp.dot(seg, powed.astype(jnp.bfloat16),
                       preferred_element_type=jnp.float32)            # (B, C_FEAT)
        pooled = jnp.exp(jnp.log(mean) * (1.0 / p))                   # ** (1/p)

        # embedding Linear (bf16 operands, f32 accumulation)
        emb = jnp.dot(pooled.astype(jnp.bfloat16), wemb_ref[...],
                      preferred_element_type=jnp.float32) + bemb_ref[...]

        # F.normalize(input): per-row L2 normalize (exact — only (B,1) values)
        norm = jnp.sqrt(jnp.sum(emb * emb, axis=-1, keepdims=True))
        embn_ref[...] = emb * (1.0 / jnp.maximum(norm, NORM_EPS))

    # ---- per-class-tile: cosine matmul + ArcFace margin epilogue ------------
    # F.normalize(weight) is applied as a post-matmul column scale (precomputed
    # inverse norms) — mathematically identical, no f32 weight traffic.
    cosine = jnp.dot(embn_ref[...].astype(jnp.bfloat16), warc_ref[...],
                     preferred_element_type=jnp.float32) * winv_ref[...]  # (B, TILE_N)

    # global class index of each lane in this tile
    iota = jax.lax.broadcasted_iota(jnp.int32, cosine.shape, 1) + j * tile_n
    is_label = iota == label_ref[...]                                  # (B, TILE_N)

    # margin math only on the label column: extract target cosine per row (B,1)
    tcos = jnp.sum(jnp.where(is_label, cosine, 0.0), axis=-1, keepdims=True)
    tsin = jnp.sqrt(jnp.maximum(1.0 - tcos * tcos, 0.0))
    phi = tcos * COS_M - tsin * SIN_M
    phi = jnp.where(tcos > TH, phi, tcos - MM)                         # easy_margin=False

    out_ref[...] = jnp.where(is_label, phi, cosine) * ARC_S            # ls_eps == 0


# ---------------- wrapper -----------------------------------------------------
def happy_whale_forward(x_nchw, labels, params, *, tile_n=TILE_N):
    b, cin, h, w = x_nchw.shape
    hw = h * w
    cf = params["w_back"].shape[1]
    e = params["w_emb"].shape[1]
    n_cls = params["w_arc_t"].shape[1]

    # pad batch to a multiple of 8 (full sublane occupancy / unmasked stores)
    b_pad = ((b + 7) // 8) * 8
    # pad class axis to a multiple of tile_n (lane-dense output tiles)
    n_pad = ((n_cls + tile_n - 1) // tile_n) * tile_n
    n_tiles = n_pad // tile_n

    # layout: NCHW -> (B_PAD*HW, C_IN) so channels sit on the lane axis
    x2d = jnp.transpose(x_nchw, (0, 2, 3, 1)).reshape(b, hw, cin)
    if b_pad != b:
        x2d = jnp.concatenate(
            [x2d, jnp.zeros((b_pad - b, hw, cin), x2d.dtype)], axis=0)
    x2d = x2d.reshape(b_pad * hw, cin).astype(jnp.bfloat16)

    labels2 = labels.astype(jnp.int32)
    if b_pad != b:
        labels2 = jnp.concatenate(
            [labels2, jnp.zeros((b_pad - b,), jnp.int32)], axis=0)
    labels2 = labels2.reshape(b_pad, 1)

    # precompute per-class inverse L2 norms of the ArcFace weight (static per step)
    w_arc = params["w_arc_t"]
    w_norm = jnp.sqrt(jnp.sum(w_arc.astype(jnp.float32) ** 2, axis=0, keepdims=True))
    inv_wnorm = 1.0 / jnp.maximum(w_norm, NORM_EPS)
    if n_pad != n_cls:
        w_arc = jnp.pad(w_arc, ((0, 0), (0, n_pad - n_cls)))
        inv_wnorm = jnp.pad(inv_wnorm, ((0, 0), (0, n_pad - n_cls)))  # 0 -> 0 logits

    out = pl.pallas_call(
        fused_kernel,
        out_shape=jax.ShapeDtypeStruct((b_pad, n_pad), jnp.float32),
        grid=(n_tiles,),
        in_specs=[
            pl.BlockSpec(memory_space=pltpu.MemorySpace.SMEM),       # gem_p (1,)
            pl.BlockSpec((b_pad * hw, cin), lambda j: (0, 0)),       # x
            pl.BlockSpec((cin, cf), lambda j: (0, 0)),               # w_back
            pl.BlockSpec((1, cf), lambda j: (0, 0)),                 # b_back
            pl.BlockSpec((cf, e), lambda j: (0, 0)),                 # w_emb
            pl.BlockSpec((1, e), lambda j: (0, 0)),                  # b_emb
            pl.BlockSpec((b_pad, 1), lambda j: (0, 0)),              # labels
            pl.BlockSpec((e, tile_n), lambda j: (0, j)),             # w_arc tile
            pl.BlockSpec((1, tile_n), lambda j: (0, j)),             # inv_wnorm tile
        ],
        out_specs=pl.BlockSpec((b_pad, tile_n), lambda j: (0, j)),
        scratch_shapes=[pltpu.VMEM((b_pad, e), jnp.float32)],        # emb_n, persists
        compiler_params=pltpu.CompilerParams(
            # "arbitrary": the class axis carries the emb_n scratch written at tile 0.
            # On v7x megacore, use "parallel" only with per-tile recompute (or a
            # separate emb pre-pass).
            dimension_semantics=("arbitrary",),
            vmem_limit_bytes=48 * 1024 * 1024),
    )(params["gem_p"], x2d, params["w_back"], params["b_back"],
      params["w_emb"], params["b_emb"], labels2, w_arc, inv_wnorm)

    return out[:b, :n_cls]


# ---------------- pure-JAX reference (mirrors the bf16 matmul precision) -----
def reference_forward(x, labels, params, n_classes):
    b, cin, h, w = x.shape
    hw = h * w
    xf = jnp.transpose(x, (0, 2, 3, 1)).reshape(b, hw, cin).astype(jnp.bfloat16)
    feat = jnp.einsum("bsc,cf->bsf", xf, params["w_back"],
                      preferred_element_type=jnp.float32) + params["b_back"][None]
    feat = jnp.maximum(feat, 0.0)
    p = params["gem_p"][0]
    powed = jnp.maximum(feat, GEM_EPS) ** p
    # mirror the kernel's bf16 MXU operands (f32 accumulation) for the spatial mean
    pooled = jnp.mean(powed.astype(jnp.bfloat16).astype(jnp.float32),
                      axis=1) ** (1.0 / p)
    emb = jnp.dot(pooled.astype(jnp.bfloat16), params["w_emb"],
                  preferred_element_type=jnp.float32) + params["b_emb"]
    emb_n = emb / jnp.maximum(jnp.linalg.norm(emb, axis=-1, keepdims=True), NORM_EPS)
    wt = params["w_arc_t"]                                   # (EMB, N_CLASSES) bf16
    inv_wn = 1.0 / jnp.maximum(
        jnp.sqrt(jnp.sum(wt.astype(jnp.float32) ** 2, axis=0, keepdims=True)),
        NORM_EPS)
    # F.normalize(weight) applied as a post-matmul column scale (identical math)
    cosine = jnp.dot(emb_n.astype(jnp.bfloat16), wt,
                     preferred_element_type=jnp.float32) * inv_wn
    sine = jnp.sqrt(jnp.maximum(1.0 - cosine ** 2, 0.0))
    phi = cosine * COS_M - sine * SIN_M
    phi = jnp.where(cosine > TH, phi, cosine - MM)
    one_hot = jax.nn.one_hot(labels, n_classes, dtype=jnp.float32)
    return (one_hot * phi + (1.0 - one_hot) * cosine) * ARC_S


if __name__ == "__main__":
    key = jax.random.PRNGKey(0)
    kx, kl, kb, ke, kbe, ka = jax.random.split(key, 6)

    x = jax.random.normal(kx, (B, C_IN, H, W), dtype=jnp.float32)
    labels = jax.random.randint(kl, (B,), 0, N_CLASSES, dtype=jnp.int32)

    # deterministic parameter init (shapes follow the module's __init__);
    # matmul weights stored in bf16 (autocast intent), biases / gem_p in f32.
    xav_b = math.sqrt(6.0 / (C_IN + C_FEAT))
    w_back = jax.random.uniform(kb, (C_IN, C_FEAT), jnp.float32,
                                -xav_b, xav_b).astype(jnp.bfloat16)
    b_back = jnp.zeros((1, C_FEAT), jnp.float32)
    gem_p = jnp.full((1,), 3.0, jnp.float32)                    # GeM p init = 3

    lin_b = 1.0 / math.sqrt(C_FEAT)
    w_emb = jax.random.uniform(ke, (C_FEAT, EMB), jnp.float32,
                               -lin_b, lin_b).astype(jnp.bfloat16)
    b_emb = jax.random.uniform(kbe, (1, EMB), jnp.float32, -lin_b, lin_b)

    arc_b = math.sqrt(6.0 / (EMB + N_CLASSES))                  # xavier_uniform
    w_arc_t = jax.random.uniform(ka, (EMB, N_CLASSES), jnp.float32,
                                 -arc_b, arc_b).astype(jnp.bfloat16)

    params = dict(w_back=w_back, b_back=b_back, gem_p=gem_p,
                  w_emb=w_emb, b_emb=b_emb, w_arc_t=w_arc_t)

    out = happy_whale_forward(x, labels, params)
    out = jax.block_until_ready(out)

    ref = reference_forward(x, labels, params, N_CLASSES)
    assert out.shape == (B, N_CLASSES)
    assert jnp.all(jnp.isfinite(out)), "non-finite logits"
    assert jnp.allclose(out, ref, rtol=2e-2, atol=5e-2), "mismatch vs reference"

    print("KERNEL_OK")
</pallas_src>

<mosaic_0001>
module attributes {stable_mosaic.version = 11 : i64} {
  func.func @fused_kernel(%arg0: i32, %arg1: memref<1xf32, #tpu.memory_space<smem>>, %arg2: memref<2048x3xbf16, #tpu.memory_space<vmem>>, %arg3: memref<3x128xbf16, #tpu.memory_space<vmem>>, %arg4: memref<1x128xf32, #tpu.memory_space<vmem>>, %arg5: memref<128x128xbf16, #tpu.memory_space<vmem>>, %arg6: memref<1x128xf32, #tpu.memory_space<vmem>>, %arg7: memref<8x1xi32, #tpu.memory_space<vmem>>, %arg8: memref<128x128xbf16, #tpu.memory_space<vmem>>, %arg9: memref<1x128xf32, #tpu.memory_space<vmem>>, %arg10: memref<8x128xf32, #tpu.memory_space<vmem>>, %arg11: memref<8x128xf32, #tpu.memory_space<vmem>>) attributes {dimension_semantics = [#tpu.dimension_semantics<arbitrary>], iteration_bounds = array<i64: 2>, scalar_prefetch = 0 : i64, scratch_operands = 1 : i64, tpu.core_type = #tpu.core_type<tc>, window_params = [{transform_indices = @transform_0, window_bounds = array<i64: 1>}, {pipeline_mode = #tpu.pipeline_mode<synchronous>, transform_indices = @transform_1, window_bounds = array<i64: 2048, 3>}, {pipeline_mode = #tpu.pipeline_mode<synchronous>, transform_indices = @transform_2, window_bounds = array<i64: 3, 128>}, {pipeline_mode = #tpu.pipeline_mode<synchronous>, transform_indices = @transform_3, window_bounds = array<i64: 1, 128>}, {pipeline_mode = #tpu.pipeline_mode<synchronous>, transform_indices = @transform_4, window_bounds = array<i64: 128, 128>}, {pipeline_mode = #tpu.pipeline_mode<synchronous>, transform_indices = @transform_5, window_bounds = array<i64: 1, 128>}, {pipeline_mode = #tpu.pipeline_mode<synchronous>, transform_indices = @transform_6, window_bounds = array<i64: 8, 1>}, {transform_indices = @transform_7, window_bounds = array<i64: 128, 128>}, {transform_indices = @transform_8, window_bounds = array<i64: 1, 128>}, {transform_indices = @transform_9, window_bounds = array<i64: 8, 128>}]} {
    %c0_i32 = arith.constant 0 : i32
    %0 = arith.cmpi eq, %arg0, %c0_i32 : i32
    %1 = arith.extui %0 : i1 to i32
    %c0_i32_0 = arith.constant 0 : i32
    %2 = arith.cmpi ne, %1, %c0_i32_0 : i32
    scf.if %2 {
      %c0_19 = arith.constant 0 : index
      %43 = memref.load %arg1[%c0_19] : memref<1xf32, #tpu.memory_space<smem>>
      %c0_20 = arith.constant 0 : index
      %c0_21 = arith.constant 0 : index
      %44 = vector.load %arg2[%c0_20, %c0_21] : memref<2048x3xbf16, #tpu.memory_space<vmem>>, vector<2048x3xbf16>
      %c0_22 = arith.constant 0 : index
      %c0_23 = arith.constant 0 : index
      %45 = vector.load %arg3[%c0_22, %c0_23] : memref<3x128xbf16, #tpu.memory_space<vmem>>, vector<3x128xbf16>
      %cst_24 = arith.constant dense<0.000000e+00> : vector<2048x128xf32>
      %46 = tpu.matmul %44, %45, %cst_24 {dimension_numbers = #tpu.dot_dimension_numbers<[1], [0], [0], [1], [0, 0, 1, 1], [], []>} : vector<2048x3xbf16>, vector<3x128xbf16>, vector<2048x128xf32> -> vector<2048x128xf32>
      %c0_25 = arith.constant 0 : index
      %c0_26 = arith.constant 0 : index
      %47 = vector.load %arg4[%c0_25, %c0_26] : memref<1x128xf32, #tpu.memory_space<vmem>>, vector<1x128xf32>
      %48 = vector.broadcast %47 : vector<1x128xf32> to vector<2048x128xf32>
      %49 = arith.addf %46, %48 : vector<2048x128xf32>
      %cst_27 = arith.constant 0.000000e+00 : f32
      %50 = vector.broadcast %cst_27 : f32 to vector<2048x128xf32>
      %51 = arith.maximumf %49, %50 : vector<2048x128xf32>
      %cst_28 = arith.constant 9.99999997E-7 : f32
      %52 = vector.broadcast %cst_28 : f32 to vector<2048x128xf32>
      %53 = arith.maximumf %51, %52 : vector<2048x128xf32>
      %54 = math.log %53 : vector<2048x128xf32>
      %55 = vector.broadcast %43 : f32 to vector<2048x128xf32>
      %56 = arith.mulf %55, %54 : vector<2048x128xf32>
      %57 = math.exp %56 : vector<2048x128xf32>
      %58 = tpu.iota {dimensions = array<i32: 0>} : vector<8x2048xi32>
      %59 = tpu.iota {dimensions = array<i32: 1>} : vector<8x2048xi32>
      %c256_i32 = arith.constant 256 : i32
      %60 = vector.broadcast %c256_i32 : i32 to vector<8x2048xi32>
      %61 = arith.muli %58, %60 : vector<8x2048xi32>
      %62 = arith.cmpi sge, %59, %61 : vector<8x2048xi32>
      %c1_i32 = arith.constant 1 : i32
      %63 = vector.broadcast %c1_i32 : i32 to vector<8x2048xi32>
      %64 = arith.addi %58, %63 : vector<8x2048xi32>
      %c256_i32_29 = arith.constant 256 : i32
      %65 = vector.broadcast %c256_i32_29 : i32 to vector<8x2048xi32>
      %66 = arith.muli %64, %65 : vector<8x2048xi32>
      %67 = arith.cmpi slt, %59, %66 : vector<8x2048xi32>
      %68 = arith.andi %62, %67 : vector<8x2048xi1>
      %cst_30 = arith.constant 3.906250e-03 : f32
      %cst_31 = arith.constant 0.000000e+00 : f32
      %69 = vector.broadcast %cst_30 : f32 to vector<8x2048xf32>
      %70 = vector.broadcast %cst_31 : f32 to vector<8x2048xf32>
      %71 = arith.select %68, %69, %70 : vector<8x2048xi1>, vector<8x2048xf32>
      %72 = arith.truncf %71 : vector<8x2048xf32> to vector<8x2048xbf16>
      %73 = arith.truncf %57 : vector<2048x128xf32> to vector<2048x128xbf16>
      %cst_32 = arith.constant dense<0.000000e+00> : vector<8x128xf32>
      %74 = tpu.matmul %72, %73, %cst_32 {dimension_numbers = #tpu.dot_dimension_numbers<[1], [0], [0], [1], [0, 0, 1, 1], [], []>} : vector<8x2048xbf16>, vector<2048x128xbf16>, vector<8x128xf32> -> vector<8x128xf32>
      %75 = math.log %74 : vector<8x128xf32>
      %cst_33 = arith.constant 1.000000e+00 : f32
      %76 = arith.divf %cst_33, %43 : f32
      %77 = vector.broadcast %76 : f32 to vector<8x128xf32>
      %78 = arith.mulf %75, %77 : vector<8x128xf32>
      %79 = math.exp %78 : vector<8x128xf32>
      %80 = arith.truncf %79 : vector<8x128xf32> to vector<8x128xbf16>
      %c0_34 = arith.constant 0 : index
      %c0_35 = arith.constant 0 : index
      %81 = vector.load %arg5[%c0_34, %c0_35] : memref<128x128xbf16, #tpu.memory_space<vmem>>, vector<128x128xbf16>
      %cst_36 = arith.constant dense<0.000000e+00> : vector<8x128xf32>
      %82 = tpu.matmul %80, %81, %cst_36 {dimension_numbers = #tpu.dot_dimension_numbers<[1], [0], [0], [1], [0, 0, 1, 1], [], []>} : vector<8x128xbf16>, vector<128x128xbf16>, vector<8x128xf32> -> vector<8x128xf32>
      %c0_37 = arith.constant 0 : index
      %c0_38 = arith.constant 0 : index
      %83 = vector.load %arg6[%c0_37, %c0_38] : memref<1x128xf32, #tpu.memory_space<vmem>>, vector<1x128xf32>
      %84 = vector.broadcast %83 : vector<1x128xf32> to vector<8x128xf32>
      %85 = arith.addf %82, %84 : vector<8x128xf32>
      %86 = arith.mulf %85, %85 : vector<8x128xf32>
      %cst_39 = arith.constant dense<0.000000e+00> : vector<8xf32>
      %87 = vector.multi_reduction <add>, %86, %cst_39 [1] : vector<8x128xf32> to vector<8xf32>
      %88 = vector.shape_cast %87 : vector<8xf32> to vector<8x1xf32>
      %89 = math.sqrt %88 : vector<8x1xf32>
      %cst_40 = arith.constant 9.99999996E-13 : f32
      %90 = vector.broadcast %cst_40 : f32 to vector<8x1xf32>
      %91 = arith.maximumf %89, %90 : vector<8x1xf32>
      %cst_41 = arith.constant 1.000000e+00 : f32
      %92 = vector.broadcast %cst_41 : f32 to vector<8x1xf32>
      %93 = arith.divf %92, %91 : vector<8x1xf32>
      %94 = vector.broadcast %93 : vector<8x1xf32> to vector<8x128xf32>
      %95 = arith.mulf %85, %94 : vector<8x128xf32>
      %c0_42 = arith.constant 0 : index
      %c0_43 = arith.constant 0 : index
      %96 = vector.load %arg11[%c0_42, %c0_43] : memref<8x128xf32, #tpu.memory_space<vmem>>, vector<8x128xf32>
      tpu.vector_store %arg11[%c0_42, %c0_43], %95 {strides = array<i32>} : memref<8x128xf32, #tpu.memory_space<vmem>>, vector<8x128xf32>,
    } else {
    }
    %c0 = arith.constant 0 : index
    %c0_1 = arith.constant 0 : index
    %3 = vector.load %arg11[%c0, %c0_1] : memref<8x128xf32, #tpu.memory_space<vmem>>, vector<8x128xf32>
    %4 = arith.truncf %3 : vector<8x128xf32> to vector<8x128xbf16>
    %c0_2 = arith.constant 0 : index
    %c0_3 = arith.constant 0 : index
    %5 = vector.load %arg8[%c0_2, %c0_3] : memref<128x128xbf16, #tpu.memory_space<vmem>>, vector<128x128xbf16>
    %cst = arith.constant dense<0.000000e+00> : vector<8x128xf32>
    %6 = tpu.matmul %4, %5, %cst {dimension_numbers = #tpu.dot_dimension_numbers<[1], [0], [0], [1], [0, 0, 1, 1], [], []>} : vector<8x128xbf16>, vector<128x128xbf16>, vector<8x128xf32> -> vector<8x128xf32>
    %c0_4 = arith.constant 0 : index
    %c0_5 = arith.constant 0 : index
    %7 = vector.load %arg9[%c0_4, %c0_5] : memref<1x128xf32, #tpu.memory_space<vmem>>, vector<1x128xf32>
    %8 = vector.broadcast %7 : vector<1x128xf32> to vector<8x128xf32>
    %9 = arith.mulf %6, %8 : vector<8x128xf32>
    %10 = tpu.iota {dimensions = array<i32: 1>} : vector<8x128xi32>
    %c128_i32 = arith.constant 128 : i32
    %11 = arith.muli %arg0, %c128_i32 : i32
    %12 = vector.broadcast %11 : i32 to vector<8x128xi32>
    %13 = arith.addi %10, %12 : vector<8x128xi32>
    %c0_6 = arith.constant 0 : index
    %c0_7 = arith.constant 0 : index
    %14 = vector.load %arg7[%c0_6, %c0_7] : memref<8x1xi32, #tpu.memory_space<vmem>>, vector<8x1xi32>
    %15 = vector.broadcast %14 : vector<8x1xi32> to vector<8x128xi32>
    %16 = arith.cmpi eq, %13, %15 : vector<8x128xi32>
    %cst_8 = arith.constant 0.000000e+00 : f32
    %17 = vector.broadcast %cst_8 : f32 to vector<8x128xf32>
    %18 = arith.select %16, %9, %17 : vector<8x128xi1>, vector<8x128xf32>
    %cst_9 = arith.constant dense<0.000000e+00> : vector<8xf32>
    %19 = vector.multi_reduction <add>, %18, %cst_9 [1] : vector<8x128xf32> to vector<8xf32>
    %20 = vector.shape_cast %19 : vector<8xf32> to vector<8x1xf32>
    %21 = arith.mulf %20, %20 : vector<8x1xf32>
    %cst_10 = arith.constant 1.000000e+00 : f32
    %22 = vector.broadcast %cst_10 : f32 to vector<8x1xf32>
    %23 = arith.subf %22, %21 : vector<8x1xf32>
    %cst_11 = arith.constant 0.000000e+00 : f32
    %24 = vector.broadcast %cst_11 : f32 to vector<8x1xf32>
    %25 = arith.maximumf %23, %24 : vector<8x1xf32>
    %26 = math.sqrt %25 : vector<8x1xf32>
    %cst_12 = arith.constant 0.87758255 : f32
    %27 = vector.broadcast %cst_12 : f32 to vector<8x1xf32>
    %28 = arith.mulf %20, %27 : vector<8x1xf32>
    %cst_13 = arith.constant 0.47942555 : f32
    %29 = vector.broadcast %cst_13 : f32 to vector<8x1xf32>
    %30 = arith.mulf %26, %29 : vector<8x1xf32>
    %31 = arith.subf %28, %30 : vector<8x1xf32>
    %cst_14 = arith.constant -0.87758255 : f32
    %32 = vector.broadcast %cst_14 : f32 to vector<8x1xf32>
    %33 = arith.cmpf ogt, %20, %32 : vector<8x1xf32>
    %cst_15 = arith.constant 0.239712775 : f32
    %34 = vector.broadcast %cst_15 : f32 to vector<8x1xf32>
    %35 = arith.subf %20, %34 : vector<8x1xf32>
    %36 = arith.select %33, %31, %35 : vector<8x1xi1>, vector<8x1xf32>
    %37 = vector.shape_cast %36 : vector<8x1xf32> to vector<8x1xf32>
    %38 = vector.broadcast %37 : vector<8x1xf32> to vector<8x128xf32>
    %39 = arith.select %16, %38, %9 : vector<8x128xi1>, vector<8x128xf32>
    %cst_16 = arith.constant 3.000000e+01 : f32
    %40 = vector.broadcast %cst_16 : f32 to vector<8x128xf32>
    %41 = arith.mulf %39, %40 : vector<8x128xf32>
    %c0_17 = arith.constant 0 : index
    %c0_18 = arith.constant 0 : index
    %42 = vector.load %arg10[%c0_17, %c0_18] : memref<8x128xf32, #tpu.memory_space<vmem>>, vector<8x128xf32>
    tpu.vector_store %arg10[%c0_17, %c0_18], %41 {strides = array<i32>} : memref<8x128xf32, #tpu.memory_space<vmem>>, vector<8x128xf32>,
    return
  }
  func.func @transform_0(%arg0: i32) -> i32 {
    %c0_i32 = arith.constant 0 : i32
    %c0_i32_0 = arith.constant 0 : i32
    return %c0_i32 : i32
  }
  func.func @transform_1(%arg0: i32) -> (i32, i32) {
    %c0_i32 = arith.constant 0 : i32
    %c0_i32_0 = arith.constant 0 : i32
    %c0_i32_1 = arith.constant 0 : i32
    return %c0_i32, %c0_i32_0 : i32, i32
  }
  func.func @transform_2(%arg0: i32) -> (i32, i32) {
    %c0_i32 = arith.constant 0 : i32
    %c0_i32_0 = arith.constant 0 : i32
    %c0_i32_1 = arith.constant 0 : i32
    return %c0_i32, %c0_i32_0 : i32, i32
  }
  func.func @transform_3(%arg0: i32) -> (i32, i32) {
    %c0_i32 = arith.constant 0 : i32
    %c0_i32_0 = arith.constant 0 : i32
    %c0_i32_1 = arith.constant 0 : i32
    return %c0_i32, %c0_i32_0 : i32, i32
  }
  func.func @transform_4(%arg0: i32) -> (i32, i32) {
    %c0_i32 = arith.constant 0 : i32
    %c0_i32_0 = arith.constant 0 : i32
    %c0_i32_1 = arith.constant 0 : i32
    return %c0_i32, %c0_i32_0 : i32, i32
  }
  func.func @transform_5(%arg0: i32) -> (i32, i32) {
    %c0_i32 = arith.constant 0 : i32
    %c0_i32_0 = arith.constant 0 : i32
    %c0_i32_1 = arith.constant 0 : i32
    return %c0_i32, %c0_i32_0 : i32, i32
  }
  func.func @transform_6(%arg0: i32) -> (i32, i32) {
    %c0_i32 = arith.constant 0 : i32
    %c0_i32_0 = arith.constant 0 : i32
    %c0_i32_1 = arith.constant 0 : i32
    return %c0_i32, %c0_i32_0 : i32, i32
  }
  func.func @transform_7(%arg0: i32) -> (i32, i32) {
    %c0_i32 = arith.constant 0 : i32
    %c0_i32_0 = arith.constant 0 : i32
    return %c0_i32, %arg0 : i32, i32
  }
  func.func @transform_8(%arg0: i32) -> (i32, i32) {
    %c0_i32 = arith.constant 0 : i32
    %c0_i32_0 = arith.constant 0 : i32
    return %c0_i32, %arg0 : i32, i32
  }
  func.func @transform_9(%arg0: i32) -> (i32, i32) {
    %c0_i32 = arith.constant 0 : i32
    %c0_i32_0 = arith.constant 0 : i32
    return %c0_i32, %arg0 : i32, i32
  }
}

</mosaic_0001>

<bundles_post_ra>
// kernel: tpu_custom_call.1
= control target key start
LH: loop header
LB: loop body
LE: loop exit
PB: predicated region body
PF: predicated region fallthrough
CT: control target
= control target key end

     0   :  { %s10505_s0 = inlined_call_operand.<no memory space> [shape: f32[1], index: 0, kind: input, shape index: {}]   ;;  %s10506_s1 = inlined_call_operand.vmem [shape: bf16[2048,3], index: 1, kind: input, shape index: {}]   ;;  %s10507_s2 = inlined_call_operand.vmem [shape: bf16[3,128], index: 2, kind: input, shape index: {}]   ;;  %s10508_s3 = inlined_call_operand.vmem [shape: f32[1,128], index: 3, kind: input, shape index: {}]   ;;  %s10509_s4 = inlined_call_operand.vmem [shape: bf16[128,128], index: 4, kind: input, shape index: {}]   ;;  %s10510_s5 = inlined_call_operand.vmem [shape: f32[1,128], index: 5, kind: input, shape index: {}]   ;;  %s10511_s6 = inlined_call_operand.vmem [shape: s32[8,1], index: 6, kind: input, shape index: {}]   ;;  %s10512_s7 = inlined_call_operand.vmem [shape: bf16[128,256], index: 7, kind: input, shape index: {}]   ;;  %s10513_s8 = inlined_call_operand.vmem [shape: f32[1,256], index: 8, kind: input, shape index: {}]   ;;  %s10514_s9 = inlined_call_operand.hbm [shape: f32[8,256], index: 9, kind: output, shape index: {}]  }
   0x1   :  { %10533 = sst [smem:[#allocation55_spill]] %s10507_s2 }
   0x2   :  { %14 = sst [smem:[#allocation3]] %s10505_s0 }
   0x3   :  { %15 = vsyncpa [#allocation6], 0 }
   0x4   :  { %17 = vsyncpa [#allocation6 + $0x1], 0  ;;  %s7824_s11 = smov 0   ;;  %s7826_s12 = smov 0  }
   0x5   :  { %s7828_s13 = smov 0   ;;  %s7830_s14 = smov 0  }
   0x6 LB: > { %s7845_s0 = sadd.s32 4294967295, %s7761_s14   ;;  %s5519_s15 = sadd.s32 4294967294, %s7761_s14   ;;  %s7761_s14 = sphi %s7830_s14, %s10708_s14   ;;  %s7757_s13 = sphi %s7828_s13, %s10707_s13   ;;  %s7753_s12 = sphi %s7826_s12, %s10706_s12   ;;  %s7749_s11 = sphi %s7824_s11, %s10705_s11  }
   0x7   : > { %s7849_s16 = sadd.s32 1, %s7761_s14   ;;  %s177_s17 = sadd.s32 1, %s7757_s13 }
   0x8   : > { %s174_s18 = ssub.s32 %s7761_s14, %s7849_s16  ;;  %p184_p0 = scmp.ne.s32.totalorder %s7757_s13, %s7753_s12 }
   0x9   : > { %p175_p1 = scmp.eq.s32.totalorder %s174_s18, 0  ;;  %p185_p2 = scmp.eq.s32.totalorder %s7761_s14, 0 }
   0xa   : > { %p240_p3 = scmp.eq.s32.totalorder %s7845_s0, 1  ;;  %p245_p4 = scmp.ne.s32.totalorder %s7753_s12, %s7749_s11 }
   0xb   : > { %s7861_s19 = scalar_select %p175_p1, %s7757_s13, %s177_s17  }
   0xc   : > { %p186_p5 = por %p185_p2, %p184_p0  ;;  %p7863_p6 = por %p240_p3, %p184_p0 }
   0xd   : > { %p246_p7 = scmp.eq.s32.totalorder %s5519_s15, 1  ;;  %p5521_p9 = scmp.ge.s32.totalorder %s7761_s14, 2 }
   0xf   : > { %p7867_p8 = por %p246_p7, %p245_p4  ;;  %283 = sbr.rel (%p5521_p9) target bundleno = 36 (0x24), region = 44 }
  0x16   : > { %286 = sbr.rel (!%p186_p5) target bundleno = 36 (0x24), region = 48  ;;  %s288_s22 = sand.u32 (%p186_p5), 1, %s7757_s13  }
  0x17   : > { %s5523_s23 = sshll.u32 (%p186_p5), %s7761_s14, 2  ;;  %s5522_s24 = sshll.u32 (%p186_p5), %s288_s22, 6 }
  0x18   : > { %s7879_s27 = scalar_lea.vmem (%p186_p5), %s10512_s7, %s5523_s23  ;;  %s290_s28 = scalar_lea.vmem (%p186_p5), [#allocation4], %s5522_s24 }
  0x19   : > { %v308_v0 = vld [vmem:[%s7879_s27] sm:$0xf] (%p186_p5)  ;;  %v310_v1 = vld [vmem:[%s7879_s27 + $0x8] sm:$0xf] (%p186_p5)  ;;  %v312_v2 = vld [vmem:[%s7879_s27 + $0x10] sm:$0xf] (%p186_p5) }
  0x1a   : > { %309 = vst [vmem:[%s290_s28] sm:$0xf] (%p186_p5), %v308_v0  ;;  %311 = vst [vmem:[%s290_s28 + $0x4] sm:$0xf] (%p186_p5), %v310_v1  ;;  %v314_v3 = vld [vmem:[%s7879_s27 + $0x18] sm:$0xf] (%p186_p5) }
  0x1b   : > { %v316_v4 = vld [vmem:[%s7879_s27 + $0x20] sm:$0xf] (%p186_p5)  ;;  %313 = vst [vmem:[%s290_s28 + $0x8] sm:$0xf] (%p186_p5), %v312_v2  ;;  %315 = vst [vmem:[%s290_s28 + $0xc] sm:$0xf] (%p186_p5), %v314_v3 }
  0x1c   : > { %317 = vst [vmem:[%s290_s28 + $0x10] sm:$0xf] (%p186_p5), %v316_v4  ;;  %v318_v5 = vld [vmem:[%s7879_s27 + $0x28] sm:$0xf] (%p186_p5)  ;;  %v320_v6 = vld [vmem:[%s7879_s27 + $0x30] sm:$0xf] (%p186_p5) }
  0x1d   : > { %v322_v7 = vld [vmem:[%s7879_s27 + $0x38] sm:$0xf]  ;;  %319 = vst [vmem:[%s290_s28 + $0x14] sm:$0xf] %v318_v5  ;;  %321 = vst [vmem:[%s290_s28 + $0x18] sm:$0xf] %v320_v6 }
  0x1e   : > { %323 = vst [vmem:[%s290_s28 + $0x1c] sm:$0xf] %v322_v7  ;;  %v324_v8 = vld [vmem:[%s7879_s27 + $0x40] sm:$0xf]  ;;  %v326_v9 = vld [vmem:[%s7879_s27 + $0x48] sm:$0xf] }
  0x1f   : > { %v328_v10 = vld [vmem:[%s7879_s27 + $0x50] sm:$0xf]  ;;  %325 = vst [vmem:[%s290_s28 + $0x20] sm:$0xf] %v324_v8  ;;  %327 = vst [vmem:[%s290_s28 + $0x24] sm:$0xf] %v326_v9 }
  0x20   : > { %329 = vst [vmem:[%s290_s28 + $0x28] sm:$0xf] %v328_v10  ;;  %v330_v11 = vld [vmem:[%s7879_s27 + $0x58] sm:$0xf]  ;;  %v332_v12 = vld [vmem:[%s7879_s27 + $0x60] sm:$0xf] }
  0x21   : > { %v334_v13 = vld [vmem:[%s7879_s27 + $0x68] sm:$0xf]  ;;  %331 = vst [vmem:[%s290_s28 + $0x2c] sm:$0xf] %v330_v11  ;;  %333 = vst [vmem:[%s290_s28 + $0x30] sm:$0xf] %v332_v12 }
  0x22   : > { %335 = vst [vmem:[%s290_s28 + $0x34] sm:$0xf] %v334_v13  ;;  %v336_v14 = vld [vmem:[%s7879_s27 + $0x70] sm:$0xf]  ;;  %v338_v15 = vld [vmem:[%s7879_s27 + $0x78] sm:$0xf] }
  0x23   : > { %337 = vst [vmem:[%s290_s28 + $0x38] sm:$0xf] %v336_v14  ;;  %339 = vst [vmem:[%s290_s28 + $0x3c] sm:$0xf] %v338_v15 }
  0x24 PF: > { %p5524_p10 = scmp.ge.s32.totalorder %s7761_s14, 1  ;;  %p399_p11 = scmp.lt.s32.totalorder %s7761_s14, 3 }
  0x26   : > { %p400_p12 = pnand %p5524_p10, %p399_p11 }
  0x27   : > { %s7900_s29 = sand.u32 (!%p400_p12), 1, %s7753_s12   ;;  %p444_p13 = scmp.lt.s32.totalorder (!%p400_p12), %s7845_s0, 1 }
  0x28   : > { %403 = sbr.rel (%p400_p12) target bundleno = 1954 (0x7a2), region = 93  ;;  %s5525_s30 = sshll.u32 (!%p400_p12), %s7900_s29, 6 }
  0x29   : > { %s5526_s10 = sshll.u32 (!%p400_p12), %s7900_s29, 3  ;;  %s7912_s23 = scalar_lea.vmem (!%p400_p12), [#allocation4], %s5525_s30 }
  0x2a   : > { %s7914_s24 = scalar_lea.vmem (!%p400_p12), [#allocation5], %s5526_s10  ;;  %p5527_p0 = scmp.ne.s32.totalorder (!%p400_p12), %s7845_s0, 0 }
  0x2f   : > { %s7906_s15 = scalar_select %p444_p13, %s7845_s0, 1 }
  0x30   : > { %451 = sbr.rel (%p5527_p0) target bundleno = 1521 (0x5f1), region = 101 }
  0x37   : > { %s10536_s2 = sld [smem:[#allocation55_spill]]  ;;  %vm1742_vm0 = vcmask 1040384   ;;  %vm1743_vm1 = vcmask 1041408   ;;  %v6512_v17 = vld [vmem:[%s10506_s1] sm:$0xff]   ;;  %v7763_v18 = vmov 65535   ;;  %vm1357_vm2 = vcmask 23552  }
  0x38   : > { %v1744_v19 = vsel %vm1742_vm0, 4294967295, %v7763_v18  ;;  %6166 = vmatprep.mubr.msk.bf16.mxu0 %vm1357_vm2, %v6512_v17  ;;  %v6513_v22 = vld [vmem:[%s10506_s1 + $0x8] sm:$0xff]   ;;  %v6514_v23 = vld [vmem:[%s10506_s1 + $0x10] sm:$0xff]   ;;  %v6515_v24 = vld [vmem:[%s10506_s1 + $0x18] sm:$0xff]   ;;  %s452_s25 = sld [smem:[#allocation3]] }
  0x39   : > { %v1745_v20 = vsel %vm1743_vm1, %v1744_v19, 0  ;;  %v6516_v25 = vld [vmem:[%s10506_s1 + $0x20] sm:$0xff]   ;;  %v6517_v26 = vld [vmem:[%s10506_s1 + $0x28] sm:$0xff]   ;;  %v6518_v27 = vld [vmem:[%s10506_s1 + $0x30] sm:$0xff]  }
  0x3a   : > { %v6519_v28 = vld [vmem:[%s10506_s1 + $0x38] sm:$0xff]   ;;  %v6520_v29 = vld [vmem:[%s10506_s1 + $0x40] sm:$0xff]   ;;  %v6521_v30 = vld [vmem:[%s10506_s1 + $0x48] sm:$0xff]  }
  0x3b   : > { %v6522_v31 = vld [vmem:[%s10506_s1 + $0x50] sm:$0xff]   ;;  %v6523_v32 = vld [vmem:[%s10506_s1 + $0x58] sm:$0xff]   ;;  %v6524_v33 = vld [vmem:[%s10506_s1 + $0x60] sm:$0xff]  }
  0x3c   : > { %v6525_v34 = vld [vmem:[%s10506_s1 + $0x68] sm:$0xff]   ;;  %v6526_v35 = vld [vmem:[%s10506_s1 + $0x70] sm:$0xff]   ;;  %v6527_v36 = vld [vmem:[%s10506_s1 + $0x78] sm:$0xff]  }
  0x3d   : > { %v709_v16 = vld [vmem:[%s10536_s2] sm:$0x3]  ;;  %v6529_v38 = vld [vmem:[%s10506_s1 + $0x88] sm:$0xff]   ;;  %v6530_v39 = vld [vmem:[%s10506_s1 + $0x90] sm:$0xff]  }
  0x3e   : > { %v1747_v21 = vand.u32 %v1745_v20, %v709_v16  ;;  %v6528_v37 = vld [vmem:[%s10506_s1 + $0x80] sm:$0xff]   ;;  %v6531_v40 = vld [vmem:[%s10506_s1 + $0x98] sm:$0xff]   ;;  %v6533_v42 = vld [vmem:[%s10506_s1 + $0xa8] sm:$0xff]  }
  0x3f   : > { %v6532_v41 = vld [vmem:[%s10506_s1 + $0xa0] sm:$0xff]   ;;  %v6534_v43 = vld [vmem:[%s10506_s1 + $0xb0] sm:$0xff]   ;;  %v6535_v44 = vld [vmem:[%s10506_s1 + $0xb8] sm:$0xff]  }
  0x40   : > { %6164 = vmatprep.subr.bf16.mxu0 %v1747_v21  ;;  %6462 = vmatprep.subr.bf16.mxu1 %v1747_v21  ;;  %v6536_v45 = vld [vmem:[%s10506_s1 + $0xc0] sm:$0xff]   ;;  %v6537_v46 = vld [vmem:[%s10506_s1 + $0xc8] sm:$0xff]   ;;  %v6538_v47 = vld [vmem:[%s10506_s1 + $0xd0] sm:$0xff]  }
  0x41   : > { %6165 = vmatpush3.bf16.msra.mxu0 %v1747_v21  ;;  %6463 = vmatpush3.bf16.msra.mxu1 %v1747_v21  ;;  %v6570_v48 = vld [vmem:[%s10506_s1 + $0x310] sm:$0xff]   ;;  %v6539_v49 = vld [vmem:[%s10506_s1 + $0xd8] sm:$0xff]   ;;  %v6540_v50 = vld [vmem:[%s10506_s1 + $0xe0] sm:$0xff]  }
  0x42   : > { %6362 = vmatprep.mubr.msk.bf16.mxu1 %vm1357_vm2, %v6570_v48  ;;  %v6571_v51 = vld [vmem:[%s10506_s1 + $0x318] sm:$0xff]   ;;  %v6541_v52 = vld [vmem:[%s10506_s1 + $0xe8] sm:$0xff]   ;;  %v6542_v53 = vld [vmem:[%s10506_s1 + $0xf0] sm:$0xff]  }
  0x43   : > { %v6574_v54 = vld [vmem:[%s10506_s1 + $0x320] sm:$0xff]   ;;  %v6575_v55 = vld [vmem:[%s10506_s1 + $0x328] sm:$0xff]   ;;  %v6543_v56 = vld [vmem:[%s10506_s1 + $0xf8] sm:$0xff]  }
  0x44   : > { %6167 = vmatmul.mubr.msk.bf16.vlgmr.msra.gmra.mrb[0].mxu0 %vm1357_vm2, %v6513_v22  ;;  %6363 = vmatmul.mubr.msk.bf16.vlgmr.msra.gmra.mrb[0].mxu1 %vm1357_vm2, %v6571_v51  ;;  %v6544_v57 = vld [vmem:[%s10506_s1 + $0x100] sm:$0xff]   ;;  %v6578_v58 = vld [vmem:[%s10506_s1 + $0x330] sm:$0xff]   ;;  %v6579_v59 = vld [vmem:[%s10506_s1 + $0x338] sm:$0xff]  }
  0x45   : > { %6170 = vmatprep.mubr.msk.bf16.mxu0 %vm1357_vm2, %v6514_v23  ;;  %6366 = vmatprep.mubr.msk.bf16.mxu1 %vm1357_vm2, %v6574_v54  ;;  %v6545_v60 = vld [vmem:[%s10506_s1 + $0x108] sm:$0xff]   ;;  %v6546_v61 = vld [vmem:[%s10506_s1 + $0x110] sm:$0xff]   ;;  %v6582_v62 = vld [vmem:[%s10506_s1 + $0x340] sm:$0xff]  }
  0x46   : > { %v6583_v63 = vld [vmem:[%s10506_s1 + $0x348] sm:$0xff]   ;;  %v6547_v0 = vld [vmem:[%s10506_s1 + $0x118] sm:$0xff]   ;;  %v6548_v1 = vld [vmem:[%s10506_s1 + $0x120] sm:$0xff]  }
  0x47   : > { %v6586_v2 = vld [vmem:[%s10506_s1 + $0x350] sm:$0xff]   ;;  %v6587_v3 = vld [vmem:[%s10506_s1 + $0x358] sm:$0xff]   ;;  %v6549_v4 = vld [vmem:[%s10506_s1 + $0x128] sm:$0xff]  }
  0x48   : > { %v6550_v5 = vld [vmem:[%s10506_s1 + $0x130] sm:$0xff]   ;;  %v6590_v6 = vld [vmem:[%s10506_s1 + $0x360] sm:$0xff]   ;;  %v6591_v7 = vld [vmem:[%s10506_s1 + $0x368] sm:$0xff]  }
  0x49   : > { %v6551_v8 = vld [vmem:[%s10506_s1 + $0x138] sm:$0xff]   ;;  %v6552_v9 = vld [vmem:[%s10506_s1 + $0x140] sm:$0xff]   ;;  %v6594_v10 = vld [vmem:[%s10506_s1 + $0x370] sm:$0xff]  }
  0x4a   : > { %v6595_v11 = vld [vmem:[%s10506_s1 + $0x378] sm:$0xff]   ;;  %v6553_v12 = vld [vmem:[%s10506_s1 + $0x148] sm:$0xff]   ;;  %v6554_v13 = vld [vmem:[%s10506_s1 + $0x150] sm:$0xff]  }
  0x4b   : > { %v6598_v14 = vld [vmem:[%s10506_s1 + $0x380] sm:$0xff]   ;;  %v6599_v15 = vld [vmem:[%s10506_s1 + $0x388] sm:$0xff]   ;;  %v6555_v16 = vld [vmem:[%s10506_s1 + $0x158] sm:$0xff]  }
  0x4c   : > { %6171 = vmatmul.mubr.msk.bf16.gmra.mrb[4].mxu0 %vm1357_vm2, %v6515_v24  ;;  %6367 = vmatmul.mubr.msk.bf16.gmra.mrb[4].mxu1 %vm1357_vm2, %v6575_v55  ;;  %v6556_v17 = vld [vmem:[%s10506_s1 + $0x160] sm:$0xff]   ;;  %v6602_v18 = vld [vmem:[%s10506_s1 + $0x390] sm:$0xff]   ;;  %v6603_v19 = vld [vmem:[%s10506_s1 + $0x398] sm:$0xff]  }
  0x4d   : > { %6174 = vmatprep.mubr.msk.bf16.mxu0 %vm1357_vm2, %v6516_v25  ;;  %6370 = vmatprep.mubr.msk.bf16.mxu1 %vm1357_vm2, %v6578_v58  ;;  %v6557_v20 = vld [vmem:[%s10506_s1 + $0x168] sm:$0xff]   ;;  %v6558_v21 = vld [vmem:[%s10506_s1 + $0x170] sm:$0xff]   ;;  %v6559_v22 = vld [vmem:[%s10506_s1 + $0x178] sm:$0xff]  }
  0x4e   : > { %v6560_v23 = vld [vmem:[%s10506_s1 + $0x180] sm:$0xff]   ;;  %v6561_v24 = vld [vmem:[%s10506_s1 + $0x188] sm:$0xff]   ;;  %v6562_v25 = vld [vmem:[%s10506_s1 + $0x190] sm:$0xff]  }
  0x4f   : > { %v6614_v51 = vld [vmem:[%s10506_s1 + $0x3c0] sm:$0xff]   ;;  %v6569_v58 = vld [vmem:[%s10506_s1 + $0x1c8] sm:$0xff]  }
  0x54   : > { %6175 = vmatmul.mubr.msk.bf16.gmra.mrb[8].mxu0 %vm1357_vm2, %v6517_v26  ;;  %6371 = vmatmul.mubr.msk.bf16.gmra.mrb[8].mxu1 %vm1357_vm2, %v6579_v59  ;;  %v6563_v26 = vld [vmem:[%s10506_s1 + $0x198] sm:$0xff]  }
  0x55   : > { %6178 = vmatprep.mubr.msk.bf16.mxu0 %vm1357_vm2, %v6518_v27  ;;  %6374 = vmatprep.mubr.msk.bf16.mxu1 %vm1357_vm2, %v6582_v62  ;;  %v6564_v27 = vld [vmem:[%s10506_s1 + $0x1a0] sm:$0xff]  }
  0x5c   : > { %6179 = vmatmul.mubr.msk.bf16.gmra.mrb[12].mxu0 %vm1357_vm2, %v6519_v28  ;;  %6375 = vmatmul.mubr.msk.bf16.gmra.mrb[12].mxu1 %vm1357_vm2, %v6583_v63  ;;  %v6606_v28 = vld [vmem:[%s10506_s1 + $0x3a0] sm:$0xff]  }
  0x5d   : > { %6182 = vmatprep.mubr.msk.bf16.mxu0 %vm1357_vm2, %v6520_v29  ;;  %6378 = vmatprep.mubr.msk.bf16.mxu1 %vm1357_vm2, %v6586_v2  ;;  %v6607_v29 = vld [vmem:[%s10506_s1 + $0x3a8] sm:$0xff]  }
  0x64   : > { %6183 = vmatmul.mubr.msk.bf16.gmra.mrb[16].mxu0 %vm1357_vm2, %v6521_v30  ;;  %6379 = vmatmul.mubr.msk.bf16.gmra.mrb[16].mxu1 %vm1357_vm2, %v6587_v3  ;;  %v6565_v30 = vld [vmem:[%s10506_s1 + $0x1a8] sm:$0xff]  }
  0x65   : > { %6186 = vmatprep.mubr.msk.bf16.mxu0 %vm1357_vm2, %v6522_v31  ;;  %6382 = vmatprep.mubr.msk.bf16.mxu1 %vm1357_vm2, %v6590_v6  ;;  %v6566_v31 = vld [vmem:[%s10506_s1 + $0x1b0] sm:$0xff]  }
  0x6c   : > { %6187 = vmatmul.mubr.msk.bf16.gmra.mrb[20].mxu0 %vm1357_vm2, %v6523_v32  ;;  %6383 = vmatmul.mubr.msk.bf16.gmra.mrb[20].mxu1 %vm1357_vm2, %v6591_v7  ;;  %v6610_v32 = vld [vmem:[%s10506_s1 + $0x3b0] sm:$0xff]  }
  0x6d   : > { %6190 = vmatprep.mubr.msk.bf16.mxu0 %vm1357_vm2, %v6524_v33  ;;  %6386 = vmatprep.mubr.msk.bf16.mxu1 %vm1357_vm2, %v6594_v10  ;;  %v8225_v33 = vld [vmem:[%s10508_s3] ss:$0 sm:$0xff] }
  0x74   : > { %6191 = vmatmul.mubr.msk.bf16.gmra.mrb[24].mxu0 %vm1357_vm2, %v6525_v34  ;;  %6387 = vmatmul.mubr.msk.bf16.gmra.mrb[24].mxu1 %vm1357_vm2, %v6595_v11  ;;  %v6611_v34 = vld [vmem:[%s10506_s1 + $0x3b8] sm:$0xff]  }
  0x75   : > { %6194 = vmatprep.mubr.msk.bf16.mxu0 %vm1357_vm2, %v6526_v35  ;;  %6390 = vmatprep.mubr.msk.bf16.mxu1 %vm1357_vm2, %v6598_v14 }
  0x7c   : > { %6195 = vmatmul.mubr.msk.bf16.gmra.mrb[28].mxu0 %vm1357_vm2, %v6527_v36  ;;  %6391 = vmatmul.mubr.msk.bf16.gmra.mrb[28].mxu1 %vm1357_vm2, %v6599_v15 }
  0x7d   : > { %6198 = vmatprep.mubr.msk.bf16.mxu0 %vm1357_vm2, %v6528_v37  ;;  %6394 = vmatprep.mubr.msk.bf16.mxu1 %vm1357_vm2, %v6602_v18 }
  0x84   : > { %6199 = vmatmul.mubr.msk.bf16.gmra.mrb[32].mxu0 %vm1357_vm2, %v6529_v38  ;;  %6395 = vmatmul.mubr.msk.bf16.gmra.mrb[32].mxu1 %vm1357_vm2, %v6603_v19  ;;  %v6567_v38 = vld [vmem:[%s10506_s1 + $0x1b8] sm:$0xff]  }
  0x85   : > { %6202 = vmatprep.mubr.msk.bf16.mxu0 %vm1357_vm2, %v6530_v39  ;;  %6398 = vmatprep.mubr.msk.bf16.mxu1 %vm1357_vm2, %v6606_v28 }
  0x8c   : > { %6203 = vmatmul.mubr.msk.bf16.gmra.mrb[36].mxu0 %vm1357_vm2, %v6531_v40  ;;  %6399 = vmatmul.mubr.msk.bf16.gmra.mrb[36].mxu1 %vm1357_vm2, %v6607_v29 }
  0x8d   : > { %6206 = vmatprep.mubr.msk.bf16.mxu0 %vm1357_vm2, %v6532_v41  ;;  %6402 = vmatprep.mubr.msk.bf16.mxu1 %vm1357_vm2, %v6610_v32  ;;  %v6568_v41 = vld [vmem:[%s10506_s1 + $0x1c0] sm:$0xff]  }
  0x94   : > { %6207 = vmatmul.mubr.msk.bf16.gmra.mrb[40].mxu0 %vm1357_vm2, %v6533_v42  ;;  %6403 = vmatmul.mubr.msk.bf16.gmra.mrb[40].mxu1 %vm1357_vm2, %v6611_v34 }
  0x95   : > { %6210 = vmatprep.mubr.msk.bf16.mxu0 %vm1357_vm2, %v6534_v43  ;;  %6406 = vmatprep.mubr.msk.bf16.mxu1 %vm1357_vm2, %v6614_v51 }
  0x9c   : > { %6211 = vmatmul.mubr.msk.bf16.gmra.mrb[44].mxu0 %vm1357_vm2, %v6535_v44 }
  0x9d   : > { %6214 = vmatprep.mubr.msk.bf16.mxu0 %vm1357_vm2, %v6536_v45 }
  0xa4   : > { %6215 = vmatmul.mubr.msk.bf16.gmra.mrb[48].mxu0 %vm1357_vm2, %v6537_v46 }
  0xa5   : > { %6218 = vmatprep.mubr.msk.bf16.mxu0 %vm1357_vm2, %v6538_v47 }
  0xac   : > { %6219 = vmatmul.mubr.msk.bf16.gmra.mrb[52].mxu0 %vm1357_vm2, %v6539_v49 }
  0xad   : > { %6222 = vmatprep.mubr.msk.bf16.mxu0 %vm1357_vm2, %v6540_v50 }
  0xb4   : > { %6223 = vmatmul.mubr.msk.bf16.gmra.mrb[56].mxu0 %vm1357_vm2, %v6541_v52 }
  0xb5   : > { %6226 = vmatprep.mubr.msk.bf16.mxu0 %vm1357_vm2, %v6542_v53  ;;  %v6615_v53 = vld [vmem:[%s10506_s1 + $0x3c8] sm:$0xff]  }
  0xb6   : > { %6407 = vmatmul.mubr.msk.bf16.gmra.mrb[44].mxu1 %vm1357_vm2, %v6615_v53 }
  0xbc   : > { %6227 = vmatmul.mubr.msk.bf16.gmra.mrb[60].mxu0 %vm1357_vm2, %v6543_v56 }
  0xbd   : > { %6230 = vmatprep.mubr.msk.bf16.mxu0 %vm1357_vm2, %v6544_v57 }
  0xc4   : > { %6231 = vmatmul.mubr.msk.bf16.gmra.mrb[64].mxu0 %vm1357_vm2, %v6545_v60 }
  0xc5   : > { %6234 = vmatprep.mubr.msk.bf16.mxu0 %vm1357_vm2, %v6546_v61  ;;  %v6572_v61 = vld [vmem:[%s10506_s1 + $0x1d0] sm:$0xff]  }
  0xcc   : > { %6235 = vmatmul.mubr.msk.bf16.gmra.mrb[68].mxu0 %vm1357_vm2, %v6547_v0 }
  0xcd   : > { %6238 = vmatprep.mubr.msk.bf16.mxu0 %vm1357_vm2, %v6548_v1  ;;  %v6618_v1 = vld [vmem:[%s10506_s1 + $0x3d0] sm:$0xff]  }
  0xce   : > { %6410 = vmatprep.mubr.msk.bf16.mxu1 %vm1357_vm2, %v6618_v1 }
  0xd4   : > { %6239 = vmatmul.mubr.msk.bf16.gmra.mrb[72].mxu0 %vm1357_vm2, %v6549_v4 }
  0xd5   : > { %6242 = vmatprep.mubr.msk.bf16.mxu0 %vm1357_vm2, %v6550_v5 }
  0xdc   : > { %6243 = vmatmul.mubr.msk.bf16.gmra.mrb[76].mxu0 %vm1357_vm2, %v6551_v8  ;;  %v6619_v8 = vld [vmem:[%s10506_s1 + $0x3d8] sm:$0xff]  }
  0xdd   : > { %6246 = vmatprep.mubr.msk.bf16.mxu0 %vm1357_vm2, %v6552_v9  ;;  %6411 = vmatmul.mubr.msk.bf16.gmra.mrb[48].mxu1 %vm1357_vm2, %v6619_v8 }
  0xe4   : > { %6247 = vmatmul.mubr.msk.bf16.gmra.mrb[80].mxu0 %vm1357_vm2, %v6553_v12 }
  0xe5   : > { %6250 = vmatprep.mubr.msk.bf16.mxu0 %vm1357_vm2, %v6554_v13  ;;  %v8272_v13 = vstv %s452_s25 }
  0xec   : > { %6251 = vmatmul.mubr.msk.bf16.gmra.mrb[84].mxu0 %vm1357_vm2, %v6555_v16  ;;  %v6573_v16 = vld [vmem:[%s10506_s1 + $0x1d8] sm:$0xff]  }
  0xed   : > { %6254 = vmatprep.mubr.msk.bf16.mxu0 %vm1357_vm2, %v6556_v17 }
  0xf4   : > { %6255 = vmatmul.mubr.msk.bf16.gmra.mrb[88].mxu0 %vm1357_vm2, %v6557_v20 }
  0xf5   : > { %6258 = vmatprep.mubr.msk.bf16.mxu0 %vm1357_vm2, %v6558_v21  ;;  %v6576_v21 = vld [vmem:[%s10506_s1 + $0x1e0] sm:$0xff]  }
  0xfc   : > { %6259 = vmatmul.mubr.msk.bf16.gmra.mrb[92].mxu0 %vm1357_vm2, %v6559_v22 }
  0xfd   : > { %6262 = vmatprep.mubr.msk.bf16.mxu0 %vm1357_vm2, %v6560_v23 }
 0x104   : > { %6263 = vmatmul.mubr.msk.bf16.gmra.mrb[96].mxu0 %vm1357_vm2, %v6561_v24 }
 0x105   : > { %6266 = vmatprep.mubr.msk.bf16.mxu0 %vm1357_vm2, %v6562_v25 }
 0x10c   : > { %6267 = vmatmul.mubr.msk.bf16.gmra.mrb[100].mxu0 %vm1357_vm2, %v6563_v26 }
 0x10d   : > { %6270 = vmatprep.mubr.msk.bf16.mxu0 %vm1357_vm2, %v6564_v27  ;;  %v6622_v27 = vld [vmem:[%s10506_s1 + $0x3e0] sm:$0xff]  }
 0x10e   : > { %6414 = vmatprep.mubr.msk.bf16.mxu1 %vm1357_vm2, %v6622_v27 }
 0x114   : > { %6271 = vmatmul.mubr.msk.bf16.gmra.mrb[104].mxu0 %vm1357_vm2, %v6565_v30 }
 0x115   : > { %6274 = vmatprep.mubr.msk.bf16.mxu0 %vm1357_vm2, %v6566_v31 }
 0x117   : > { %v6168_v35 = vpop.f32.mrb[0].mxu0 }
 0x118   : > { %v1792_v36 = vadd.f32 %v6168_v35, %v8225_v33  ;;  %v1783_v37 = vpop.f32.mrb[1].mxu0 }
 0x119   : > { %v1784_v39 = vadd.f32 %v8225_v33, %v1783_v37  ;;  %v6169_v40 = vpop.f32.mrb[2].mxu0 }
 0x11a   : > { %v2808_v42 = vmax.f32 %v1792_v36, 0.0  ;;  %v1795_v43 = vadd.f32 %v6169_v40, %v8225_v33  ;;  %v1786_v44 = vpop.f32.mrb[3].mxu0 }
 0x11b   : > { %v2806_v45 = vmax.f32 %v1784_v39, 0.0  ;;  %v1787_v46 = vadd.f32 %v8225_v33, %v1786_v44 }
 0x11c   : > { %v3064_v47 = vmax.f32 %v2808_v42, 1e-06  ;;  %v2809_v48 = vmax.f32 %v1795_v43, 0.0  ;;  %6275 = vmatmul.mubr.msk.bf16.gmra.mrb[108].mxu0 %vm1357_vm2, %v6567_v38  ;;  %v6623_v38 = vld [vmem:[%s10506_s1 + $0x3e8] sm:$0xff]  }
 0x11d   : > { %v3062_v49 = vmax.f32 %v2806_v45, 1e-06  ;;  %v2807_v50 = vmax.f32 %v1787_v46, 0.0  ;;  %6278 = vmatprep.mubr.msk.bf16.mxu0 %vm1357_vm2, %v6568_v41  ;;  %6415 = vmatmul.mubr.msk.bf16.gmra.mrb[52].mxu1 %vm1357_vm2, %v6623_v38 }
 0x11e   : > { %6648 = vlog2.f32 %v3064_v47  ;;  %v3065_v52 = vmax.f32 %v2809_v48, 1e-06 }
 0x11f   : > { %6650 = vlog2.f32 %v3062_v49  ;;  %v3063_v54 = vmax.f32 %v2807_v50, 1e-06  ;;  %v6172_v55 = vpop.f32.mrb[4].mxu0 }
 0x120   : > { %6652 = vlog2.f32 %v3065_v52  ;;  %v1808_v56 = vadd.f32 %v6172_v55, %v8225_v33  ;;  %v1799_v57 = vpop.f32.mrb[5].mxu0  ;;  %v6577_v52 = vld [vmem:[%s10506_s1 + $0x1e8] sm:$0xff]  }
 0x121   : > { %6654 = vlog2.f32 %v3063_v54  ;;  %v1800_v59 = vadd.f32 %v8225_v33, %v1799_v57  ;;  %v6173_v60 = vpop.f32.mrb[6].mxu0 }
 0x122   : > { %v2812_v62 = vmax.f32 %v1808_v56, 0.0  ;;  %v1811_v63 = vadd.f32 %v6173_v60, %v8225_v33  ;;  %v1802_v0 = vpop.f32.mrb[7].mxu0 }
 0x123   : > { %v2810_v2 = vmax.f32 %v1800_v59, 0.0  ;;  %v1803_v3 = vadd.f32 %v8225_v33, %v1802_v0 }
 0x124   : > { %v3068_v4 = vmax.f32 %v2812_v62, 1e-06  ;;  %v2813_v5 = vmax.f32 %v1811_v63, 0.0  ;;  %6279 = vmatmul.mubr.msk.bf16.gmra.mrb[112].mxu0 %vm1357_vm2, %v6569_v58  ;;  %v6580_v58 = vld [vmem:[%s10506_s1 + $0x1f0] sm:$0xff]  }
 0x125   : > { %v3066_v6 = vmax.f32 %v2810_v2, 1e-06  ;;  %v2811_v7 = vmax.f32 %v1803_v3, 0.0  ;;  %6282 = vmatprep.mubr.msk.bf16.mxu0 %vm1357_vm2, %v6572_v61 }
 0x126   : > { %6656 = vlog2.f32 %v3068_v4  ;;  %v3069_v9 = vmax.f32 %v2813_v5, 1e-06 }
 0x127   : > { %6658 = vlog2.f32 %v3066_v6  ;;  %v3067_v10 = vmax.f32 %v2811_v7, 1e-06  ;;  %v6176_v11 = vpop.f32.mrb[8].mxu0  ;;  %v6626_v7 = vld [vmem:[%s10506_s1 + $0x3f0] sm:$0xff]  }
 0x128   : > { %v6649_v12 = vpop.eup %6648  ;;  %6660 = vlog2.f32 %v3069_v9  ;;  %v1824_v14 = vadd.f32 %v6176_v11, %v8225_v33  ;;  %v1815_v15 = vpop.f32.mrb[9].mxu0  ;;  %6418 = vmatprep.mubr.msk.bf16.mxu1 %vm1357_vm2, %v6626_v7 }
 0x129   : > { %v6651_v17 = vpop.eup %6650  ;;  %v3323_v18 = vmul.f32 0.6931472, %v6649_v12  ;;  %6662 = vlog2.f32 %v3067_v10  ;;  %v1816_v19 = vadd.f32 %v8225_v33, %v1815_v15  ;;  %v6177_v20 = vpop.f32.mrb[10].mxu0  ;;  %v6627_v10 = vld [vmem:[%s10506_s1 + $0x3f8] sm:$0xff]  }
 0x12a   : > { %v6653_v22 = vpop.eup %6652  ;;  %v3319_v23 = vmul.f32 0.6931472, %v6651_v17  ;;  %v2816_v24 = vmax.f32 %v1824_v14, 0.0  ;;  %v1827_v25 = vadd.f32 %v6177_v20, %v8225_v33  ;;  %v1818_v26 = vpop.f32.mrb[11].mxu0  ;;  %6419 = vmatmul.mubr.msk.bf16.gmra.mrb[56].mxu1 %vm1357_vm2, %v6627_v10 }
 0x12b   : > { %v6655_v28 = vpop.eup %6654  ;;  %v3833_v29 = vmul.f32 %v8272_v13, %v3323_v18  ;;  %v3325_v30 = vmul.f32 0.6931472, %v6653_v22  ;;  %v2814_v31 = vmax.f32 %v1816_v19, 0.0  ;;  %v1819_v32 = vadd.f32 %v8225_v33, %v1818_v26 }
 0x12c   : > { %v3831_v34 = vmul.f32 %v8272_v13, %v3319_v23  ;;  %v3321_v35 = vmul.f32 0.6931472, %v6655_v28  ;;  %v3072_v36 = vmax.f32 %v2816_v24, 1e-06  ;;  %v2817_v37 = vmax.f32 %v1827_v25, 0.0  ;;  %6283 = vmatmul.mubr.msk.bf16.gmra.mrb[116].mxu0 %vm1357_vm2, %v6573_v16  ;;  %v6581_v24 = vld [vmem:[%s10506_s1 + $0x1f8] sm:$0xff]  }
 0x12d   : > { %v4091_v39 = vmul.f32 1.442695, %v3833_v29  ;;  %v3834_v40 = vmul.f32 %v8272_v13, %v3325_v30  ;;  %v2815_v41 = vmax.f32 %v1819_v32, 0.0  ;;  %6286 = vmatprep.mubr.msk.bf16.mxu0 %vm1357_vm2, %v6576_v21  ;;  %v3070_v45 = vmax.f32 %v2814_v31, 1e-06  ;;  %v6584_v30 = vld [vmem:[%s10506_s1 + $0x200] sm:$0xff]  }
 0x12e   : > { %v4087_v42 = vmul.f32 1.442695, %v3831_v34  ;;  %v3832_v43 = vmul.f32 %v8272_v13, %v3321_v35  ;;  %6664 = vlog2.f32 %v3072_v36  ;;  %v3073_v49 = vmax.f32 %v2817_v37, 1e-06 }
 0x12f   : > { %6666 = vpow2.f32 %v4091_v39  ;;  %v4093_v44 = vmul.f32 1.442695, %v3834_v40  ;;  %v6180_v46 = vpop.f32.mrb[12].mxu0  ;;  %v3071_v55 = vmax.f32 %v2815_v41, 1e-06 }
 0x130   : > { %v6657_v47 = vpop.eup %6656  ;;  %6668 = vpow2.f32 %v4087_v42  ;;  %v4089_v48 = vmul.f32 1.442695, %v3832_v43  ;;  %v1840_v50 = vadd.f32 %v6180_v46, %v8225_v33  ;;  %v1831_v51 = vpop.f32.mrb[13].mxu0 }
 0x131   : > { %v6659_v53 = vpop.eup %6658  ;;  %6670 = vpow2.f32 %v4093_v44  ;;  %v3331_v54 = vmul.f32 0.6931472, %v6657_v47  ;;  %v1832_v56 = vadd.f32 %v8225_v33, %v1831_v51  ;;  %v6181_v57 = vpop.f32.mrb[14].mxu0 }
 0x132   : > { %v6661_v59 = vpop.eup %6660  ;;  %6672 = vpow2.f32 %v4089_v48  ;;  %v3327_v60 = vmul.f32 0.6931472, %v6659_v53  ;;  %v2820_v61 = vmax.f32 %v1840_v50, 0.0  ;;  %v1843_v62 = vadd.f32 %v6181_v57, %v8225_v33  ;;  %v1834_v63 = vpop.f32.mrb[15].mxu0 }
 0x133   : > { %v6663_v0 = vpop.eup %6662  ;;  %v3837_v1 = vmul.f32 %v8272_v13, %v3331_v54  ;;  %v3333_v2 = vmul.f32 0.6931472, %v6661_v59  ;;  %6674 = vlog2.f32 %v3070_v45  ;;  %v2818_v3 = vmax.f32 %v1832_v56, 0.0 }
 0x134   : > { %v3835_v4 = vmul.f32 %v8272_v13, %v3327_v60  ;;  %v3329_v5 = vmul.f32 0.6931472, %v6663_v0  ;;  %6676 = vlog2.f32 %v3073_v49  ;;  %v3076_v6 = vmax.f32 %v2820_v61, 1e-06  ;;  %6287 = vmatmul.mubr.msk.bf16.gmra.mrb[120].mxu0 %vm1357_vm2, %v6577_v52 }
 0x135   : > { %v4099_v8 = vmul.f32 1.442695, %v3837_v1  ;;  %v3838_v9 = vmul.f32 %v8272_v13, %v3333_v2  ;;  %6678 = vlog2.f32 %v3071_v55  ;;  %6290 = vmatprep.mubr.msk.bf16.mxu0 %vm1357_vm2, %v6580_v58  ;;  %v2821_v14 = vmax.f32 %v1843_v62, 0.0  ;;  %v6585_v62 = vld [vmem:[%s10506_s1 + $0x208] sm:$0xff]  }
 0x136   : > { %v4095_v11 = vmul.f32 1.442695, %v3835_v4  ;;  %v3836_v12 = vmul.f32 %v8272_v13, %v3329_v5  ;;  %6680 = vlog2.f32 %v3076_v6  ;;  %v3074_v16 = vmax.f32 %v2818_v3, 1e-06  ;;  %v6588_v4 = vld [vmem:[%s10506_s1 + $0x210] sm:$0xff]  }
 0x137   : > { %6682 = vpow2.f32 %v4099_v8  ;;  %v4101_v15 = vmul.f32 1.442695, %v3838_v9  ;;  %v1835_v17 = vadd.f32 %v8225_v33, %v1834_v63  ;;  %v6184_v18 = vpop.f32.mrb[16].mxu0  ;;  %v3077_v21 = vmax.f32 %v2821_v14, 1e-06 }
 0x138   : > { %v6665_v19 = vpop.eup %6664  ;;  %6684 = vpow2.f32 %v4095_v11  ;;  %v4097_v20 = vmul.f32 1.442695, %v3836_v12  ;;  %v1856_v22 = vadd.f32 %v6184_v18, %v8225_v33  ;;  %v1847_v23 = vpop.f32.mrb[17].mxu0  ;;  %v4599_v56 = vlaneseq }
 0x139   : > { %v8327_v25 = vpop.eup %6666  ;;  %6686 = vpow2.f32 %v4101_v15  ;;  %v3339_v26 = vmul.f32 0.6931472, %v6665_v19  ;;  %v2819_v27 = vmax.f32 %v1835_v17, 0.0  ;;  %v1848_v28 = vadd.f32 %v8225_v33, %v1847_v23  ;;  %v6185_v29 = vpop.f32.mrb[18].mxu0 }
 0x13a   : > { %v8333_v31 = vpop.eup %6668  ;;  %6688 = vpow2.f32 %v4097_v20  ;;  %v2824_v32 = vmax.f32 %v1856_v22, 0.0  ;;  %v1859_v34 = vadd.f32 %v6185_v29, %v8225_v33  ;;  %v1850_v35 = vpop.f32.mrb[19].mxu0 }
 0x13b   : > { %v8336_v36 = vpop.eup %6670  ;;  %v3841_v37 = vmul.f32 %v8272_v13, %v3339_v26  ;;  %6690 = vlog2.f32 %v3074_v16  ;;  %v3075_v38 = vmax.f32 %v2819_v27, 1e-06  ;;  %v2822_v39 = vmax.f32 %v1848_v28, 0.0 }
 0x13c   : > { %v8339_v40 = vpop.eup %6672  ;;  %6692 = vlog2.f32 %v3077_v21  ;;  %v3080_v41 = vmax.f32 %v2824_v32, 1e-06  ;;  %v2825_v42 = vmax.f32 %v1859_v34, 0.0  ;;  %v1851_v43 = vadd.f32 %v8225_v33, %v1850_v35  ;;  %6291 = vmatmul.mubr.msk.bf16.gmra.mrb[124].mxu0 %vm1357_vm2, %v6581_v24 }
 0x13d   : > { %v6675_v44 = vpop.eup %6674  ;;  %v4107_v45 = vmul.f32 1.442695, %v3841_v37  ;;  %6694 = vlog2.f32 %v3075_v38  ;;  %v3078_v46 = vmax.f32 %v2822_v39, 1e-06  ;;  %6294 = vmatprep.mubr.msk.bf16.mxu0 %vm1357_vm2, %v6584_v30  ;;  %v4701_v47 = vpack.c.bf16 %v8339_v40, %v8333_v31 }
 0x13e   : > { %v6677_v48 = vpop.eup %6676  ;;  %v3335_v49 = vmul.f32 0.6931472, %v6675_v44  ;;  %6696 = vlog2.f32 %v3080_v41  ;;  %v3081_v50 = vmax.f32 %v2825_v42, 1e-06  ;;  %v2823_v51 = vmax.f32 %v1851_v43, 0.0  ;;  %v6589_v43 = vld [vmem:[%s10506_s1 + $0x218] sm:$0xff]  }
 0x13f   : > { %v6679_v52 = vpop.eup %6678  ;;  %6698 = vpow2.f32 %v4107_v45  ;;  %v3341_v53 = vmul.f32 0.6931472, %v6677_v48  ;;  %v6188_v54 = vpop.f32.mrb[20].mxu0  ;;  %v4702_v55 = vpack.c.bf16 %v8336_v36, %v8327_v25 }
 0x140   : > { %v6681_v57 = vpop.eup %6680  ;;  %v3839_v58 = vmul.f32 %v8272_v13, %v3335_v49  ;;  %v3337_v59 = vmul.f32 0.6931472, %v6679_v52  ;;  %6700 = vlog2.f32 %v3078_v46  ;;  %v3079_v60 = vmax.f32 %v2823_v51, 1e-06  ;;  %v1863_v61 = vpop.f32.mrb[21].mxu0 }
 0x141   : > { %v8352_v63 = vpop.eup %6682  ;;  %v3842_v0 = vmul.f32 %v8272_v13, %v3341_v53  ;;  %v3347_v1 = vmul.f32 0.6931472, %v6681_v57  ;;  %6702 = vlog2.f32 %v3081_v50  ;;  %v1872_v2 = vadd.f32 %v6188_v54, %v8225_v33  ;;  %v6189_v3 = vpop.f32.mrb[22].mxu0  ;;  %v6592_v50 = vld [vmem:[%s10506_s1 + $0x220] sm:$0xff]  }
 0x142   : > { %v8359_v5 = vpop.eup %6684  ;;  %v4103_v6 = vmul.f32 1.442695, %v3839_v58  ;;  %v3840_v7 = vmul.f32 %v8272_v13, %v3337_v59  ;;  %6704 = vlog2.f32 %v3079_v60  ;;  %v1864_v8 = vadd.f32 %v8225_v33, %v1863_v61  ;;  %v1866_v9 = vpop.f32.mrb[23].mxu0 }
 0x143   : > { %v8363_v10 = vpop.eup %6686  ;;  %v4109_v11 = vmul.f32 1.442695, %v3842_v0  ;;  %v3845_v12 = vmul.f32 %v8272_v13, %v3347_v1  ;;  %v2828_v14 = vmax.f32 %v1872_v2, 0.0  ;;  %v1875_v15 = vadd.f32 %v6189_v3, %v8225_v33 }
 0x144   : > { %v8367_v16 = vpop.eup %6688  ;;  %6706 = vpow2.f32 %v4103_v6  ;;  %v4105_v17 = vmul.f32 1.442695, %v3840_v7  ;;  %v2826_v18 = vmax.f32 %v1864_v8, 0.0  ;;  %v1867_v19 = vadd.f32 %v8225_v33, %v1866_v9  ;;  %6295 = vmatmul.mubr.msk.bf16.gmra.mrb[128].mxu0 %vm1357_vm2, %v6585_v62 }
 0x145   : > { %v6691_v20 = vpop.eup %6690  ;;  %6708 = vpow2.f32 %v4109_v11  ;;  %v4115_v21 = vmul.f32 1.442695, %v3845_v12  ;;  %v3084_v22 = vmax.f32 %v2828_v14, 1e-06  ;;  %v2829_v23 = vmax.f32 %v1875_v15, 0.0  ;;  %6298 = vmatprep.mubr.msk.bf16.mxu0 %vm1357_vm2, %v6588_v4 }
 0x146   : > { %v6693_v24 = vpop.eup %6692  ;;  %6710 = vpow2.f32 %v4105_v17  ;;  %v3343_v26 = vmul.f32 0.6931472, %v6691_v20  ;;  %v3082_v27 = vmax.f32 %v2826_v18, 1e-06  ;;  %v2827_v28 = vmax.f32 %v1867_v19, 0.0 }
 0x147   : > { %v6695_v29 = vpop.eup %6694  ;;  %6712 = vpow2.f32 %v4115_v21  ;;  %v3349_v30 = vmul.f32 0.6931472, %v6693_v24  ;;  %v3085_v32 = vmax.f32 %v2829_v23, 1e-06  ;;  %v6192_v34 = vpop.f32.mrb[24].mxu0  ;;  %v4703_v35 = vpack.c.bf16 %v8367_v16, %v8359_v5  ;;  %v6593_v24 = vld [vmem:[%s10506_s1 + $0x228] sm:$0xff]  }
 0x148   : > { %v6697_v37 = vpop.eup %6696  ;;  %v3843_v38 = vmul.f32 %v8272_v13, %v3343_v26  ;;  %v3345_v39 = vmul.f32 0.6931472, %v6695_v29  ;;  %6714 = vlog2.f32 %v3084_v22  ;;  %v3083_v41 = vmax.f32 %v2827_v28, 1e-06  ;;  %v1879_v42 = vpop.f32.mrb[25].mxu0 }
 0x149   : > { %v8378_v44 = vpop.eup %6698  ;;  %v3846_v45 = vmul.f32 %v8272_v13, %v3349_v30  ;;  %v3355_v46 = vmul.f32 0.6931472, %v6697_v37  ;;  %6716 = vlog2.f32 %v3082_v27  ;;  %v1888_v48 = vadd.f32 %v6192_v34, %v8225_v33  ;;  %v6193_v49 = vpop.f32.mrb[26].mxu0 }
 0x14a   : > { %v6701_v51 = vpop.eup %6700  ;;  %v4111_v52 = vmul.f32 1.442695, %v3843_v38  ;;  %v3844_v53 = vmul.f32 %v8272_v13, %v3345_v39  ;;  %6718 = vlog2.f32 %v3085_v32  ;;  %v1880_v54 = vadd.f32 %v8225_v33, %v1879_v42  ;;  %v1882_v57 = vpop.f32.mrb[27].mxu0  ;;  %v6596_v32 = vld [vmem:[%s10506_s1 + $0x230] sm:$0xff]  }
 0x14b   : > { %v6703_v58 = vpop.eup %6702  ;;  %v4117_v59 = vmul.f32 1.442695, %v3846_v45  ;;  %v3849_v60 = vmul.f32 %v8272_v13, %v3355_v46  ;;  %v3351_v61 = vmul.f32 0.6931472, %v6701_v51  ;;  %6720 = vlog2.f32 %v3083_v41 }
 0x14c   : > { %v6705_v62 = vpop.eup %6704  ;;  %6722 = vpow2.f32 %v4111_v52  ;;  %v4113_v0 = vmul.f32 1.442695, %v3844_v53  ;;  %v3357_v1 = vmul.f32 0.6931472, %v6703_v58  ;;  %v2832_v2 = vmax.f32 %v1888_v48, 0.0  ;;  %6299 = vmatmul.mubr.msk.bf16.gmra.mrb[132].mxu0 %vm1357_vm2, %v6589_v43 }
 0x14d   : > { %6724 = vpow2.f32 %v4117_v59  ;;  %v4123_v3 = vmul.f32 1.442695, %v3849_v60  ;;  %v3847_v4 = vmul.f32 %v8272_v13, %v3351_v61  ;;  %v3353_v6 = vmul.f32 0.6931472, %v6705_v62  ;;  %6302 = vmatprep.mubr.msk.bf16.mxu0 %vm1357_vm2, %v6592_v50 }
 0x14e   : > { %v8391_v7 = vpop.eup %6706  ;;  %6726 = vpow2.f32 %v4113_v0  ;;  %v3850_v8 = vmul.f32 %v8272_v13, %v3357_v1  ;;  %v3088_v9 = vmax.f32 %v2832_v2, 1e-06  ;;  %v2830_v11 = vmax.f32 %v1880_v54, 0.0 }
 0x14f   : > { %v8394_v12 = vpop.eup %6708  ;;  %6728 = vpow2.f32 %v4123_v3  ;;  %v4119_v14 = vmul.f32 1.442695, %v3847_v4  ;;  %v3848_v15 = vmul.f32 %v8272_v13, %v3353_v6  ;;  %v1891_v17 = vadd.f32 %v6193_v49, %v8225_v33  ;;  %v6196_v18 = vpop.f32.mrb[28].mxu0 }
 0x150   : > { %v8398_v19 = vpop.eup %6710  ;;  %v4125_v20 = vmul.f32 1.442695, %v3850_v8  ;;  %6730 = vlog2.f32 %v3088_v9  ;;  %v3086_v21 = vmax.f32 %v2830_v11, 1e-06  ;;  %v1883_v22 = vadd.f32 %v8225_v33, %v1882_v57  ;;  %v1895_v23 = vpop.f32.mrb[29].mxu0 }
 0x151   : > { %v8404_v26 = vpop.eup %6712  ;;  %6732 = vpow2.f32 %v4119_v14  ;;  %v4121_v27 = vmul.f32 1.442695, %v3848_v15  ;;  %v2833_v28 = vmax.f32 %v1891_v17, 0.0  ;;  %v1904_v29 = vadd.f32 %v6196_v18, %v8225_v33  ;;  %v6197_v30 = vpop.f32.mrb[30].mxu0  ;;  %v6597_v14 = vld [vmem:[%s10506_s1 + $0x238] sm:$0xff]  }
 0x152   : > { %v6715_v34 = vpop.eup %6714  ;;  %6734 = vpow2.f32 %v4125_v20  ;;  %v2831_v37 = vmax.f32 %v1883_v22, 0.0  ;;  %v1896_v38 = vadd.f32 %v8225_v33, %v1895_v23  ;;  %v1907_v39 = vadd.f32 %v6197_v30, %v8225_v33  ;;  %v1898_v41 = vpop.f32.mrb[31].mxu0  ;;  %v6600_v22 = vld [vmem:[%s10506_s1 + $0x240] sm:$0xff]  }
 0x153   : > { %v6717_v42 = vpop.eup %6716  ;;  %6736 = vpow2.f32 %v4121_v27  ;;  %v3363_v43 = vmul.f32 0.6931472, %v6715_v34  ;;  %v3089_v45 = vmax.f32 %v2833_v28, 1e-06  ;;  %v2836_v46 = vmax.f32 %v1904_v29, 0.0 }
 0x154   : > { %v6719_v48 = vpop.eup %6718  ;;  %v3359_v49 = vmul.f32 0.6931472, %v6717_v42  ;;  %6738 = vlog2.f32 %v3086_v21  ;;  %v3087_v50 = vmax.f32 %v2831_v37, 1e-06  ;;  %v2834_v51 = vmax.f32 %v1896_v38, 0.0  ;;  %6303 = vmatmul.mubr.msk.bf16.gmra.mrb[136].mxu0 %vm1357_vm2, %v6593_v24 }
 0x155   : > { %v6721_v52 = vpop.eup %6720  ;;  %v3853_v53 = vmul.f32 %v8272_v13, %v3363_v43  ;;  %v3365_v54 = vmul.f32 0.6931472, %v6719_v48  ;;  %6740 = vlog2.f32 %v3089_v45  ;;  %v3092_v57 = vmax.f32 %v2836_v46, 1e-06  ;;  %6306 = vmatprep.mubr.msk.bf16.mxu0 %vm1357_vm2, %v6596_v32 }
 0x156   : > { %v8415_v58 = vpop.eup %6722  ;;  %v3851_v59 = vmul.f32 %v8272_v13, %v3359_v49  ;;  %v3361_v60 = vmul.f32 0.6931472, %v6721_v52  ;;  %6742 = vlog2.f32 %v3087_v50  ;;  %v3090_v61 = vmax.f32 %v2834_v51, 1e-06 }
 0x157   : > { %v8418_v62 = vpop.eup %6724  ;;  %v4131_v0 = vmul.f32 1.442695, %v3853_v53  ;;  %v3854_v1 = vmul.f32 %v8272_v13, %v3365_v54  ;;  %6744 = vlog2.f32 %v3092_v57  ;;  %v2837_v2 = vmax.f32 %v1907_v39, 0.0  ;;  %v6200_v3 = vpop.f32.mrb[32].mxu0 }
 0x158   : > { %v8421_v4 = vpop.eup %6726  ;;  %v4127_v6 = vmul.f32 1.442695, %v3851_v59  ;;  %v3852_v8 = vmul.f32 %v8272_v13, %v3361_v60  ;;  %6746 = vlog2.f32 %v3090_v61  ;;  %v1899_v9 = vadd.f32 %v8225_v33, %v1898_v41  ;;  %v1911_v11 = vpop.f32.mrb[33].mxu0 }
 0x159   : > { %v6729_v15 = vpop.eup %6728  ;;  %6748 = vpow2.f32 %v4131_v0  ;;  %v4133_v17 = vmul.f32 1.442695, %v3854_v1  ;;  %v3093_v18 = vmax.f32 %v2837_v2, 1e-06  ;;  %v1920_v20 = vadd.f32 %v6200_v3, %v8225_v33  ;;  %v6201_v21 = vpop.f32.mrb[34].mxu0  ;;  %v6601_v3 = vld [vmem:[%s10506_s1 + $0x248] sm:$0xff]  }
 0x15a   : > { %v6731_v23 = vpop.eup %6730  ;;  %6750 = vpow2.f32 %v4127_v6  ;;  %v4129_v24 = vmul.f32 1.442695, %v3852_v8  ;;  %v2835_v27 = vmax.f32 %v1899_v9, 0.0  ;;  %v1912_v28 = vadd.f32 %v8225_v33, %v1911_v11  ;;  %v1914_v29 = vpop.f32.mrb[35].mxu0 }
 0x15b   : > { %v6733_v30 = vpop.eup %6732  ;;  %6752 = vpow2.f32 %v4133_v17  ;;  %v3371_v32 = vmul.f32 0.6931472, %v6731_v23  ;;  %v2840_v34 = vmax.f32 %v1920_v20, 0.0  ;;  %v1923_v37 = vadd.f32 %v6201_v21, %v8225_v33 }
 0x15c   : > { %v6735_v38 = vpop.eup %6734  ;;  %6754 = vpow2.f32 %v4129_v24  ;;  %v3091_v39 = vmax.f32 %v2835_v27, 1e-06  ;;  %v2838_v41 = vmax.f32 %v1912_v28, 0.0  ;;  %v1915_v42 = vadd.f32 %v8225_v33, %v1914_v29  ;;  %6307 = vmatmul.mubr.msk.bf16.gmra.mrb[140].mxu0 %vm1357_vm2, %v6597_v14 }
 0x15d   : > { %v6737_v43 = vpop.eup %6736  ;;  %v3857_v45 = vmul.f32 %v8272_v13, %v3371_v32  ;;  %6756 = vlog2.f32 %v3093_v18  ;;  %v3096_v46 = vmax.f32 %v2840_v34, 1e-06  ;;  %v2841_v48 = vmax.f32 %v1923_v37, 0.0  ;;  %6310 = vmatprep.mubr.msk.bf16.mxu0 %vm1357_vm2, %v6600_v22 }
 0x15e   : > { %v6739_v49 = vpop.eup %6738  ;;  %6758 = vlog2.f32 %v3091_v39  ;;  %v3094_v50 = vmax.f32 %v2838_v41, 1e-06  ;;  %v2839_v51 = vmax.f32 %v1915_v42, 0.0  ;;  %v4709_v52 = vpack.c.bf16 %v6737_v43, %v6733_v30 }
 0x15f   : > { %v6741_v53 = vpop.eup %6740  ;;  %v4139_v54 = vmul.f32 1.442695, %v3857_v45  ;;  %v3367_v57 = vmul.f32 0.6931472, %v6739_v49  ;;  %6760 = vlog2.f32 %v3096_v46  ;;  %v3097_v59 = vmax.f32 %v2841_v48, 1e-06 }
 0x160   : > { %v6743_v60 = vpop.eup %6742  ;;  %v3373_v61 = vmul.f32 0.6931472, %v6741_v53  ;;  %6762 = vlog2.f32 %v3094_v50  ;;  %v3095_v0 = vmax.f32 %v2839_v51, 1e-06  ;;  %v6204_v1 = vpop.f32.mrb[36].mxu0  ;;  %5970 = vmatprep.subr.bf16.mxu1 %v4709_v52  ;;  %v4710_v2 = vpack.c.bf16 %v6735_v38, %v6729_v15  ;;  %v6604_v15 = vld [vmem:[%s10506_s1 + $0x250] sm:$0xff]  }
 0x161   : > { %v6745_v6 = vpop.eup %6744  ;;  %6764 = vpow2.f32 %v4139_v54  ;;  %v3855_v8 = vmul.f32 %v8272_v13, %v3367_v57  ;;  %v3369_v9 = vmul.f32 0.6931472, %v6743_v60  ;;  %v1936_v11 = vadd.f32 %v6204_v1, %v8225_v33  ;;  %v1927_v14 = vpop.f32.mrb[37].mxu0  ;;  %5971 = vmatpush3.bf16.msra.mxu1 %v4701_v47  ;;  %v6605_v54 = vld [vmem:[%s10506_s1 + $0x258] sm:$0xff]   ;;  %v6608_v57 = vld [vmem:[%s10506_s1 + $0x260] sm:$0xff]  }
 0x162   : > { %v6747_v17 = vpop.eup %6746  ;;  %v3858_v18 = vmul.f32 %v8272_v13, %v3373_v61  ;;  %v3379_v20 = vmul.f32 0.6931472, %v6745_v6  ;;  %6766 = vlog2.f32 %v3097_v59  ;;  %v1928_v21 = vadd.f32 %v8225_v33, %v1927_v14  ;;  %v6205_v22 = vpop.f32.mrb[38].mxu0  ;;  %5972 = vmatprep.subr.bf16.mxu1 %v4710_v2 }
 0x163   : > { %v8451_v23 = vpop.eup %6748  ;;  %v4135_v24 = vmul.f32 1.442695, %v3855_v8  ;;  %v3856_v27 = vmul.f32 %v8272_v13, %v3369_v9  ;;  %v3375_v31 = vmul.f32 0.6931472, %v6747_v17  ;;  %6768 = vlog2.f32 %v3095_v0  ;;  %v1930_v40 = vpop.f32.mrb[39].mxu0 }
 0x164   : > { %v6751_v47 = vpop.eup %6750  ;;  %v4141_v28 = vmul.f32 1.442695, %v3858_v18  ;;  %v3861_v29 = vmul.f32 %v8272_v13, %v3379_v20  ;;  %v2844_v30 = vmax.f32 %v1936_v11, 0.0  ;;  %v2842_v32 = vmax.f32 %v1928_v21, 0.0  ;;  %6311 = vmatmul.mubr.msk.bf16.gmra.mrb[144].mxu0 %vm1357_vm2, %v6601_v3 }
 0x165   : > { %v8456_v34 = vpop.eup %6752  ;;  %6770 = vpow2.f32 %v4135_v24  ;;  %v4137_v37 = vmul.f32 1.442695, %v3856_v27  ;;  %v3859_v38 = vmul.f32 %v8272_v13, %v3375_v31  ;;  %v1939_v39 = vadd.f32 %v6205_v22, %v8225_v33  ;;  %5973 = vmatpush3.bf16.msra.mxu1 %v4702_v55  ;;  %6314 = vmatprep.mubr.msk.bf16.mxu0 %vm1357_vm2, %v6604_v15 }
 0x166   : > { %v6755_v41 = vpop.eup %6754  ;;  %6772 = vpow2.f32 %v4141_v28  ;;  %v4147_v42 = vmul.f32 1.442695, %v3861_v29  ;;  %v3100_v43 = vmax.f32 %v2844_v30, 1e-06  ;;  %v3098_v45 = vmax.f32 %v2842_v32, 1e-06 }
 0x167   : > { %v6757_v46 = vpop.eup %6756  ;;  %6774 = vpow2.f32 %v4137_v37  ;;  %v4143_v48 = vmul.f32 1.442695, %v3859_v38  ;;  %v2845_v49 = vmax.f32 %v1939_v39, 0.0  ;;  %v1931_v50 = vadd.f32 %v8225_v33, %v1930_v40  ;;  %v6208_v51 = vpop.f32.mrb[40].mxu0 }
 0x168   : > { %v6759_v52 = vpop.eup %6758  ;;  %6776 = vpow2.f32 %v4147_v42  ;;  %v3381_v53 = vmul.f32 0.6931472, %v6757_v46  ;;  %v1952_v25 = vadd.f32 %v6208_v51, %v8225_v33  ;;  %v4711_v36 = vpack.c.bf16 %v6755_v41, %v6751_v47  ;;  %v1943_v55 = vpop.f32.mrb[41].mxu0  ;;  %v6612_v51 = vld [vmem:[%s10506_s1 + $0x270] sm:$0xff]  }
 0x169   : > { %v6761_v59 = vpop.eup %6760  ;;  %6778 = vpow2.f32 %v4143_v48  ;;  %v3377_v60 = vmul.f32 0.6931472, %v6759_v52  ;;  %v3101_v61 = vmax.f32 %v2845_v49, 1e-06  ;;  %v2843_v0 = vmax.f32 %v1931_v50, 0.0  ;;  %v6209_v1 = vpop.f32.mrb[42].mxu0 }
 0x16a   : > { %v6763_v2 = vpop.eup %6762  ;;  %v3862_v3 = vmul.f32 %v8272_v13, %v3381_v53  ;;  %v3387_v6 = vmul.f32 0.6931472, %v6761_v59  ;;  %6780 = vlog2.f32 %v3100_v43  ;;  %v2848_v8 = vmax.f32 %v1952_v25, 0.0  ;;  %5974 = vmatprep.subr.bf16.mxu1 %v4711_v36  ;;  %v1946_v9 = vpop.f32.mrb[43].mxu0  ;;  %v6609_v43 = vld [vmem:[%s10506_s1 + $0x268] sm:$0xff]  }
 0x16b   : > { %v8473_v11 = vpop.eup %6764  ;;  %v3860_v14 = vmul.f32 %v8272_v13, %v3377_v60  ;;  %v3383_v15 = vmul.f32 0.6931472, %v6763_v2  ;;  %6782 = vlog2.f32 %v3098_v45  ;;  %v3099_v17 = vmax.f32 %v2843_v0, 1e-06  ;;  %5975 = vmatpush3.bf16.msra.mxu1 %v4703_v35 }
 0x16c   : > { %v6767_v18 = vpop.eup %6766  ;;  %v4149_v20 = vmul.f32 1.442695, %v3862_v3  ;;  %v3865_v21 = vmul.f32 %v8272_v13, %v3387_v6  ;;  %6784 = vlog2.f32 %v3101_v61  ;;  %v3104_v22 = vmax.f32 %v2848_v8, 1e-06  ;;  %6315 = vmatmul.mubr.msk.bf16.gmra.mrb[148].mxu0 %vm1357_vm2, %v6605_v54  ;;  %v8507_v54 = vld [vmem:[%s10508_s3] ss:$0 sm:$0xff] }
 0x16d   : > { %v6769_v24 = vpop.eup %6768  ;;  %v4145_v27 = vmul.f32 1.442695, %v3860_v14  ;;  %v3863_v31 = vmul.f32 %v8272_v13, %v3383_v15  ;;  %v3389_v40 = vmul.f32 0.6931472, %v6767_v18  ;;  %6786 = vlog2.f32 %v3099_v17  ;;  %6318 = vmatprep.mubr.msk.bf16.mxu0 %vm1357_vm2, %v6608_v57  ;;  %v6613_v18 = vld [vmem:[%s10506_s1 + $0x278] sm:$0xff]  }
 0x16e   : > { %6788 = vpow2.f32 %v4149_v20  ;;  %v4155_v47 = vmul.f32 1.442695, %v3865_v21  ;;  %v3385_v5 = vmul.f32 0.6931472, %v6769_v24  ;;  %v1944_v16 = vadd.f32 %v8225_v33, %v1943_v55 }
 0x16f   : > { %v6771_v35 = vpop.eup %6770  ;;  %6790 = vpow2.f32 %v4145_v27  ;;  %v4151_v28 = vmul.f32 1.442695, %v3863_v31  ;;  %v3866_v29 = vmul.f32 %v8272_v13, %v3389_v40  ;;  %v1955_v30 = vadd.f32 %v6209_v1, %v8225_v33  ;;  %v6212_v32 = vpop.f32.mrb[44].mxu0 }
 0x170   : > { %v8486_v37 = vpop.eup %6772  ;;  %6792 = vpow2.f32 %v4155_v47  ;;  %v3864_v38 = vmul.f32 %v8272_v13, %v3385_v5  ;;  %v2846_v39 = vmax.f32 %v1944_v16, 0.0  ;;  %v4712_v41 = vpack.c.bf16 %v8456_v34, %v8451_v23  ;;  %v1959_v42 = vpop.f32.mrb[45].mxu0 }
 0x171   : > { %v6775_v45 = vpop.eup %6774  ;;  %6794 = vpow2.f32 %v4151_v28  ;;  %v4157_v46 = vmul.f32 1.442695, %v3866_v29  ;;  %v2849_v48 = vmax.f32 %v1955_v30, 0.0  ;;  %v1947_v49 = vadd.f32 %v8225_v33, %v1946_v9  ;;  %v6213_v50 = vpop.f32.mrb[46].mxu0  ;;  %v6616_v28 = vld [vmem:[%s10506_s1 + $0x280] sm:$0xff]  }
 0x172   : > { %v8498_v52 = vpop.eup %6776  ;;  %v4153_v53 = vmul.f32 1.442695, %v3864_v38  ;;  %6796 = vlog2.f32 %v3104_v22  ;;  %v3102_v23 = vmax.f32 %v2846_v39, 1e-06  ;;  %5976 = vmatprep.subr.bf16.mxu1 %v4712_v41  ;;  %v4704_v34 = vpack.c.bf16 %v8363_v10, %v8352_v63  ;;  %v1962_v25 = vpop.f32.mrb[47].mxu0 }
 0x173   : > { %v8502_v36 = vpop.eup %6778  ;;  %6798 = vpow2.f32 %v4157_v46  ;;  %v3105_v55 = vmax.f32 %v2849_v48, 1e-06  ;;  %v2847_v33 = vmax.f32 %v1947_v49, 0.0  ;;  %v1968_v57 = vadd.f32 %v8507_v54, %v6212_v32 }
 0x174   : > { %v6781_v59 = vpop.eup %6780  ;;  %6800 = vpow2.f32 %v4153_v53  ;;  %5977 = vmatpush3.bf16.msra.mxu1 %v4704_v34  ;;  %v4713_v60 = vpack.c.bf16 %v6775_v45, %v6771_v35  ;;  %v1960_v61 = vadd.f32 %v8507_v54, %v1959_v42  ;;  %v4705_v63 = vpack.c.bf16 %v8398_v19, %v8391_v7  ;;  %6319 = vmatmul.mubr.msk.bf16.gmra.mrb[152].mxu0 %vm1357_vm2, %v6609_v43 }
 0x175   : > { %v6783_v10 = vpop.eup %6782  ;;  %v3395_v0 = vmul.f32 0.6931472, %v6781_v59  ;;  %6802 = vlog2.f32 %v3102_v23  ;;  %v3103_v1 = vmax.f32 %v2847_v33, 1e-06  ;;  %v2852_v2 = vmax.f32 %v1968_v57, 0.0  ;;  %6322 = vmatprep.mubr.msk.bf16.mxu0 %vm1357_vm2, %v6612_v51  ;;  %v6617_v59 = vld [vmem:[%s10506_s1 + $0x288] sm:$0xff]  }
 0x176   : > { %v6785_v3 = vpop.eup %6784  ;;  %v3391_v6 = vmul.f32 0.6931472, %v6783_v10  ;;  %6804 = vlog2.f32 %v3105_v55  ;;  %5978 = vmatprep.subr.bf16.mxu1 %v4713_v60  ;;  %v2850_v8 = vmax.f32 %v1960_v61, 0.0  ;;  %v1971_v9 = vadd.f32 %v8507_v54, %v6213_v50  ;;  %v6620_v60 = vld [vmem:[%s10506_s1 + $0x290] sm:$0xff]  }
 0x177   : > { %v6787_v14 = vpop.eup %6786  ;;  %v3869_v15 = vmul.f32 %v8272_v13, %v3395_v0  ;;  %v3397_v7 = vmul.f32 0.6931472, %v6785_v3  ;;  %6806 = vlog2.f32 %v3103_v1  ;;  %v3108_v19 = vmax.f32 %v2852_v2, 1e-06  ;;  %v6216_v17 = vpop.f32.mrb[48].mxu0 }
 0x178   : > { %v8520_v20 = vpop.eup %6788  ;;  %v3867_v21 = vmul.f32 %v8272_v13, %v3391_v6  ;;  %v3393_v22 = vmul.f32 0.6931472, %v6787_v14  ;;  %v3106_v24 = vmax.f32 %v2850_v8, 1e-06  ;;  %5979 = vmatpush3.bf16.msra.mxu1 %v4705_v63  ;;  %v2853_v27 = vmax.f32 %v1971_v9, 0.0  ;;  %v1975_v31 = vpop.f32.mrb[49].mxu0 }
 0x179   : > { %v6791_v40 = vpop.eup %6790  ;;  %v4163_v47 = vmul.f32 1.442695, %v3869_v15  ;;  %v3870_v5 = vmul.f32 %v8272_v13, %v3397_v7  ;;  %6808 = vlog2.f32 %v3108_v19  ;;  %v4714_v16 = vpack.c.bf16 %v8486_v37, %v8473_v11  ;;  %v6217_v35 = vpop.f32.mrb[50].mxu0 }
 0x17a   : > { %v8529_v29 = vpop.eup %6792  ;;  %v4159_v30 = vmul.f32 1.442695, %v3867_v21  ;;  %v3868_v32 = vmul.f32 %v8272_v13, %v3393_v22  ;;  %6810 = vlog2.f32 %v3106_v24  ;;  %v3109_v38 = vmax.f32 %v2853_v27, 1e-06  ;;  %v1978_v39 = vpop.f32.mrb[51].mxu0 }
 0x17b   : > { %v8532_v41 = vpop.eup %6794  ;;  %6812 = vpow2.f32 %v4163_v47  ;;  %v4165_v42 = vmul.f32 1.442695, %v3870_v5  ;;  %5980 = vmatprep.subr.bf16.mxu1 %v4714_v16  ;;  %v1963_v11 = vadd.f32 %v8507_v54, %v1962_v25  ;;  %v4706_v37 = vpack.c.bf16 %v8394_v12, %v8378_v44 }
 0x17c   : > { %v6797_v43 = vpop.eup %6796  ;;  %6814 = vpow2.f32 %v4159_v30  ;;  %v4161_v45 = vmul.f32 1.442695, %v3868_v32  ;;  %v1984_v46 = vadd.f32 %v8507_v54, %v6216_v17  ;;  %v4715_v48 = vpack.c.bf16 %v6791_v40, %v8502_v36  ;;  %6323 = vmatmul.mubr.msk.bf16.gmra.mrb[156].mxu0 %vm1357_vm2, %v6613_v18 }
 0x17d   : > { %v8540_v49 = vpop.eup %6798  ;;  %6816 = vpow2.f32 %v4165_v42  ;;  %v3403_v50 = vmul.f32 0.6931472, %v6797_v43  ;;  %v2851_v51 = vmax.f32 %v1963_v11, 0.0  ;;  %5981 = vmatpush3.bf16.msra.mxu1 %v4706_v37  ;;  %v1976_v53 = vadd.f32 %v8507_v54, %v1975_v31  ;;  %6326 = vmatprep.mubr.msk.bf16.mxu0 %vm1357_vm2, %v6616_v28 }
 0x17e   : > { %v8544_v44 = vpop.eup %6800  ;;  %6818 = vpow2.f32 %v4161_v45  ;;  %v2856_v12 = vmax.f32 %v1984_v46, 0.0  ;;  %5982 = vmatprep.subr.bf16.mxu1 %v4715_v48  ;;  %v4707_v23 = vpack.c.bf16 %v8421_v4, %v8415_v58  ;;  %v1987_v34 = vadd.f32 %v8507_v54, %v6217_v35  ;;  %v6621_v45 = vld [vmem:[%s10506_s1 + $0x298] sm:$0xff]  }
 0x17f   : > { %v6803_v25 = vpop.eup %6802  ;;  %v3873_v36 = vmul.f32 %v8272_v13, %v3403_v50  ;;  %6820 = vlog2.f32 %v3109_v38  ;;  %v3107_v55 = vmax.f32 %v2851_v51, 1e-06  ;;  %v2854_v33 = vmax.f32 %v1976_v53, 0.0  ;;  %v6220_v57 = vpop.f32.mrb[52].mxu0 }
 0x180   : > { %v6805_v61 = vpop.eup %6804  ;;  %v3399_v63 = vmul.f32 0.6931472, %v6803_v25  ;;  %v3112_v58 = vmax.f32 %v2856_v12, 1e-06  ;;  %v2857_v4 = vmax.f32 %v1987_v34, 0.0  ;;  %v4716_v10 = vpack.c.bf16 %v8520_v20, %v8498_v52  ;;  %v1991_v0 = vpop.f32.mrb[53].mxu0 }
 0x181   : > { %v6807_v1 = vpop.eup %6806  ;;  %v4171_v2 = vmul.f32 1.442695, %v3873_v36  ;;  %v3405_v3 = vmul.f32 0.6931472, %v6805_v61  ;;  %6822 = vlog2.f32 %v3107_v55  ;;  %v3110_v6 = vmax.f32 %v2854_v33, 1e-06  ;;  %5983 = vmatpush3.bf16.msra.mxu1 %v4707_v23 }
 0x182   : > { %v3871_v8 = vmul.f32 %v8272_v13, %v3399_v63  ;;  %v3401_v9 = vmul.f32 0.6931472, %v6807_v1  ;;  %6824 = vlog2.f32 %v3112_v58  ;;  %v3113_v14 = vmax.f32 %v2857_v4, 1e-06  ;;  %5984 = vmatprep.subr.bf16.mxu1 %v4716_v10  ;;  %v6221_v15 = vpop.f32.mrb[54].mxu0  ;;  %v6624_v12 = vld [vmem:[%s10506_s1 + $0x2a0] sm:$0xff]  }
 0x183   : > { %v6809_v7 = vpop.eup %6808  ;;  %6826 = vpow2.f32 %v4171_v2  ;;  %v3874_v19 = vmul.f32 %v8272_v13, %v3405_v3  ;;  %v1979_v52 = vadd.f32 %v8507_v54, %v1978_v39  ;;  %v4708_v17 = vpack.c.bf16 %v8418_v62, %v8404_v26  ;;  %v1994_v18 = vpop.f32.mrb[55].mxu0 }
 0x184   : > { %v6811_v20 = vpop.eup %6810  ;;  %v4167_v21 = vmul.f32 1.442695, %v3871_v8  ;;  %v3872_v22 = vmul.f32 %v8272_v13, %v3401_v9  ;;  %v3411_v24 = vmul.f32 0.6931472, %v6809_v7  ;;  %6828 = vlog2.f32 %v3110_v6  ;;  %6327 = vmatmul.mubr.msk.bf16.gmra.mrb[160].mxu0 %vm1357_vm2, %v6617_v59 }
 0x185   : > { %v8565_v27 = vpop.eup %6812  ;;  %v4173_v31 = vmul.f32 1.442695, %v3874_v19  ;;  %v3407_v40 = vmul.f32 0.6931472, %v6811_v20  ;;  %6830 = vlog2.f32 %v3113_v14  ;;  %v2855_v47 = vmax.f32 %v1979_v52, 0.0  ;;  %5985 = vmatpush3.bf16.msra.mxu1 %v4708_v17  ;;  %6330 = vmatprep.mubr.msk.bf16.mxu0 %vm1357_vm2, %v6620_v60  ;;  %v6625_v52 = vld [vmem:[%s10506_s1 + $0x2a8] sm:$0xff]  }
 0x186   : > { %v8568_v5 = vpop.eup %6814  ;;  %6832 = vpow2.f32 %v4167_v21  ;;  %v4169_v26 = vmul.f32 1.442695, %v3872_v22  ;;  %v3877_v62 = vmul.f32 %v8272_v13, %v3411_v24  ;;  %v2000_v16 = vadd.f32 %v8507_v54, %v6220_v57 }
 0x187   : > { %v8572_v35 = vpop.eup %6816  ;;  %6834 = vpow2.f32 %v4173_v31  ;;  %v3875_v28 = vmul.f32 %v8272_v13, %v3407_v40  ;;  %v3111_v30 = vmax.f32 %v2855_v47, 1e-06  ;;  %v1992_v32 = vadd.f32 %v8507_v54, %v1991_v0  ;;  %v6224_v38 = vpop.f32.mrb[56].mxu0 }
 0x188   : > { %v8576_v39 = vpop.eup %6818  ;;  %6836 = vpow2.f32 %v4169_v26  ;;  %v4179_v42 = vmul.f32 1.442695, %v3877_v62  ;;  %v2860_v11 = vmax.f32 %v2000_v16, 0.0  ;;  %v2003_v37 = vadd.f32 %v8507_v54, %v6221_v15  ;;  %v2007_v43 = vpop.f32.mrb[57].mxu0  ;;  %v6628_v62 = vld [vmem:[%s10506_s1 + $0x2b0] sm:$0xff]  }
 0x189   : > { %v6821_v46 = vpop.eup %6820  ;;  %v4175_v48 = vmul.f32 1.442695, %v3875_v28  ;;  %6838 = vlog2.f32 %v3111_v30  ;;  %v2858_v50 = vmax.f32 %v1992_v32, 0.0  ;;  %v1995_v51 = vadd.f32 %v8507_v54, %v1994_v18  ;;  %v6225_v53 = vpop.f32.mrb[58].mxu0 }
 0x18a   : > { %6840 = vpow2.f32 %v4179_v42  ;;  %v3413_v23 = vmul.f32 0.6931472, %v6821_v46  ;;  %v3116_v34 = vmax.f32 %v2860_v11, 1e-06  ;;  %v2861_v25 = vmax.f32 %v2003_v37, 0.0  ;;  %v2010_v36 = vpop.f32.mrb[59].mxu0 }
 0x18b   : > { %v6823_v55 = vpop.eup %6822  ;;  %6842 = vpow2.f32 %v4175_v48  ;;  %v3114_v33 = vmax.f32 %v2858_v50, 1e-06  ;;  %v2859_v57 = vmax.f32 %v1995_v51, 0.0  ;;  %v2016_v59 = vadd.f32 %v8507_v54, %v6224_v38 }
 0x18c   : > { %v6825_v60 = vpop.eup %6824  ;;  %v3878_v61 = vmul.f32 %v8272_v13, %v3413_v23  ;;  %v3409_v63 = vmul.f32 0.6931472, %v6823_v55  ;;  %6844 = vlog2.f32 %v3116_v34  ;;  %v3117_v58 = vmax.f32 %v2861_v25, 1e-06  ;;  %6331 = vmatmul.mubr.msk.bf16.gmra.mrb[164].mxu0 %vm1357_vm2, %v6621_v45 }
 0x18d   : > { %v8589_v4 = vpop.eup %6826  ;;  %v3419_v10 = vmul.f32 0.6931472, %v6825_v60  ;;  %6846 = vlog2.f32 %v3114_v33  ;;  %v3115_v0 = vmax.f32 %v2859_v57, 1e-06  ;;  %v2864_v1 = vmax.f32 %v2016_v59, 0.0  ;;  %6334 = vmatprep.mubr.msk.bf16.mxu0 %vm1357_vm2, %v6624_v12  ;;  %v6629_v33 = vld [vmem:[%s10506_s1 + $0x2b8] sm:$0xff]  }
 0x18e   : > { %v6829_v2 = vpop.eup %6828  ;;  %v4181_v3 = vmul.f32 1.442695, %v3878_v61  ;;  %v3876_v6 = vmul.f32 %v8272_v13, %v3409_v63  ;;  %6848 = vlog2.f32 %v3117_v58  ;;  %v2008_v8 = vadd.f32 %v8507_v54, %v2007_v43 }
 0x18f   : > { %v6831_v9 = vpop.eup %6830  ;;  %v3881_v14 = vmul.f32 %v8272_v13, %v3419_v10  ;;  %v3415_v15 = vmul.f32 0.6931472, %v6829_v2  ;;  %6850 = vlog2.f32 %v3115_v0  ;;  %v3120_v7 = vmax.f32 %v2864_v1, 1e-06  ;;  %v6228_v19 = vpop.f32.mrb[60].mxu0 }
 0x190   : > { %v8598_v17 = vpop.eup %6832  ;;  %6852 = vpow2.f32 %v4181_v3  ;;  %v4177_v18 = vmul.f32 1.442695, %v3876_v6  ;;  %v3421_v20 = vmul.f32 0.6931472, %v6831_v9  ;;  %v2862_v21 = vmax.f32 %v2008_v8, 0.0  ;;  %v2023_v22 = vpop.f32.mrb[61].mxu0 }
 0x191   : > { %v8600_v24 = vpop.eup %6834  ;;  %v4187_v31 = vmul.f32 1.442695, %v3881_v14  ;;  %v3879_v40 = vmul.f32 %v8272_v13, %v3415_v15  ;;  %6854 = vlog2.f32 %v3120_v7  ;;  %v2019_v47 = vadd.f32 %v8507_v54, %v6225_v53  ;;  %v6229_v26 = vpop.f32.mrb[62].mxu0  ;;  %v6630_v15 = vld [vmem:[%s10506_s1 + $0x2c0] sm:$0xff]  }
 0x192   : > { %v8607_v16 = vpop.eup %6836  ;;  %6856 = vpow2.f32 %v4177_v18  ;;  %v3882_v28 = vmul.f32 %v8272_v13, %v3421_v20  ;;  %v3118_v30 = vmax.f32 %v2862_v21, 1e-06  ;;  %v2011_v32 = vadd.f32 %v8507_v54, %v2010_v36  ;;  %v2026_v38 = vpop.f32.mrb[63].mxu0 }
 0x193   : > { %v6839_v42 = vpop.eup %6838  ;;  %6858 = vpow2.f32 %v4187_v31  ;;  %v4183_v11 = vmul.f32 1.442695, %v3879_v40  ;;  %v2865_v37 = vmax.f32 %v2019_v47, 0.0  ;;  %v2032_v43 = vadd.f32 %v8507_v54, %v6228_v19 }
 0x194   : > { %v8612_v45 = vpop.eup %6840  ;;  %v4189_v46 = vmul.f32 1.442695, %v3882_v28  ;;  %v3417_v48 = vmul.f32 0.6931472, %v6839_v42  ;;  %6860 = vlog2.f32 %v3118_v30  ;;  %v2863_v50 = vmax.f32 %v2011_v32, 0.0  ;;  %6335 = vmatmul.mubr.msk.bf16.gmra.mrb[168].mxu0 %vm1357_vm2, %v6625_v52 }
 0x195   : > { %v8615_v51 = vpop.eup %6842  ;;  %6862 = vpow2.f32 %v4183_v11  ;;  %v3121_v53 = vmax.f32 %v2865_v37, 1e-06  ;;  %v2868_v12 = vmax.f32 %v2032_v43, 0.0  ;;  %v2024_v23 = vadd.f32 %v8507_v54, %v2023_v22  ;;  %6338 = vmatprep.mubr.msk.bf16.mxu0 %vm1357_vm2, %v6628_v62 }
 0x196   : > { %v6845_v34 = vpop.eup %6844  ;;  %6864 = vpow2.f32 %v4189_v46  ;;  %v3880_v25 = vmul.f32 %v8272_v13, %v3417_v48  ;;  %v3119_v36 = vmax.f32 %v2863_v50, 1e-06  ;;  %v2035_v55 = vadd.f32 %v8507_v54, %v6229_v26 }
 0x197   : > { %v6847_v57 = vpop.eup %6846  ;;  %v3427_v59 = vmul.f32 0.6931472, %v6845_v34  ;;  %6866 = vlog2.f32 %v3121_v53  ;;  %v3124_v60 = vmax.f32 %v2868_v12, 1e-06  ;;  %v2866_v61 = vmax.f32 %v2024_v23, 0.0  ;;  %v6232_v63 = vpop.f32.mrb[64].mxu0 }
 0x198   : > { %v6849_v58 = vpop.eup %6848  ;;  %v4185_v10 = vmul.f32 1.442695, %v3880_v25  ;;  %v3423_v0 = vmul.f32 0.6931472, %v6847_v57  ;;  %6868 = vlog2.f32 %v3119_v36  ;;  %v2869_v1 = vmax.f32 %v2035_v55, 0.0  ;;  %v2039_v2 = vpop.f32.mrb[65].mxu0 }
 0x199   : > { %v6851_v3 = vpop.eup %6850  ;;  %v3885_v6 = vmul.f32 %v8272_v13, %v3427_v59  ;;  %v3429_v8 = vmul.f32 0.6931472, %v6849_v58  ;;  %6870 = vlog2.f32 %v3124_v60  ;;  %v3122_v9 = vmax.f32 %v2866_v61, 1e-06  ;;  %v6233_v14 = vpop.f32.mrb[66].mxu0  ;;  %v6631_v57 = vld [vmem:[%s10506_s1 + $0x2c8] sm:$0xff]  }
 0x19a   : > { %v8628_v7 = vpop.eup %6852  ;;  %6872 = vpow2.f32 %v4185_v10  ;;  %v3883_v19 = vmul.f32 %v8272_v13, %v3423_v0  ;;  %v3425_v52 = vmul.f32 0.6931472, %v6851_v3  ;;  %v3125_v18 = vmax.f32 %v2869_v1, 1e-06  ;;  %v2042_v20 = vpop.f32.mrb[67].mxu0  ;;  %v6632_v10 = vld [vmem:[%s10506_s1 + $0x2d0] sm:$0xff]  }
 0x19b   : > { %v6855_v21 = vpop.eup %6854  ;;  %v4195_v22 = vmul.f32 1.442695, %v3885_v6  ;;  %v3886_v31 = vmul.f32 %v8272_v13, %v3429_v8  ;;  %6874 = vlog2.f32 %v3122_v9  ;;  %v2027_v40 = vadd.f32 %v8507_v54, %v2026_v38 }
 0x19c   : > { %v8633_v47 = vpop.eup %6856  ;;  %v4191_v26 = vmul.f32 1.442695, %v3883_v19  ;;  %v3884_v62 = vmul.f32 %v8272_v13, %v3425_v52  ;;  %v3435_v28 = vmul.f32 0.6931472, %v6855_v21  ;;  %6876 = vlog2.f32 %v3125_v18  ;;  %6339 = vmatmul.mubr.msk.bf16.gmra.mrb[172].mxu0 %vm1357_vm2, %v6629_v33 }
 0x19d   : > { %v8637_v30 = vpop.eup %6858  ;;  %6878 = vpow2.f32 %v4195_v22  ;;  %v4197_v32 = vmul.f32 1.442695, %v3886_v31  ;;  %v2867_v42 = vmax.f32 %v2027_v40, 0.0  ;;  %v2048_v11 = vadd.f32 %v8507_v54, %v6232_v63  ;;  %6342 = vmatprep.mubr.msk.bf16.mxu0 %vm1357_vm2, %v6630_v15 }
 0x19e   : > { %v6861_v37 = vpop.eup %6860  ;;  %6880 = vpow2.f32 %v4191_v26  ;;  %v4193_v38 = vmul.f32 1.442695, %v3884_v62  ;;  %v3889_v43 = vmul.f32 %v8272_v13, %v3435_v28  ;;  %v2040_v46 = vadd.f32 %v8507_v54, %v2039_v2 }
 0x19f   : > { %v8643_v48 = vpop.eup %6862  ;;  %6882 = vpow2.f32 %v4197_v32  ;;  %v3431_v50 = vmul.f32 0.6931472, %v6861_v37  ;;  %v3123_v53 = vmax.f32 %v2867_v42, 1e-06  ;;  %v2872_v12 = vmax.f32 %v2048_v11, 0.0  ;;  %v6236_v23 = vpop.f32.mrb[68].mxu0 }
 0x1a0   : > { %v8645_v34 = vpop.eup %6864  ;;  %6884 = vpow2.f32 %v4193_v38  ;;  %v4203_v25 = vmul.f32 1.442695, %v3889_v43  ;;  %v2870_v36 = vmax.f32 %v2040_v46, 0.0  ;;  %v2051_v55 = vadd.f32 %v8507_v54, %v6233_v14  ;;  %v8648_v33 = vpop.f32.mrb[69].mxu0 }
 0x1a1   : > { %v6867_v59 = vpop.eup %6866  ;;  %v3887_v60 = vmul.f32 %v8272_v13, %v3431_v50  ;;  %6886 = vlog2.f32 %v3123_v53  ;;  %v3128_v61 = vmax.f32 %v2872_v12, 1e-06  ;;  %v2043_v63 = vadd.f32 %v8507_v54, %v2042_v20  ;;  %v8655_v58 = vpop.f32.mrb[70].mxu0 }
 0x1a2   : > { %v6869_v0 = vpop.eup %6868  ;;  %6888 = vpow2.f32 %v4203_v25  ;;  %v3437_v1 = vmul.f32 0.6931472, %v6867_v59  ;;  %v3126_v2 = vmax.f32 %v2870_v36, 1e-06  ;;  %v2873_v3 = vmax.f32 %v2051_v55, 0.0  ;;  %v8660_v6 = vpop.f32.mrb[71].mxu0 }
 0x1a3   : > { %v6871_v8 = vpop.eup %6870  ;;  %v4199_v9 = vmul.f32 1.442695, %v3887_v60  ;;  %v3433_v14 = vmul.f32 0.6931472, %v6869_v0  ;;  %6890 = vlog2.f32 %v3128_v61  ;;  %v2871_v15 = vmax.f32 %v2043_v63, 0.0  ;;  %v6633_v25 = vld [vmem:[%s10506_s1 + $0x2d8] sm:$0xff]  }
 0x1a4   : > { %v8662_v19 = vpop.eup %6872  ;;  %v3890_v52 = vmul.f32 %v8272_v13, %v3437_v1  ;;  %v3443_v18 = vmul.f32 0.6931472, %v6871_v8  ;;  %6892 = vlog2.f32 %v3126_v2  ;;  %v3129_v20 = vmax.f32 %v2873_v3, 1e-06  ;;  %6343 = vmatmul.mubr.msk.bf16.gmra.mrb[176].mxu0 %vm1357_vm2, %v6631_v57  ;;  %v6634_v61 = vld [vmem:[%s10506_s1 + $0x2e0] sm:$0xff]  }
 0x1a5   : > { %v6875_v21 = vpop.eup %6874  ;;  %6894 = vpow2.f32 %v4199_v9  ;;  %v3888_v22 = vmul.f32 %v8272_v13, %v3433_v14  ;;  %v3127_v31 = vmax.f32 %v2871_v15, 1e-06  ;;  %v2064_v40 = vadd.f32 %v8507_v54, %v6236_v23  ;;  %6346 = vmatprep.mubr.msk.bf16.mxu0 %vm1357_vm2, %v6632_v10 }
 0x1a6   : > { %v6877_v26 = vpop.eup %6876  ;;  %v4205_v62 = vmul.f32 1.442695, %v3890_v52  ;;  %v3893_v28 = vmul.f32 %v8272_v13, %v3443_v18  ;;  %v3439_v32 = vmul.f32 0.6931472, %v6875_v21  ;;  %6896 = vlog2.f32 %v3129_v20 }
 0x1a7   : > { %v8670_v42 = vpop.eup %6878  ;;  %v4201_v11 = vmul.f32 1.442695, %v3888_v22  ;;  %v3445_v37 = vmul.f32 0.6931472, %v6877_v26  ;;  %6898 = vlog2.f32 %v3127_v31  ;;  %v2876_v38 = vmax.f32 %v2064_v40, 0.0  ;;  %v8672_v43 = vpop.f32.mrb[72].mxu0 }
 0x1a8   : > { %v8674_v46 = vpop.eup %6880  ;;  %6900 = vpow2.f32 %v4205_v62  ;;  %v4211_v50 = vmul.f32 1.442695, %v3893_v28  ;;  %v3891_v53 = vmul.f32 %v8272_v13, %v3439_v32  ;;  %v4600_v12 = vshrl.u32 %v4599_v56, 7  ;;  %v8678_v23 = vpop.f32.mrb[73].mxu0 }
 0x1a9   : > { %v8683_v36 = vpop.eup %6882  ;;  %6902 = vpow2.f32 %v4201_v11  ;;  %v3894_v55 = vmul.f32 %v8272_v13, %v3445_v37  ;;  %v3132_v57 = vmax.f32 %v2876_v38, 1e-06  ;;  %v8687_v59 = vand.u32 127, %v4599_v56  ;;  %v8689_v60 = vpop.f32.mrb[74].mxu0 }
 0x1aa   : > { %v8694_v63 = vpop.eup %6884  ;;  %6904 = vpow2.f32 %v4211_v50  ;;  %v4207_v10 = vmul.f32 1.442695, %v3891_v53  ;;  %v8696_v0 = vmul.u32 256, %v4600_v12  ;;  %v4635_v1 = vadd.s32 1, %v4600_v12  ;;  %v8698_v2 = vpop.f32.mrb[75].mxu0 }
 0x1ab   : > { %10537 = vst [vmem:[#allocation8_spill] sm:$0xff] %v8687_v59  ;;  %v6887_v3 = vpop.eup %6886  ;;  %v4213_v8 = vmul.f32 1.442695, %v3894_v55  ;;  %6906 = vlog2.f32 %v3132_v57  ;;  %v4603_v56 = vadd.s32 128, %v8687_v59  ;;  %v4725_v52 = vpack.c.bf16 %v8662_v19, %v8643_v48 }
 0x1ac   : > { %10538 = vst [vmem:[#allocation9_spill] sm:$0xff] %v8696_v0  ;;  %v8701_v9 = vpop.eup %6888  ;;  %6908 = vpow2.f32 %v4207_v10  ;;  %v3441_v14 = vmul.f32 0.6931472, %v6887_v3  ;;  %v8703_v15 = vmul.u32 256, %v4635_v1  ;;  %6347 = vmatmul.mubr.msk.bf16.gmra.mrb[180].mxu0 %vm1357_vm2, %v6633_v25  ;;  %v2056_v20 = vadd.f32 %v8507_v54, %v8648_v33 }
 0x1ad   : > { %v6891_v18 = vpop.eup %6890  ;;  %6910 = vpow2.f32 %v4213_v8  ;;  %vm4620_vm3 = vcmp.ge.s32.totalorder %v4603_v56, %v8696_v0  ;;  %vm4619_vm4 = vcmp.ge.s32.totalorder %v8687_v59, %v8696_v0  ;;  %6350 = vmatprep.mubr.msk.bf16.mxu0 %vm1357_vm2, %v6634_v61  ;;  %5992 = vmatprep.subr.bf16.mxu1 %v4725_v52  ;;  %v4717_v26 = vpack.c.bf16 %v8544_v44, %v8532_v41  ;;  %v6635_v44 = vld [vmem:[%s10506_s1 + $0x2e8] sm:$0xff]  }
 0x1ae   : > { %10539 = vst [vmem:[#allocation10_spill] sm:$0xff] %v8703_v15  ;;  %v6893_v21 = vpop.eup %6892  ;;  %v3892_v22 = vmul.f32 %v8272_v13, %v3441_v14  ;;  %v3451_v31 = vmul.f32 0.6931472, %v6891_v18  ;;  %vm4638_vm5 = vcmp.lt.s32.totalorder %v4603_v56, %v8703_v15  ;;  %vm4637_vm6 = vcmp.lt.s32.totalorder %v8687_v59, %v8703_v15 }
 0x1af   : > { %v8718_v48 = vpop.eup %6894  ;;  %v3447_v19 = vmul.f32 0.6931472, %v6893_v21  ;;  %vm8720_vm7 = vmand %vm4620_vm3, %vm4638_vm5  ;;  %v2874_v40 = vmax.f32 %v2056_v20, 0.0  ;;  %v2067_v62 = vadd.f32 %v8507_v54, %v8655_v58  ;;  %v8728_v28 = vpop.f32.mrb[76].mxu0  ;;  %v4726_v38 = vpack.c.bf16 %v8645_v34, %v8637_v30  ;;  %v6636_v58 = vld [vmem:[%s10506_s1 + $0x2f0] sm:$0xff]  }
 0x1b0   : > { %v6897_v32 = vpop.eup %6896  ;;  %v4209_v11 = vmul.f32 1.442695, %v3892_v22  ;;  %v3897_v37 = vmul.f32 %v8272_v13, %v3451_v31  ;;  %vm5785_vm8 = vmpackc.low %vm8720_vm7, %vm8720_vm7  ;;  %v2059_v50 = vadd.f32 %v8507_v54, %v8660_v6  ;;  %v8738_v41 = vpop.f32.mrb[77].mxu0  ;;  %v10515_v55 = vmov 0.00390625|0.00390625  }
 0x1b1   : > { %v6899_v53 = vpop.eup %6898  ;;  %v3895_v12 = vmul.f32 %v8272_v13, %v3447_v19  ;;  %v3453_v25 = vmul.f32 0.6931472, %v6897_v32  ;;  %5786 = vmatprep.mubr.msk.bf16.mxu1 %vm5785_vm8, %v10515_v55  ;;  %v3130_v30 = vmax.f32 %v2874_v40, 1e-06  ;;  %vm4653_vm9 = vmand %vm4619_vm4, %vm4637_vm6  ;;  %v2877_v34 = vmax.f32 %v2067_v62, 0.0  ;;  %v8754_v6 = vpop.f32.mrb[78].mxu0 }
 0x1b2   : > { %v8756_v57 = vpop.eup %6900  ;;  %6912 = vpow2.f32 %v4209_v11  ;;  %v4219_v61 = vmul.f32 1.442695, %v3897_v37  ;;  %v3449_v10 = vmul.f32 0.6931472, %v6899_v53  ;;  %vm5787_vm10 = vmpackc.low %vm4653_vm9, %vm4653_vm9  ;;  %v2875_v1 = vmax.f32 %v2059_v50, 0.0  ;;  %v8758_v3 = vpop.f32.mrb[79].mxu0 }
 0x1b3   : > { %v8760_v8 = vpop.eup %6902  ;;  %v4215_v56 = vmul.f32 1.442695, %v3895_v12  ;;  %v3898_v14 = vmul.f32 %v8272_v13, %v3453_v25  ;;  %6914 = vlog2.f32 %v3130_v30  ;;  %5788 = vmatmul.mubr.msk.bf16.vlgmr.msra.gmra.mrb[60].mxu1 %vm5787_vm10, %v10515_v55  ;;  %v3133_v52 = vmax.f32 %v2877_v34, 1e-06  ;;  %v6638_v53 = vld [vmem:[%s10506_s1 + $0x300] sm:$0xff]  }
 0x1b4   : > { %v8764_v18 = vpop.eup %6904  ;;  %6916 = vpow2.f32 %v4219_v61  ;;  %v3896_v20 = vmul.f32 %v8272_v13, %v3449_v10  ;;  %5993 = vmatpush3.bf16.msra.mxu1 %v4717_v26  ;;  %v3131_v21 = vmax.f32 %v2875_v1, 1e-06  ;;  %v4718_v22 = vpack.c.bf16 %v8540_v49, %v8529_v29  ;;  %6351 = vmatmul.mubr.msk.bf16.gmra.mrb[184].mxu0 %vm1357_vm2, %v6635_v44  ;;  %v6637_v44 = vld [vmem:[%s10506_s1 + $0x2f8] sm:$0xff]  }
 0x1b5   : > { %v6907_v31 = vpop.eup %6906  ;;  %6918 = vpow2.f32 %v4215_v56  ;;  %v4221_v19 = vmul.f32 1.442695, %v3898_v14  ;;  %5994 = vmatprep.subr.bf16.mxu1 %v4726_v38  ;;  %v2080_v33 = vadd.f32 %v8507_v54, %v8672_v43  ;;  %v4727_v40 = vpack.c.bf16 %v8694_v63, %v8674_v46  ;;  %6354 = vmatprep.mubr.msk.bf16.mxu0 %vm1357_vm2, %v6636_v58 }
 0x1b6   : > { %v8775_v62 = vpop.eup %6908  ;;  %v4217_v26 = vmul.f32 1.442695, %v3896_v20  ;;  %v3459_v32 = vmul.f32 0.6931472, %v6907_v31  ;;  %6920 = vlog2.f32 %v3133_v52  ;;  %v2072_v29 = vadd.f32 %v8507_v54, %v8678_v23 }
 0x1b7   : > { %v8779_v49 = vpop.eup %6910  ;;  %6922 = vpow2.f32 %v4221_v19  ;;  %v2880_v11 = vmax.f32 %v2080_v33, 0.0  ;;  %v4719_v43 = vpack.c.bf16 %v8576_v39, %v8568_v5  ;;  %v2083_v46 = vadd.f32 %v8507_v54, %v8689_v60  ;;  %v6248_v63 = vpop.f32.mrb[80].mxu0 }
 0x1b8   : > { %6924 = vpow2.f32 %v4217_v26  ;;  %v3901_v37 = vmul.f32 %v8272_v13, %v3459_v32  ;;  %5995 = vmatpush3.bf16.msra.mxu1 %v4718_v22  ;;  %v2878_v38 = vmax.f32 %v2072_v29, 0.0  ;;  %v4728_v50 = vpack.c.bf16 %v8683_v36, %v8670_v42  ;;  %v2103_v23 = vpop.f32.mrb[81].mxu0 }
 0x1b9   : > { %6926 = vlog2.f32 %v3131_v21  ;;  %v3136_v58 = vmax.f32 %v2880_v11, 1e-06  ;;  %5996 = vmatprep.subr.bf16.mxu1 %v4727_v40  ;;  %v2881_v5 = vmax.f32 %v2083_v46, 0.0  ;;  %v2075_v39 = vadd.f32 %v8507_v54, %v8698_v2  ;;  %v8793_v60 = vpop.f32.mrb[82].mxu0  ;;  %v6639_v40 = vld [vmem:[%s10506_s1 + $0x308] sm:$0xff]  }
 0x1ba   : > { %v4227_v12 = vmul.f32 1.442695, %v3901_v37  ;;  %v3134_v42 = vmax.f32 %v2878_v38, 1e-06  ;;  %v4720_v36 = vpack.c.bf16 %v8572_v35, %v8565_v27  ;;  %v2096_v25 = vadd.f32 %v8507_v54, %v8728_v28  ;;  %v8802_v30 = vpop.f32.mrb[83].mxu0 }
 0x1bb   : > { %6928 = vlog2.f32 %v3136_v58  ;;  %v3137_v34 = vmax.f32 %v2881_v5, 1e-06  ;;  %v2879_v61 = vmax.f32 %v2075_v39, 0.0  ;;  %v4729_v2 = vpack.c.bf16 %v8760_v8, %v8718_v48 }
 0x1bc   : > { %v8806_v10 = vpop.eup %6912  ;;  %6930 = vpow2.f32 %v4227_v12  ;;  %5997 = vmatpush3.bf16.msra.mxu1 %v4719_v43  ;;  %v2884_v1 = vmax.f32 %v2096_v25, 0.0  ;;  %v2088_v56 = vadd.f32 %v8507_v54, %v8738_v41  ;;  %v4721_v27 = vpack.c.bf16 %v8607_v16, %v8598_v17  ;;  %6355 = vmatmul.mubr.msk.bf16.gmra.mrb[188].mxu0 %vm1357_vm2, %v6637_v44 }
 0x1bd   : > { %v6915_v35 = vpop.eup %6914  ;;  %6932 = vlog2.f32 %v3134_v42  ;;  %5998 = vmatprep.subr.bf16.mxu1 %v4728_v50  ;;  %v3135_v28 = vmax.f32 %v2879_v61, 1e-06  ;;  %v2099_v48 = vadd.f32 %v8507_v54, %v8754_v6  ;;  %v4730_v8 = vpack.c.bf16 %v8756_v57, %v8701_v9  ;;  %6358 = vmatprep.mubr.msk.bf16.mxu0 %vm1357_vm2, %v6638_v53 }
 0x1be   : > { %v8818_v14 = vpop.eup %6916  ;;  %v3455_v41 = vmul.f32 0.6931472, %v6915_v35  ;;  %6934 = vlog2.f32 %v3137_v34  ;;  %v3140_v52 = vmax.f32 %v2884_v1, 1e-06  ;;  %v2882_v17 = vmax.f32 %v2088_v56, 0.0 }
 0x1bf   : > { %v8820_v16 = vpop.eup %6918  ;;  %6936 = vlog2.f32 %v3135_v28  ;;  %v2885_v20 = vmax.f32 %v2099_v48, 0.0  ;;  %v2091_v21 = vadd.f32 %v8507_v54, %v8758_v3  ;;  %v4722_v6 = vpack.c.bf16 %v8600_v24, %v8589_v4  ;;  %v8826_v22 = vpop.f32.mrb[84].mxu0 }
 0x1c0   : > { %v6921_v9 = vpop.eup %6920  ;;  %v3899_v57 = vmul.f32 %v8272_v13, %v3455_v41  ;;  %5999 = vmatpush3.bf16.msra.mxu1 %v4720_v36  ;;  %6938 = vlog2.f32 %v3140_v52  ;;  %v3138_v31 = vmax.f32 %v2882_v17, 1e-06  ;;  %v2112_v19 = vadd.f32 %v8507_v54, %v6248_v63  ;;  %v8830_v33 = vpop.f32.mrb[85].mxu0 }
 0x1c1   : > { %v8835_v3 = vpop.eup %6922  ;;  %v3461_v26 = vmul.f32 0.6931472, %v6921_v9  ;;  %6000 = vmatprep.subr.bf16.mxu1 %v4729_v2  ;;  %v3141_v4 = vmax.f32 %v2885_v20, 1e-06  ;;  %v2883_v24 = vmax.f32 %v2091_v21, 0.0  ;;  %v4731_v32 = vpack.c.bf16 %v8806_v10, %v8775_v62  ;;  %v8839_v29 = vpop.f32.mrb[86].mxu0 }
 0x1c2   : > { %v8841_v11 = vpop.eup %6924  ;;  %v4223_v43 = vmul.f32 1.442695, %v3899_v57  ;;  %6940 = vlog2.f32 %v3138_v31  ;;  %v2888_v46 = vmax.f32 %v2112_v19, 0.0  ;;  %v2104_v63 = vadd.f32 %v8507_v54, %v2103_v23  ;;  %v8844_v37 = vpop.f32.mrb[87].mxu0  ;;  %v8860_v2 = vld [vmem:[%s10508_s3] ss:$0 sm:$0xff] }
 0x1c3   : > { %v6927_v38 = vpop.eup %6926  ;;  %v3902_v50 = vmul.f32 %v8272_v13, %v3461_v26  ;;  %6942 = vlog2.f32 %v3141_v4  ;;  %v3139_v44 = vmax.f32 %v2883_v24, 1e-06  ;;  %v4723_v58 = vpack.c.bf16 %v8633_v47, %v8615_v51 }
 0x1c4   : > { %6944 = vpow2.f32 %v4223_v43  ;;  %v3457_v62 = vmul.f32 0.6931472, %v6927_v38  ;;  %6001 = vmatpush3.bf16.msra.mxu1 %v4721_v27  ;;  %v3144_v5 = vmax.f32 %v2888_v46, 1e-06  ;;  %v2886_v39 = vmax.f32 %v2104_v63, 0.0  ;;  %6359 = vmatmul.mubr.msk.bf16.gmra.mrb[192].mxu0 %vm1357_vm2, %v6639_v40 }
 0x1c5   : > { %v6929_v53 = vpop.eup %6928  ;;  %v4229_v12 = vmul.f32 1.442695, %v3902_v50  ;;  %6002 = vmatprep.subr.bf16.mxu1 %v4730_v8  ;;  %6946 = vlog2.f32 %v3139_v44  ;;  %v2115_v23 = vadd.f32 %v8507_v54, %v8793_v60  ;;  %v4732_v42 = vpack.c.bf16 %v8779_v49, %v8764_v18 }
 0x1c6   : > { %v8854_v36 = vpop.eup %6930  ;;  %v3900_v51 = vmul.f32 %v8272_v13, %v3457_v62  ;;  %v3467_v47 = vmul.f32 0.6931472, %v6929_v53  ;;  %6948 = vlog2.f32 %v3144_v5  ;;  %v3142_v25 = vmax.f32 %v2886_v39, 1e-06 }
 0x1c7   : > { %v6933_v34 = vpop.eup %6932  ;;  %6950 = vpow2.f32 %v4229_v12  ;;  %v2889_v61 = vmax.f32 %v2115_v23, 0.0  ;;  %v2107_v54 = vadd.f32 %v8860_v2, %v8802_v30  ;;  %v4724_v18 = vpack.c.bf16 %v8628_v7, %v8612_v45  ;;  %v8866_v49 = vpop.f32.mrb[88].mxu0 }
 0x1c8   : > { %v6935_v60 = vpop.eup %6934  ;;  %v4225_v10 = vmul.f32 1.442695, %v3900_v51  ;;  %v3905_v1 = vmul.f32 %v8272_v13, %v3467_v47  ;;  %v3463_v56 = vmul.f32 0.6931472, %v6933_v34  ;;  %6003 = vmatpush3.bf16.msra.mxu1 %v4722_v6  ;;  %6952 = vlog2.f32 %v3142_v25  ;;  %v8869_v27 = vpop.f32.mrb[89].mxu0 }
 0x1c9   : > { %v6937_v35 = vpop.eup %6936  ;;  %v3469_v28 = vmul.f32 0.6931472, %v6935_v60  ;;  %6004 = vmatprep.subr.bf16.mxu1 %v4731_v32  ;;  %v3145_v48 = vmax.f32 %v2889_v61, 1e-06  ;;  %v2887_v8 = vmax.f32 %v2107_v54, 0.0  ;;  %v2128_v30 = vadd.f32 %v8860_v2, %v8826_v22  ;;  %v8873_v45 = vpop.f32.mrb[90].mxu0 }
 0x1ca   : > { %v6939_v7 = vpop.eup %6938  ;;  %6954 = vpow2.f32 %v4225_v10  ;;  %v4235_v41 = vmul.f32 1.442695, %v3905_v1  ;;  %v3903_v52 = vmul.f32 %v8272_v13, %v3463_v56  ;;  %v3465_v17 = vmul.f32 0.6931472, %v6937_v35  ;;  %v8876_v20 = vpop.f32.mrb[91].mxu0 }
 0x1cb   : > { %v3906_v21 = vmul.f32 %v8272_v13, %v3469_v28  ;;  %v3475_v6 = vmul.f32 0.6931472, %v6939_v7  ;;  %6956 = vlog2.f32 %v3145_v48  ;;  %v3143_v9 = vmax.f32 %v2887_v8, 1e-06 }
 0x1cc   : > { %v6941_v57 = vpop.eup %6940  ;;  %6958 = vpow2.f32 %v4235_v41  ;;  %v4231_v31 = vmul.f32 1.442695, %v3903_v52  ;;  %v3904_v22 = vmul.f32 %v8272_v13, %v3465_v17  ;;  %6005 = vmatpush3.bf16.msra.mxu1 %v4723_v58  ;;  %v2892_v19 = vmax.f32 %v2128_v30, 0.0 }
 0x1cd   : > { %v6943_v40 = vpop.eup %6942  ;;  %v4237_v26 = vmul.f32 1.442695, %v3906_v21  ;;  %v3909_v4 = vmul.f32 %v8272_v13, %v3475_v6  ;;  %v3471_v24 = vmul.f32 0.6931472, %v6941_v57  ;;  %6006 = vmatprep.subr.bf16.mxu1 %v4732_v42  ;;  %6960 = vlog2.f32 %v3143_v9 }
 0x1ce   : > { %v8881_v32 = vpop.eup %6944  ;;  %6962 = vpow2.f32 %v4231_v31  ;;  %v4233_v43 = vmul.f32 1.442695, %v3904_v22  ;;  %v3477_v46 = vmul.f32 0.6931472, %v6943_v40  ;;  %v3148_v63 = vmax.f32 %v2892_v19, 1e-06 }
 0x1cf   : > { %v6947_v38 = vpop.eup %6946  ;;  %6964 = vpow2.f32 %v4237_v26  ;;  %v4243_v50 = vmul.f32 1.442695, %v3909_v4  ;;  %v3907_v44 = vmul.f32 %v8272_v13, %v3471_v24  ;;  %v2120_v58 = vadd.f32 %v8860_v2, %v8830_v33  ;;  %v8886_v62 = vpop.f32.mrb[92].mxu0 }
 0x1d0   : > { %v6949_v5 = vpop.eup %6948  ;;  %6966 = vpow2.f32 %v4233_v43  ;;  %v3910_v39 = vmul.f32 %v8272_v13, %v3477_v46  ;;  %v3473_v53 = vmul.f32 0.6931472, %v6947_v38  ;;  %6007 = vmatpush3.bf16.msra.mxu1 %v4724_v18  ;;  %v2131_v12 = vadd.f32 %v8860_v2, %v8839_v29  ;;  %v8891_v23 = vpop.f32.mrb[93].mxu0 }
 0x1d1   : > { %v8893_v42 = vpop.eup %6950  ;;  %6968 = vpow2.f32 %v4243_v50  ;;  %v4239_v51 = vmul.f32 1.442695, %v3907_v44  ;;  %v3483_v47 = vmul.f32 0.6931472, %v6949_v5  ;;  %v2890_v25 = vmax.f32 %v2120_v58, 0.0  ;;  %v8895_v33 = vpop.f32.mrb[94].mxu0 }
 0x1d2   : > { %v6953_v34 = vpop.eup %6952  ;;  %v4245_v61 = vmul.f32 1.442695, %v3910_v39  ;;  %v3908_v54 = vmul.f32 %v8272_v13, %v3473_v53  ;;  %6970 = vlog2.f32 %v3148_v63  ;;  %v2893_v60 = vmax.f32 %v2131_v12, 0.0  ;;  %v8898_v18 = vpop.f32.mrb[95].mxu0 }
 0x1d3   : > { %6972 = vpow2.f32 %v4239_v51  ;;  %v3913_v29 = vmul.f32 %v8272_v13, %v3483_v47  ;;  %v3479_v10 = vmul.f32 0.6931472, %v6953_v34  ;;  %v3146_v1 = vmax.f32 %v2890_v25, 1e-06 }
 0x1d4   : > { %v8901_v56 = vpop.eup %6954  ;;  %6974 = vpow2.f32 %v4245_v61  ;;  %v4241_v35 = vmul.f32 1.442695, %v3908_v54  ;;  %v3149_v28 = vmax.f32 %v2893_v60, 1e-06  ;;  %v2123_v48 = vadd.f32 %v8860_v2, %v8844_v37 }
 0x1d5   : > { %v6957_v8 = vpop.eup %6956  ;;  %v4251_v30 = vmul.f32 1.442695, %v3913_v29  ;;  %v3911_v7 = vmul.f32 %v8272_v13, %v3479_v10  ;;  %6976 = vlog2.f32 %v3146_v1  ;;  %v2144_v41 = vadd.f32 %v8860_v2, %v8866_v49 }
 0x1d6   : > { %v8908_v52 = vpop.eup %6958  ;;  %6978 = vpow2.f32 %v4241_v35  ;;  %v3485_v17 = vmul.f32 0.6931472, %v6957_v8  ;;  %v2891_v21 = vmax.f32 %v2123_v48, 0.0  ;;  %v2136_v6 = vadd.f32 %v8860_v2, %v8869_v27 }
 0x1d7   : > { %v6961_v9 = vpop.eup %6960  ;;  %6980 = vpow2.f32 %v4251_v30  ;;  %v4247_v57 = vmul.f32 1.442695, %v3911_v7  ;;  %v2896_v37 = vmax.f32 %v2144_v41, 0.0  ;;  %v2147_v31 = vadd.f32 %v8860_v2, %v8873_v45  ;;  %v6264_v22 = vpop.f32.mrb[96].mxu0 }
 0x1d8   : > { %v8914_v19 = vpop.eup %6962  ;;  %v3914_v49 = vmul.f32 %v8272_v13, %v3485_v17  ;;  %v3481_v40 = vmul.f32 0.6931472, %v6961_v9  ;;  %6982 = vlog2.f32 %v3149_v28  ;;  %v3147_v26 = vmax.f32 %v2891_v21, 1e-06  ;;  %v2167_v4 = vpop.f32.mrb[97].mxu0 }
 0x1d9   : > { %v8917_v24 = vpop.eup %6964  ;;  %6984 = vpow2.f32 %v4247_v57  ;;  %v3152_v27 = vmax.f32 %v2896_v37, 1e-06  ;;  %v2894_v43 = vmax.f32 %v2136_v6, 0.0  ;;  %v2897_v46 = vmax.f32 %v2147_v31, 0.0  ;;  %v6265_v63 = vpop.f32.mrb[98].mxu0 }
 0x1da   : > { %v8919_v38 = vpop.eup %6966  ;;  %v4253_v50 = vmul.f32 1.442695, %v3914_v49  ;;  %v3912_v45 = vmul.f32 %v8272_v13, %v3481_v40  ;;  %6986 = vlog2.f32 %v3147_v26  ;;  %v2139_v44 = vadd.f32 %v8860_v2, %v8876_v20  ;;  %v2170_v58 = vpop.f32.mrb[99].mxu0 }
 0x1db   : > { %v8924_v5 = vpop.eup %6968  ;;  %6988 = vlog2.f32 %v3152_v27  ;;  %v3150_v39 = vmax.f32 %v2894_v43, 1e-06  ;;  %v3153_v53 = vmax.f32 %v2897_v46, 1e-06  ;;  %v2160_v12 = vadd.f32 %v8860_v2, %v8886_v62 }
 0x1dc   : > { %v6971_v51 = vpop.eup %6970  ;;  %6990 = vpow2.f32 %v4253_v50  ;;  %v4249_v47 = vmul.f32 1.442695, %v3912_v45  ;;  %v2895_v25 = vmax.f32 %v2139_v44, 0.0  ;;  %v2152_v34 = vadd.f32 %v8860_v2, %v8891_v23 }
 0x1dd   : > { %v8930_v61 = vpop.eup %6972  ;;  %v3491_v54 = vmul.f32 0.6931472, %v6971_v51  ;;  %6992 = vlog2.f32 %v3150_v39  ;;  %v2900_v20 = vmax.f32 %v2160_v12, 0.0  ;;  %v2163_v60 = vadd.f32 %v8860_v2, %v8895_v33 }
 0x1de   : > { %v8934_v29 = vpop.eup %6974  ;;  %6994 = vpow2.f32 %v4249_v47  ;;  %v3151_v10 = vmax.f32 %v2895_v25, 1e-06  ;;  %v2898_v62 = vmax.f32 %v2152_v34, 0.0  ;;  %v2155_v1 = vadd.f32 %v8860_v2, %v8898_v18 }
 0x1df   : > { %v6977_v35 = vpop.eup %6976  ;;  %v3917_v28 = vmul.f32 %v8272_v13, %v3491_v54  ;;  %6996 = vlog2.f32 %v3153_v53  ;;  %v3156_v23 = vmax.f32 %v2900_v20, 1e-06  ;;  %v2901_v48 = vmax.f32 %v2163_v60, 0.0  ;;  %v6268_v8 = vpop.f32.mrb[100].mxu0 }
 0x1e0   : > { %v8939_v30 = vpop.eup %6978  ;;  %v3487_v7 = vmul.f32 0.6931472, %v6977_v35  ;;  %6998 = vlog2.f32 %v3151_v10  ;;  %v3154_v33 = vmax.f32 %v2898_v62, 1e-06  ;;  %v2899_v41 = vmax.f32 %v2155_v1, 0.0  ;;  %v8941_v17 = vpop.f32.mrb[101].mxu0 }
 0x1e1   : > { %v8943_v21 = vpop.eup %6980  ;;  %v4259_v6 = vmul.f32 1.442695, %v3917_v28  ;;  %7000 = vlog2.f32 %v3156_v23  ;;  %v3157_v18 = vmax.f32 %v2901_v48, 1e-06  ;;  %v2176_v9 = vadd.f32 %v8860_v2, %v6264_v22  ;;  %v8946_v57 = vpop.f32.mrb[102].mxu0 }
 0x1e2   : > { %v6983_v37 = vpop.eup %6982  ;;  %v3915_v31 = vmul.f32 %v8272_v13, %v3487_v7  ;;  %7002 = vlog2.f32 %v3154_v33  ;;  %v3155_v49 = vmax.f32 %v2899_v41, 1e-06  ;;  %v2168_v40 = vadd.f32 %v8860_v2, %v2167_v4  ;;  %v8950_v26 = vpop.f32.mrb[103].mxu0 }
 0x1e3   : > { %v8952_v27 = vpop.eup %6984  ;;  %7004 = vpow2.f32 %v4259_v6  ;;  %v3493_v43 = vmul.f32 0.6931472, %v6983_v37  ;;  %v2904_v46 = vmax.f32 %v2176_v9, 0.0  ;;  %v2179_v50 = vadd.f32 %v8860_v2, %v6265_v63 }
 0x1e4   : > { %v6987_v45 = vpop.eup %6986  ;;  %v4255_v22 = vmul.f32 1.442695, %v3915_v31  ;;  %7006 = vlog2.f32 %v3157_v18  ;;  %v2902_v44 = vmax.f32 %v2168_v40, 0.0  ;;  %v2171_v39 = vadd.f32 %v8860_v2, %v2170_v58 }
 0x1e5   : > { %v6989_v53 = vpop.eup %6988  ;;  %v3918_v12 = vmul.f32 %v8272_v13, %v3493_v43  ;;  %v3489_v51 = vmul.f32 0.6931472, %v6987_v45  ;;  %7008 = vlog2.f32 %v3155_v49  ;;  %v3160_v4 = vmax.f32 %v2904_v46, 1e-06 }
 0x1e6   : > { %v8957_v47 = vpop.eup %6990  ;;  %7010 = vpow2.f32 %v4255_v22  ;;  %v3499_v25 = vmul.f32 0.6931472, %v6989_v53  ;;  %v3158_v34 = vmax.f32 %v2902_v44, 1e-06  ;;  %v2905_v54 = vmax.f32 %v2179_v50, 0.0 }
 0x1e7   : > { %v6993_v20 = vpop.eup %6992  ;;  %v4261_v63 = vmul.f32 1.442695, %v3918_v12  ;;  %v3916_v60 = vmul.f32 %v8272_v13, %v3489_v51  ;;  %7012 = vlog2.f32 %v3160_v4  ;;  %v2903_v10 = vmax.f32 %v2171_v39, 0.0  ;;  %v8960_v62 = vpop.f32.mrb[104].mxu0 }
 0x1e8   : > { %v8962_v58 = vpop.eup %6994  ;;  %v3921_v1 = vmul.f32 %v8272_v13, %v3499_v25  ;;  %v3495_v35 = vmul.f32 0.6931472, %v6993_v20  ;;  %7014 = vlog2.f32 %v3158_v34  ;;  %v3161_v28 = vmax.f32 %v2905_v54, 1e-06  ;;  %v8965_v23 = vpop.f32.mrb[105].mxu0 }
 0x1e9   : > { %v6997_v48 = vpop.eup %6996  ;;  %7016 = vpow2.f32 %v4261_v63  ;;  %v4257_v7 = vmul.f32 1.442695, %v3916_v60  ;;  %v3159_v33 = vmax.f32 %v2903_v10, 1e-06  ;;  %v2192_v41 = vadd.f32 %v8860_v2, %v6268_v8  ;;  %v8968_v6 = vpop.f32.mrb[106].mxu0 }
 0x1ea   : > { %v6999_v18 = vpop.eup %6998  ;;  %v4267_v9 = vmul.f32 1.442695, %v3921_v1  ;;  %v3919_v37 = vmul.f32 %v8272_v13, %v3495_v35  ;;  %v3501_v31 = vmul.f32 0.6931472, %v6997_v48  ;;  %7018 = vlog2.f32 %v3161_v28  ;;  %v8971_v49 = vpop.f32.mrb[107].mxu0 }
 0x1eb   : > { %v7001_v40 = vpop.eup %7000  ;;  %7020 = vpow2.f32 %v4257_v7  ;;  %v3497_v43 = vmul.f32 0.6931472, %v6999_v18  ;;  %v2908_v46 = vmax.f32 %v2192_v41, 0.0  ;;  %v4605_v50 = vadd.s32 384, %v8687_v59 }
 0x1ec   : > { %v7003_v45 = vpop.eup %7002  ;;  %7022 = vpow2.f32 %v4267_v9  ;;  %v4263_v22 = vmul.f32 1.442695, %v3919_v37  ;;  %v3922_v8 = vmul.f32 %v8272_v13, %v3501_v31  ;;  %v3507_v44 = vmul.f32 0.6931472, %v7001_v40 }
 0x1ed   : > { %v8975_v39 = vpop.eup %7004  ;;  %v3920_v53 = vmul.f32 %v8272_v13, %v3497_v43  ;;  %v3503_v12 = vmul.f32 0.6931472, %v7003_v45  ;;  %7024 = vlog2.f32 %v3159_v33  ;;  %v3164_v51 = vmax.f32 %v2908_v46, 1e-06 }
 0x1ee   : > { %v7007_v4 = vpop.eup %7006  ;;  %7026 = vpow2.f32 %v4263_v22  ;;  %v4269_v25 = vmul.f32 1.442695, %v3922_v8  ;;  %v3925_v34 = vmul.f32 %v8272_v13, %v3507_v44  ;;  %vm4622_vm11 = vcmp.ge.s32.totalorder %v4605_v50, %v8696_v0 }
 0x1ef   : > { %v7009_v54 = vpop.eup %7008  ;;  %v4265_v20 = vmul.f32 1.442695, %v3920_v53  ;;  %v3923_v63 = vmul.f32 %v8272_v13, %v3503_v12  ;;  %v3509_v60 = vmul.f32 0.6931472, %v7007_v4  ;;  %7028 = vlog2.f32 %v3164_v51  ;;  %v8981_v10 = vpop.f32.mrb[108].mxu0 }
 0x1f0   : > { %v8983_v1 = vpop.eup %7010  ;;  %7030 = vpow2.f32 %v4269_v25  ;;  %v4275_v35 = vmul.f32 1.442695, %v3925_v34  ;;  %v3505_v28 = vmul.f32 0.6931472, %v7009_v54  ;;  %vm4640_vm12 = vcmp.lt.s32.totalorder %v4605_v50, %v8703_v15  ;;  %v8986_v48 = vpop.f32.mrb[109].mxu0 }
 0x1f1   : > { %v7013_v7 = vpop.eup %7012  ;;  %7032 = vpow2.f32 %v4265_v20  ;;  %v4271_v33 = vmul.f32 1.442695, %v3923_v63  ;;  %v3926_v41 = vmul.f32 %v8272_v13, %v3509_v60  ;;  %vm4656_vm13 = vmand %vm4622_vm11, %vm4640_vm12  ;;  %v4741_v18 = vpack.c.bf16 %v8962_v58, %v8952_v27  ;;  %v8993_v9 = vpop.f32.mrb[110].mxu0 }
 0x1f2   : > { %v7015_v37 = vpop.eup %7014  ;;  %7034 = vpow2.f32 %v4275_v35  ;;  %v3924_v31 = vmul.f32 %v8272_v13, %v3505_v28  ;;  %v3515_v40 = vmul.f32 0.6931472, %v7013_v7  ;;  %vm5789_vm14 = vmpackc.low %vm4656_vm13, %vm4656_vm13  ;;  %v2184_v43 = vadd.f32 %v8860_v2, %v8941_v17  ;;  %v8998_v46 = vpop.f32.mrb[111].mxu0 }
 0x1f3   : > { %v9000_v45 = vpop.eup %7016  ;;  %7036 = vpow2.f32 %v4271_v33  ;;  %v4277_v50 = vmul.f32 1.442695, %v3926_v41  ;;  %v3511_v22 = vmul.f32 0.6931472, %v7015_v37  ;;  %5790 = vmatprep.mubr.msk.bf16.mxu1 %vm5789_vm14, %v10515_v55  ;;  %6014 = vmatprep.subr.bf16.mxu1 %v4741_v18  ;;  %v4604_v27 = vadd.s32 256, %v8687_v59 }
 0x1f4   : > { %v7019_v58 = vpop.eup %7018  ;;  %v4273_v8 = vmul.f32 1.442695, %v3924_v31  ;;  %v3929_v44 = vmul.f32 %v8272_v13, %v3515_v40  ;;  %v2906_v53 = vmax.f32 %v2184_v43, 0.0  ;;  %v4733_v17 = vpack.c.bf16 %v8841_v11, %v8820_v16 }
 0x1f5   : > { %v7021_v12 = vpop.eup %7020  ;;  %7038 = vpow2.f32 %v4277_v50  ;;  %v3927_v51 = vmul.f32 %v8272_v13, %v3511_v22  ;;  %v3517_v4 = vmul.f32 0.6931472, %v7019_v58  ;;  %vm4621_vm15 = vcmp.ge.s32.totalorder %v4604_v27, %v8696_v0 }
 0x1f6   : > { %v9009_v25 = vpop.eup %7022  ;;  %7040 = vpow2.f32 %v4273_v8  ;;  %v4283_v34 = vmul.f32 1.442695, %v3929_v44  ;;  %v3162_v54 = vmax.f32 %v2906_v53, 1e-06  ;;  %vm4639_vm0 = vcmp.lt.s32.totalorder %v4604_v27, %v8703_v15 }
 0x1f7   : > { %v7025_v20 = vpop.eup %7024  ;;  %v4279_v63 = vmul.f32 1.442695, %v3927_v51  ;;  %v3930_v60 = vmul.f32 %v8272_v13, %v3517_v4  ;;  %vm4655_vm1 = vmand %vm4621_vm15, %vm4639_vm0  ;;  %v2195_v16 = vadd.f32 %v8860_v2, %v8946_v57  ;;  %v4742_v11 = vpack.c.bf16 %v8957_v47, %v8943_v21  ;;  %v9017_v35 = vpop.f32.mrb[112].mxu0 }
 0x1f8   : > { %v9019_v28 = vpop.eup %7026  ;;  %7042 = vpow2.f32 %v4283_v34  ;;  %v3513_v7 = vmul.f32 0.6931472, %v7025_v20  ;;  %vm5791_vm2 = vmpackc.low %vm4655_vm1, %vm4655_vm1  ;;  %v2187_v33 = vadd.f32 %v8860_v2, %v8950_v26  ;;  %v4734_v41 = vpack.c.bf16 %v8835_v3, %v8818_v14  ;;  %v9025_v18 = vpop.f32.mrb[113].mxu0 }
 0x1f9   : > { %v7029_v37 = vpop.eup %7028  ;;  %7044 = vpow2.f32 %v4279_v63  ;;  %v4285_v57 = vmul.f32 1.442695, %v3930_v60  ;;  %5792 = vmatmul.mubr.msk.bf16.vlgmr.msra.gmra.mrb[64].mxu1 %vm5791_vm2, %v10515_v55  ;;  %v2909_v21 = vmax.f32 %v2195_v16, 0.0  ;;  %v2208_v47 = vadd.f32 %v8860_v2, %v8960_v62  ;;  %v9030_v31 = vpop.f32.mrb[114].mxu0 }
 0x1fa   : > { %v9032_v40 = vpop.eup %7030  ;;  %v3928_v26 = vmul.f32 %v8272_v13, %v3513_v7  ;;  %v3523_v43 = vmul.f32 0.6931472, %v7029_v37  ;;  %7046 = vlog2.f32 %v3162_v54  ;;  %6015 = vmatpush3.bf16.msra.mxu1 %v4733_v17  ;;  %v2907_v14 = vmax.f32 %v2187_v33, 0.0  ;;  %v9035_v3 = vpop.f32.mrb[115].mxu0 }
 0x1fb   : > { %v9037_v50 = vpop.eup %7032  ;;  %7048 = vpow2.f32 %v4285_v57  ;;  %v3165_v22 = vmax.f32 %v2909_v21, 1e-06  ;;  %6016 = vmatprep.subr.bf16.mxu1 %v4742_v11  ;;  %v2912_v27 = vmax.f32 %v2208_v47, 0.0  ;;  %v4743_v62 = vpack.c.bf16 %v7021_v12, %v8983_v1 }
 0x1fc   : > { %v9040_v58 = vpop.eup %7034  ;;  %v4281_v8 = vmul.f32 1.442695, %v3928_v26  ;;  %v3933_v44 = vmul.f32 %v8272_v13, %v3523_v43  ;;  %v3163_v53 = vmax.f32 %v2907_v14, 1e-06  ;;  %v2200_v17 = vadd.f32 %v8860_v2, %v8965_v23 }
 0x1fd   : > { %v9045_v51 = vpop.eup %7036  ;;  %7050 = vlog2.f32 %v3165_v22  ;;  %v3168_v4 = vmax.f32 %v2912_v27, 1e-06  ;;  %v4735_v34 = vpack.c.bf16 %v8901_v56, %v8881_v32  ;;  %v2211_v54 = vadd.f32 %v8860_v2, %v8968_v6 }
 0x1fe   : > { %7052 = vpow2.f32 %v4281_v8  ;;  %v4291_v1 = vmul.f32 1.442695, %v3933_v44  ;;  %6017 = vmatpush3.bf16.msra.mxu1 %v4734_v41  ;;  %v2910_v12 = vmax.f32 %v2200_v17, 0.0  ;;  %v4744_v20 = vpack.c.bf16 %v9000_v45, %v8975_v39 }
 0x1ff   : > { %v9053_v63 = vpop.eup %7038  ;;  %7054 = vlog2.f32 %v3163_v53  ;;  %6018 = vmatprep.subr.bf16.mxu1 %v4743_v62  ;;  %v2913_v23 = vmax.f32 %v2211_v54, 0.0  ;;  %v2203_v60 = vadd.f32 %v8860_v2, %v8971_v49  ;;  %v4736_v32 = vpack.c.bf16 %v8893_v42, %v8854_v36  ;;  %v9059_v56 = vpop.f32.mrb[116].mxu0 }
 0x200   : > { %v9061_v6 = vpop.eup %7040  ;;  %7056 = vpow2.f32 %v4291_v1  ;;  %v3166_v16 = vmax.f32 %v2910_v12, 1e-06  ;;  %v2224_v39 = vadd.f32 %v8860_v2, %v8981_v10  ;;  %v4745_v45 = vpack.c.bf16 %v9037_v50, %v9019_v28  ;;  %v9067_v11 = vpop.f32.mrb[117].mxu0 }
 0x201   : > { %7058 = vlog2.f32 %v3168_v4  ;;  %v3169_v7 = vmax.f32 %v2913_v23, 1e-06  ;;  %v2911_v49 = vmax.f32 %v2203_v60, 0.0  ;;  %v2216_v36 = vadd.f32 %v8860_v2, %v8986_v48  ;;  %v9071_v42 = vpop.f32.mrb[118].mxu0 }
 0x202   : > { %v9073_v33 = vpop.eup %7042  ;;  %7060 = vlog2.f32 %v3166_v16  ;;  %6019 = vmatpush3.bf16.msra.mxu1 %v4735_v34  ;;  %v2916_v41 = vmax.f32 %v2224_v39, 0.0  ;;  %v4737_v10 = vpack.c.bf16 %v8919_v38, %v8914_v19  ;;  %v2227_v28 = vadd.f32 %v8860_v2, %v8993_v9  ;;  %v9079_v37 = vpop.f32.mrb[119].mxu0 }
 0x203   : > { %v9081_v57 = vpop.eup %7044  ;;  %7062 = vlog2.f32 %v3169_v7  ;;  %6020 = vmatprep.subr.bf16.mxu1 %v4744_v20  ;;  %v3167_v48 = vmax.f32 %v2911_v49, 1e-06  ;;  %v2914_v21 = vmax.f32 %v2216_v36, 0.0  ;;  %v4746_v47 = vpack.c.bf16 %v9032_v40, %v9009_v25 }
 0x204   : > { %v7047_v26 = vpop.eup %7046  ;;  %v3172_v43 = vmax.f32 %v2916_v41, 1e-06  ;;  %v2917_v14 = vmax.f32 %v2227_v28, 0.0  ;;  %v2219_v19 = vadd.f32 %v8860_v2, %v8998_v46  ;;  %v4738_v38 = vpack.c.bf16 %v8917_v24, %v8908_v52 }
 0x205   : > { %v9089_v9 = vpop.eup %7048  ;;  %v3519_v50 = vmul.f32 0.6931472, %v7047_v26  ;;  %7064 = vlog2.f32 %v3167_v48  ;;  %v3170_v22 = vmax.f32 %v2914_v21, 1e-06  ;;  %v2240_v27 = vadd.f32 %v8860_v2, %v9017_v35 }
 0x206   : > { %6021 = vmatpush3.bf16.msra.mxu1 %v4736_v32  ;;  %7066 = vlog2.f32 %v3172_v43  ;;  %v3173_v25 = vmax.f32 %v2917_v14, 1e-06  ;;  %v2915_v40 = vmax.f32 %v2219_v19, 0.0  ;;  %v4747_v62 = vpack.c.bf16 %v9061_v6, %v9045_v51  ;;  %v9117_v6 = vpop.f32.mrb[0].mxu1 }
 0x207   : > { %v7051_v8 = vpop.eup %7050  ;;  %v3931_v46 = vmul.f32 %v8272_v13, %v3519_v50  ;;  %6022 = vmatprep.subr.bf16.mxu1 %v4745_v45  ;;  %7068 = vlog2.f32 %v3170_v22  ;;  %v2920_v52 = vmax.f32 %v2240_v27, 0.0  ;;  %v2232_v24 = vadd.f32 %v8860_v2, %v9025_v18  ;;  %v9098_v44 = vpop.f32.mrb[120].mxu0 }
 0x208   : > { %v9100_v53 = vpop.eup %7052  ;;  %v3525_v35 = vmul.f32 0.6931472, %v7051_v8  ;;  %7070 = vlog2.f32 %v3173_v25  ;;  %v3171_v17 = vmax.f32 %v2915_v40, 1e-06  ;;  %v4739_v4 = vpack.c.bf16 %v8939_v30, %v8930_v61  ;;  %v9104_v51 = vpop.f32.mrb[121].mxu0 }
 0x209   : > { %v7055_v34 = vpop.eup %7054  ;;  %v4287_v54 = vmul.f32 1.442695, %v3931_v46  ;;  %v3176_v1 = vmax.f32 %v2920_v52, 1e-06  ;;  %v2918_v12 = vmax.f32 %v2232_v24, 0.0  ;;  %v2243_v20 = vadd.f32 %v8860_v2, %v9030_v31  ;;  %v9108_v18 = vpop.f32.mrb[122].mxu0 }
 0x20a   : > { %v9110_v23 = vpop.eup %7056  ;;  %v3934_v60 = vmul.f32 %v8272_v13, %v3525_v35  ;;  %v3521_v32 = vmul.f32 0.6931472, %v7055_v34  ;;  %6023 = vmatpush3.bf16.msra.mxu1 %v4737_v10  ;;  %7072 = vlog2.f32 %v3171_v17  ;;  %v4748_v61 = vpack.c.bf16 %v9053_v63, %v9040_v58  ;;  %v9115_v30 = vpop.f32.mrb[123].mxu0 }
 0x20b   : > { %v7059_v16 = vpop.eup %7058  ;;  %7074 = vpow2.f32 %v4287_v54  ;;  %6024 = vmatprep.subr.bf16.mxu1 %v4746_v47  ;;  %v3174_v31 = vmax.f32 %v2918_v12, 1e-06  ;;  %v2921_v39 = vmax.f32 %v2243_v20, 0.0  ;;  %v2235_v45 = vadd.f32 %v8860_v2, %v9035_v3  ;;  %v9122_v10 = vpop.f32.mrb[1].mxu1 }
 0x20c   : > { %v7061_v7 = vpop.eup %7060  ;;  %v4293_v49 = vmul.f32 1.442695, %v3934_v60  ;;  %v3932_v36 = vmul.f32 %v8272_v13, %v3521_v32  ;;  %v3531_v41 = vmul.f32 0.6931472, %v7059_v16  ;;  %7076 = vlog2.f32 %v3176_v1  ;;  %v9141_v20 = vpop.f32.mrb[2].mxu1 }
 0x20d   : > { %v7063_v58 = vpop.eup %7062  ;;  %v3527_v63 = vmul.f32 0.6931472, %v7061_v7  ;;  %7078 = vlog2.f32 %v3174_v31  ;;  %v3177_v28 = vmax.f32 %v2921_v39, 1e-06  ;;  %v2919_v48 = vmax.f32 %v2235_v45, 0.0 }
 0x20e   : > { %7080 = vpow2.f32 %v4293_v49  ;;  %v4289_v21 = vmul.f32 1.442695, %v3932_v36  ;;  %v3937_v47 = vmul.f32 %v8272_v13, %v3531_v41  ;;  %v3533_v26 = vmul.f32 0.6931472, %v7063_v58  ;;  %6025 = vmatpush3.bf16.msra.mxu1 %v4738_v38 }
 0x20f   : > { %v7065_v3 = vpop.eup %7064  ;;  %v3935_v43 = vmul.f32 %v8272_v13, %v3527_v63  ;;  %6026 = vmatprep.subr.bf16.mxu1 %v4747_v62  ;;  %7082 = vlog2.f32 %v3177_v28  ;;  %v3175_v14 = vmax.f32 %v2919_v48, 1e-06  ;;  %v4740_v19 = vpack.c.bf16 %v8934_v29, %v8924_v5  ;;  %v9128_v50 = vpop.f32.mrb[124].mxu0 }
 0x210   : > { %v7067_v22 = vpop.eup %7066  ;;  %7084 = vpow2.f32 %v4289_v21  ;;  %v4299_v27 = vmul.f32 1.442695, %v3937_v47  ;;  %v3938_v25 = vmul.f32 %v8272_v13, %v3533_v26  ;;  %v3529_v40 = vmul.f32 0.6931472, %v7065_v3  ;;  %v9131_v8 = vpop.f32.mrb[125].mxu0 }
 0x211   : > { %v7069_v38 = vpop.eup %7068  ;;  %v4295_v46 = vmul.f32 1.442695, %v3935_v43  ;;  %v3539_v52 = vmul.f32 0.6931472, %v7067_v22  ;;  %7086 = vlog2.f32 %v3175_v14  ;;  %v2256_v62 = vadd.f32 %v8860_v2, %v9059_v56  ;;  %v9135_v24 = vpop.f32.mrb[126].mxu0 }
 0x212   : > { %v7071_v5 = vpop.eup %7070  ;;  %7088 = vpow2.f32 %v4299_v27  ;;  %v4301_v29 = vmul.f32 1.442695, %v3938_v25  ;;  %v3936_v35 = vmul.f32 %v8272_v13, %v3529_v40  ;;  %v3535_v17 = vmul.f32 0.6931472, %v7069_v38  ;;  %6027 = vmatpush3.bf16.msra.mxu1 %v4739_v4  ;;  %v9138_v34 = vpop.f32.mrb[127].mxu0 }
 0x213   : > { %7090 = vpow2.f32 %v4295_v46  ;;  %v3941_v54 = vmul.f32 %v8272_v13, %v3539_v52  ;;  %v3541_v1 = vmul.f32 0.6931472, %v7071_v5  ;;  %6028 = vmatprep.subr.bf16.mxu1 %v4748_v61  ;;  %v2924_v12 = vmax.f32 %v2256_v62, 0.0  ;;  %v9168_v62 = vpop.f32.mrb[3].mxu1 }
 0x214   : > { %v7073_v56 = vpop.eup %7072  ;;  %7092 = vpow2.f32 %v4301_v29  ;;  %v4297_v60 = vmul.f32 1.442695, %v3936_v35  ;;  %v3939_v32 = vmul.f32 %v8272_v13, %v3535_v17  ;;  %v2248_v16 = vadd.f32 %v8860_v2, %v9067_v11 }
 0x215   : > { %v9146_v31 = vpop.eup %7074  ;;  %v4307_v4 = vmul.f32 1.442695, %v3941_v54  ;;  %v3942_v39 = vmul.f32 %v8272_v13, %v3541_v1  ;;  %v3537_v45 = vmul.f32 0.6931472, %v7073_v56  ;;  %v3180_v7 = vmax.f32 %v2924_v12, 1e-06 }
 0x216   : > { %v7077_v49 = vpop.eup %7076  ;;  %7094 = vpow2.f32 %v4297_v60  ;;  %v4303_v61 = vmul.f32 1.442695, %v3939_v32  ;;  %6029 = vmatpush3.bf16.msra.mxu1 %v4740_v19  ;;  %v2922_v36 = vmax.f32 %v2248_v16, 0.0  ;;  %v2259_v41 = vadd.f32 %v8860_v2, %v9071_v42 }
 0x217   : > { %v7079_v58 = vpop.eup %7078  ;;  %7096 = vpow2.f32 %v4307_v4  ;;  %v4309_v63 = vmul.f32 1.442695, %v3942_v39  ;;  %v3940_v11 = vmul.f32 %v8272_v13, %v3537_v45  ;;  %v3547_v28 = vmul.f32 0.6931472, %v7077_v49  ;;  %v9152_v48 = vpop.f32.mrb[128].mxu0 }
 0x218   : > { %v9154_v21 = vpop.eup %7080  ;;  %7098 = vpow2.f32 %v4303_v61  ;;  %v3543_v47 = vmul.f32 0.6931472, %v7079_v58  ;;  %v3178_v26 = vmax.f32 %v2922_v36, 1e-06  ;;  %v2925_v3 = vmax.f32 %v2259_v41, 0.0  ;;  %v9156_v43 = vpop.f32.mrb[129].mxu0 }
 0x219   : > { %v7083_v14 = vpop.eup %7082  ;;  %7100 = vpow2.f32 %v4309_v63  ;;  %v4305_v19 = vmul.f32 1.442695, %v3940_v11  ;;  %v3945_v42 = vmul.f32 %v8272_v13, %v3547_v28  ;;  %v2251_v22 = vadd.f32 %v8860_v2, %v9079_v37  ;;  %v9161_v27 = vpop.f32.mrb[130].mxu0  ;;  %v9193_v63 = vld [vmem:[%s10508_s3] ss:$0 sm:$0xff] }
 0x21a   : > { %v9163_v25 = vpop.eup %7084  ;;  %v3943_v40 = vmul.f32 %v8272_v13, %v3543_v47  ;;  %v3549_v38 = vmul.f32 0.6931472, %v7083_v14  ;;  %7102 = vlog2.f32 %v3180_v7  ;;  %v3181_v46 = vmax.f32 %v2925_v3, 1e-06  ;;  %v9166_v52 = vpop.f32.mrb[131].mxu0 }
 0x21b   : > { %v7087_v5 = vpop.eup %7086  ;;  %7104 = vpow2.f32 %v4305_v19  ;;  %v4315_v29 = vmul.f32 1.442695, %v3945_v42  ;;  %v2923_v35 = vmax.f32 %v2251_v22, 0.0  ;;  %v2272_v37 = vadd.f32 %v8860_v2, %v9098_v44  ;;  %v9199_v28 = vpop.f32.mrb[4].mxu1 }
 0x21c   : > { %v9172_v17 = vpop.eup %7088  ;;  %v4311_v54 = vmul.f32 1.442695, %v3943_v40  ;;  %v3946_v1 = vmul.f32 %v8272_v13, %v3549_v38  ;;  %v3545_v12 = vmul.f32 0.6931472, %v7087_v5  ;;  %7106 = vlog2.f32 %v3178_v26  ;;  %v9207_v14 = vpop.f32.mrb[5].mxu1 }
 0x21d   : > { %v9175_v56 = vpop.eup %7090  ;;  %7108 = vpow2.f32 %v4315_v29  ;;  %v3179_v60 = vmax.f32 %v2923_v35, 1e-06  ;;  %v2928_v32 = vmax.f32 %v2272_v37, 0.0  ;;  %v2264_v16 = vadd.f32 %v8860_v2, %v9104_v51  ;;  %v9215_v38 = vpop.f32.mrb[6].mxu1 }
 0x21e   : > { %v9179_v4 = vpop.eup %7092  ;;  %7110 = vpow2.f32 %v4311_v54  ;;  %v4317_v39 = vmul.f32 1.442695, %v3946_v1  ;;  %v3944_v44 = vmul.f32 %v8272_v13, %v3545_v12  ;;  %v2275_v45 = vadd.f32 %v8860_v2, %v9108_v18  ;;  %10542 = vst [vmem:[#allocation11_spill] sm:$0xff] %v9215_v38 }
 0x21f   : > { %7112 = vlog2.f32 %v3181_v46  ;;  %v3184_v7 = vmax.f32 %v2928_v32, 1e-06  ;;  %v2926_v49 = vmax.f32 %v2264_v16, 0.0  ;;  %v2267_v61 = vadd.f32 %v8860_v2, %v9115_v30  ;;  %v9186_v36 = vpop.f32.mrb[132].mxu0  ;;  %v9225_v16 = vpop.f32.mrb[7].mxu1 }
 0x220   : > { %v9188_v41 = vpop.eup %7094  ;;  %7114 = vpow2.f32 %v4317_v39  ;;  %v4313_v51 = vmul.f32 1.442695, %v3944_v44  ;;  %v2929_v58 = vmax.f32 %v2275_v45, 0.0  ;;  %v2288_v18 = vadd.f32 %v9193_v63, %v9128_v50  ;;  %v9197_v11 = vpop.f32.mrb[133].mxu0  ;;  %10543 = vst [vmem:[#allocation12_spill] sm:$0xff] %v9225_v16 }
 0x221   : > { %v9201_v2 = vpop.eup %7096  ;;  %7116 = vlog2.f32 %v3179_v60  ;;  %v3182_v30 = vmax.f32 %v2926_v49, 1e-06  ;;  %v2927_v47 = vmax.f32 %v2267_v61, 0.0  ;;  %v2280_v26 = vadd.f32 %v9193_v63, %v9131_v8  ;;  %v9205_v3 = vpop.f32.mrb[134].mxu0 }
 0x222   : > { %v9209_v19 = vpop.eup %7098  ;;  %7118 = vpow2.f32 %v4313_v51  ;;  %v3185_v50 = vmax.f32 %v2929_v58, 1e-06  ;;  %v2932_v42 = vmax.f32 %v2288_v18, 0.0  ;;  %v2291_v22 = vadd.f32 %v9193_v63, %v9135_v24  ;;  %v9213_v40 = vpop.f32.mrb[135].mxu0 }
 0x223   : > { %v9217_v46 = vpop.eup %7100  ;;  %7120 = vlog2.f32 %v3184_v7  ;;  %v3183_v8 = vmax.f32 %v2927_v47, 1e-06  ;;  %v2930_v5 = vmax.f32 %v2280_v26, 0.0  ;;  %v2283_v29 = vadd.f32 %v9193_v63, %v9138_v34 }
 0x224   : > { %v7103_v35 = vpop.eup %7102  ;;  %7122 = vlog2.f32 %v3182_v30  ;;  %v3188_v37 = vmax.f32 %v2932_v42, 1e-06  ;;  %v2933_v54 = vmax.f32 %v2291_v22, 0.0  ;;  %v2304_v1 = vadd.f32 %v9193_v63, %v9152_v48 }
 0x225   : > { %v9223_v24 = vpop.eup %7104  ;;  %v3555_v12 = vmul.f32 0.6931472, %v7103_v35  ;;  %7124 = vlog2.f32 %v3185_v50  ;;  %v3186_v60 = vmax.f32 %v2930_v5, 1e-06  ;;  %v2931_v32 = vmax.f32 %v2283_v29, 0.0 }
 0x226   : > { %v7107_v39 = vpop.eup %7106  ;;  %7126 = vlog2.f32 %v3183_v8  ;;  %v3189_v44 = vmax.f32 %v2933_v54, 1e-06  ;;  %v2936_v45 = vmax.f32 %v2304_v1, 0.0  ;;  %v2296_v34 = vadd.f32 %v9193_v63, %v9156_v43 }
 0x227   : > { %v9229_v7 = vpop.eup %7108  ;;  %v3949_v49 = vmul.f32 %v8272_v13, %v3555_v12  ;;  %v3551_v48 = vmul.f32 0.6931472, %v7107_v39  ;;  %7128 = vlog2.f32 %v3188_v37  ;;  %v3187_v61 = vmax.f32 %v2931_v32, 1e-06  ;;  %v9232_v51 = vpop.f32.mrb[136].mxu0 }
 0x228   : > { %v9234_v58 = vpop.eup %7110  ;;  %7130 = vlog2.f32 %v3186_v60  ;;  %v3192_v18 = vmax.f32 %v2936_v45, 1e-06  ;;  %v2934_v30 = vmax.f32 %v2296_v34, 0.0  ;;  %v2307_v47 = vadd.f32 %v9193_v63, %v9161_v27  ;;  %v9238_v26 = vpop.f32.mrb[137].mxu0 }
 0x229   : > { %v7113_v43 = vpop.eup %7112  ;;  %v4323_v50 = vmul.f32 1.442695, %v3949_v49  ;;  %v3947_v42 = vmul.f32 %v8272_v13, %v3551_v48  ;;  %7132 = vlog2.f32 %v3189_v44  ;;  %v2299_v22 = vadd.f32 %v9193_v63, %v9166_v52  ;;  %v9243_v8 = vpop.f32.mrb[138].mxu0 }
 0x22a   : > { %v9245_v5 = vpop.eup %7114  ;;  %v3557_v29 = vmul.f32 0.6931472, %v7113_v43  ;;  %7134 = vlog2.f32 %v3187_v61  ;;  %v3190_v35 = vmax.f32 %v2934_v30, 1e-06  ;;  %v2937_v37 = vmax.f32 %v2307_v47, 0.0  ;;  %v9247_v54 = vpop.f32.mrb[139].mxu0 }
 0x22b   : > { %v7117_v27 = vpop.eup %7116  ;;  %7136 = vpow2.f32 %v4323_v50  ;;  %v4319_v1 = vmul.f32 1.442695, %v3947_v42  ;;  %v2935_v12 = vmax.f32 %v2299_v22, 0.0  ;;  %v2320_v60 = vadd.f32 %v9193_v63, %v9186_v36  ;;  %v9251_v32 = vpop.f32.mrb[8].mxu1 }
 0x22c   : > { %10544 = vst [vmem:[#allocation13_spill] sm:$0xff] %v9251_v32  ;;  %v9253_v52 = vpop.eup %7118  ;;  %v3950_v39 = vmul.f32 %v8272_v13, %v3557_v29  ;;  %v3553_v44 = vmul.f32 0.6931472, %v7117_v27  ;;  %7138 = vlog2.f32 %v3192_v18  ;;  %v3193_v45 = vmax.f32 %v2937_v37, 1e-06  ;;  %v9256_v34 = vpop.f32.mrb[9].mxu1 }
 0x22d   : > { %10545 = vst [vmem:[#allocation14_spill] sm:$0xff] %v9256_v34  ;;  %v7121_v49 = vpop.eup %7120  ;;  %7140 = vpow2.f32 %v4319_v1  ;;  %v3191_v48 = vmax.f32 %v2935_v12, 1e-06  ;;  %v2940_v61 = vmax.f32 %v2320_v60, 0.0  ;;  %v4607_v30 = vadd.s32 640, %v8687_v59  ;;  %v9281_v32 = vpop.f32.mrb[10].mxu1 }
 0x22e   : > { %v7123_v47 = vpop.eup %7122  ;;  %v4325_v43 = vmul.f32 1.442695, %v3950_v39  ;;  %v3948_v36 = vmul.f32 %v8272_v13, %v3553_v44  ;;  %v3563_v50 = vmul.f32 0.6931472, %v7121_v49  ;;  %7142 = vlog2.f32 %v3190_v35  ;;  %10547 = vst [vmem:[#allocation15_spill] sm:$0xff] %v9281_v32 }
 0x22f   : > { %v7125_v42 = vpop.eup %7124  ;;  %v3559_v22 = vmul.f32 0.6931472, %v7123_v47  ;;  %7144 = vlog2.f32 %v3193_v45  ;;  %v3196_v29 = vmax.f32 %v2940_v61, 1e-06  ;;  %vm4624_vm3 = vcmp.ge.s32.totalorder %v4607_v30, %v8696_v0  ;;  %v9261_v18 = vpop.f32.mrb[140].mxu0 }
 0x230   : > { %v7127_v37 = vpop.eup %7126  ;;  %7146 = vpow2.f32 %v4325_v43  ;;  %v4321_v27 = vmul.f32 1.442695, %v3948_v36  ;;  %v3953_v1 = vmul.f32 %v8272_v13, %v3563_v50  ;;  %v3565_v12 = vmul.f32 0.6931472, %v7125_v42  ;;  %v9264_v60 = vpop.f32.mrb[141].mxu0 }
 0x231   : > { %v7129_v39 = vpop.eup %7128  ;;  %v3951_v44 = vmul.f32 %v8272_v13, %v3559_v22  ;;  %v3561_v35 = vmul.f32 0.6931472, %v7127_v37  ;;  %7148 = vlog2.f32 %v3191_v48  ;;  %vm4642_vm4 = vcmp.lt.s32.totalorder %v4607_v30, %v8703_v15  ;;  %v9268_v45 = vpop.f32.mrb[142].mxu0 }
 0x232   : > { %v7131_v49 = vpop.eup %7130  ;;  %7150 = vpow2.f32 %v4321_v27  ;;  %v4331_v61 = vmul.f32 1.442695, %v3953_v1  ;;  %v3954_v47 = vmul.f32 %v8272_v13, %v3565_v12  ;;  %v3571_v43 = vmul.f32 0.6931472, %v7129_v39  ;;  %vm4658_vm5 = vmand %vm4624_vm3, %vm4642_vm4  ;;  %v9273_v36 = vpop.f32.mrb[143].mxu0 }
 0x233   : > { %v7133_v50 = vpop.eup %7132  ;;  %v4327_v42 = vmul.f32 1.442695, %v3951_v44  ;;  %v3952_v22 = vmul.f32 %v8272_v13, %v3561_v35  ;;  %v3567_v48 = vmul.f32 0.6931472, %v7131_v49  ;;  %7152 = vlog2.f32 %v3196_v29  ;;  %vm5793_vm6 = vmpackc.low %vm4658_vm5, %vm4658_vm5 }
 0x234   : > { %v7135_v37 = vpop.eup %7134  ;;  %7154 = vpow2.f32 %v4331_v61  ;;  %v4333_v55 = vmul.f32 1.442695, %v3954_v47  ;;  %v3957_v27 = vmul.f32 %v8272_v13, %v3571_v43  ;;  %v3573_v1 = vmul.f32 0.6931472, %v7133_v50 }
 0x235   : > { %v10546_v12 = vmov 0.00390625|0.00390625   ;;  %v9278_v39 = vpop.eup %7136  ;;  %7156 = vpow2.f32 %v4327_v42  ;;  %v4329_v30 = vmul.f32 1.442695, %v3952_v22  ;;  %v3955_v34 = vmul.f32 %v8272_v13, %v3567_v48 }
 0x236   : > { %5794 = vmatprep.mubr.msk.bf16.mxu1 %vm5793_vm6, %v10546_v12  ;;  %v3569_v44 = vmul.f32 0.6931472, %v7135_v37  ;;  %v7139_v35 = vpop.eup %7138  ;;  %7158 = vpow2.f32 %v4333_v55  ;;  %v4339_v29 = vmul.f32 1.442695, %v3957_v27  ;;  %v3958_v49 = vmul.f32 %v8272_v13, %v3573_v1 }
 0x237   : > { %v4757_v61 = vpack.c.bf16 %v9253_v52, %v9234_v58  ;;  %v9286_v47 = vpop.eup %7140  ;;  %7160 = vpow2.f32 %v4329_v30  ;;  %v4335_v43 = vmul.f32 1.442695, %v3955_v34  ;;  %v3579_v42 = vmul.f32 0.6931472, %v7139_v35  ;;  %v9289_v22 = vpop.f32.mrb[144].mxu0 }
 0x238   : > { %v3956_v50 = vmul.f32 %v8272_v13, %v3569_v44  ;;  %v7143_v48 = vpop.eup %7142  ;;  %7162 = vpow2.f32 %v4339_v29  ;;  %v4341_v37 = vmul.f32 1.442695, %v3958_v49  ;;  %v2312_v55 = vadd.f32 %v9193_v63, %v9197_v11  ;;  %v9294_v1 = vpop.f32.mrb[145].mxu0 }
 0x239   : > { %6036 = vmatprep.subr.bf16.mxu1 %v4757_v61  ;;  %v4606_v27 = vadd.s32 512, %v8687_v59  ;;  %v7145_v58 = vpop.eup %7144  ;;  %7164 = vpow2.f32 %v4335_v43  ;;  %v3961_v34 = vmul.f32 %v8272_v13, %v3579_v42  ;;  %v3575_v30 = vmul.f32 0.6931472, %v7143_v48  ;;  %v9297_v44 = vpop.f32.mrb[146].mxu0 }
 0x23a   : > { %v4337_v52 = vmul.f32 1.442695, %v3956_v50  ;;  %v9299_v35 = vpop.eup %7146  ;;  %7166 = vpow2.f32 %v4341_v37  ;;  %v3581_v29 = vmul.f32 0.6931472, %v7145_v58  ;;  %v2938_v49 = vmax.f32 %v2312_v55, 0.0  ;;  %v9302_v11 = vpop.f32.mrb[147].mxu0 }
 0x23b   : > { %vm4623_vm7 = vcmp.ge.s32.totalorder %v4606_v27, %v8696_v0  ;;  %v7149_v61 = vpop.eup %7148  ;;  %v4347_v32 = vmul.f32 1.442695, %v3961_v34  ;;  %v3959_v43 = vmul.f32 %v8272_v13, %v3575_v30  ;;  %vm4641_vm8 = vcmp.lt.s32.totalorder %v4606_v27, %v8703_v15  ;;  %v9309_v55 = vpop.f32.mrb[11].mxu1 }
 0x23c   : > { %7168 = vpow2.f32 %v4337_v52  ;;  %v7151_v50 = vpop.eup %7150  ;;  %v3962_v42 = vmul.f32 %v8272_v13, %v3581_v29  ;;  %v3577_v48 = vmul.f32 0.6931472, %v7149_v61  ;;  %v3194_v16 = vmax.f32 %v2938_v49, 1e-06  ;;  %vm4657_vm9 = vmand %vm4623_vm7, %vm4641_vm8 }
 0x23d   : > { %v4749_v37 = vpack.c.bf16 %v9100_v53, %v9081_v57  ;;  %v7153_v58 = vpop.eup %7152  ;;  %7170 = vpow2.f32 %v4347_v32  ;;  %v4343_v38 = vmul.f32 1.442695, %v3959_v43  ;;  %vm5795_vm10 = vmpackc.low %vm4657_vm9, %vm4657_vm9  ;;  %v2323_v52 = vadd.f32 %v9193_v63, %v9205_v3 }
 0x23e   : > { %v4758_v27 = vpack.c.bf16 %v9245_v5, %v9229_v7  ;;  %v9315_v34 = vpop.eup %7154  ;;  %v4349_v30 = vmul.f32 1.442695, %v3962_v42  ;;  %v3960_v29 = vmul.f32 %v8272_v13, %v3577_v48  ;;  %v3587_v49 = vmul.f32 0.6931472, %v7153_v58  ;;  %5796 = vmatmul.mubr.msk.bf16.vlgmr.msra.gmra.mrb[68].mxu1 %vm5795_vm10, %v10546_v12 }
 0x23f   : > { %7172 = vlog2.f32 %v3194_v16  ;;  %v9319_v57 = vpop.eup %7156  ;;  %6037 = vmatpush3.bf16.msra.mxu1 %v4749_v37  ;;  %v2941_v53 = vmax.f32 %v2323_v52, 0.0  ;;  %v2315_v3 = vadd.f32 %v9193_v63, %v9213_v40  ;;  %v4750_v7 = vpack.c.bf16 %v9089_v9, %v9073_v33  ;;  %v9325_v5 = vpop.f32.mrb[148].mxu0 }
 0x240   : > { %7174 = vpow2.f32 %v4343_v38  ;;  %v9327_v32 = vpop.eup %7158  ;;  %v4345_v61 = vmul.f32 1.442695, %v3960_v29  ;;  %v3965_v16 = vmul.f32 %v8272_v13, %v3587_v49  ;;  %6038 = vmatprep.subr.bf16.mxu1 %v4758_v27  ;;  %v2336_v38 = vadd.f32 %v9193_v63, %v9232_v51  ;;  %v9332_v43 = vpop.f32.mrb[149].mxu0 }
 0x241   : > { %7176 = vpow2.f32 %v4349_v30  ;;  %v9334_v42 = vpop.eup %7160  ;;  %v3197_v40 = vmax.f32 %v2941_v53, 1e-06  ;;  %v2939_v48 = vmax.f32 %v2315_v3, 0.0  ;;  %v4759_v33 = vpack.c.bf16 %v7151_v50, %v9286_v47  ;;  %v9339_v37 = vpop.f32.mrb[150].mxu0 }
 0x242   : > { %v2328_v9 = vadd.f32 %v9193_v63, %v9238_v26  ;;  %v9341_v58 = vpop.eup %7162  ;;  %7178 = vpow2.f32 %v4345_v61  ;;  %v4355_v52 = vmul.f32 1.442695, %v3965_v16  ;;  %v2944_v27 = vmax.f32 %v2336_v38, 0.0  ;;  %v9345_v30 = vpop.f32.mrb[151].mxu0 }
 0x243   : > { %v4751_v51 = vpack.c.bf16 %v9163_v25, %v9146_v31  ;;  %v9347_v29 = vpop.f32.mrb[12].mxu1  ;;  %v9349_v49 = vpop.eup %7164  ;;  %7180 = vlog2.f32 %v3197_v40  ;;  %v3195_v47 = vmax.f32 %v2939_v48, 1e-06  ;;  %6039 = vmatpush3.bf16.msra.mxu1 %v4750_v7  ;;  %v2339_v50 = vadd.f32 %v9193_v63, %v9243_v8 }
 0x244   : > { %v2942_v26 = vmax.f32 %v2328_v9, 0.0  ;;  %v9353_v53 = vpop.f32.mrb[13].mxu1  ;;  %v9355_v3 = vpop.eup %7166  ;;  %7182 = vpow2.f32 %v4355_v52  ;;  %v3200_v61 = vmax.f32 %v2944_v27, 1e-06  ;;  %6040 = vmatprep.subr.bf16.mxu1 %v4759_v33  ;;  %v4760_v31 = vpack.c.bf16 %v9299_v35, %v9278_v39 }
 0x245   : > { %v2331_v25 = vadd.f32 %v9193_v63, %v9247_v54  ;;  %v9361_v16 = vpop.f32.mrb[14].mxu1  ;;  %7184 = vlog2.f32 %v3195_v47  ;;  %v2945_v8 = vmax.f32 %v2339_v50, 0.0  ;;  %v4752_v40 = vpack.c.bf16 %v9154_v21, %v9110_v23 }
 0x246   : > { %v9363_v7 = vpop.eup %7168  ;;  %v3198_v38 = vmax.f32 %v2942_v26, 1e-06  ;;  %7186 = vlog2.f32 %v3200_v61  ;;  %v2352_v33 = vadd.f32 %v9193_v63, %v9261_v18  ;;  %v4761_v39 = vpack.c.bf16 %v9334_v42, %v9319_v57  ;;  %v9379_v21 = vpop.f32.mrb[15].mxu1 }
 0x247   : > { %v2943_v48 = vmax.f32 %v2331_v25, 0.0  ;;  %v9371_v35 = vpop.eup %7170  ;;  %6041 = vmatpush3.bf16.msra.mxu1 %v4751_v51  ;;  %v3201_v54 = vmax.f32 %v2945_v8, 1e-06  ;;  %v2344_v9 = vadd.f32 %v9193_v63, %v9264_v60  ;;  %v4753_v52 = vpack.c.bf16 %v9188_v41, %v9175_v56  ;;  %v9377_v23 = vpop.f32.mrb[152].mxu0 }
 0x248   : > { %7188 = vlog2.f32 %v3198_v38  ;;  %6042 = vmatprep.subr.bf16.mxu1 %v4760_v31  ;;  %v2948_v47 = vmax.f32 %v2352_v33, 0.0  ;;  %v2355_v57 = vadd.f32 %v9193_v63, %v9268_v45  ;;  %v4762_v42 = vpack.c.bf16 %v9327_v32, %v9315_v34  ;;  %v9385_v51 = vpop.f32.mrb[153].mxu0 }
 0x249   : > { %v7173_v27 = vpop.eup %7172  ;;  %v3199_v18 = vmax.f32 %v2943_v48, 1e-06  ;;  %7190 = vlog2.f32 %v3201_v54  ;;  %v2946_v56 = vmax.f32 %v2344_v9, 0.0  ;;  %v2347_v41 = vadd.f32 %v9193_v63, %v9273_v36  ;;  %v9391_v50 = vpop.f32.mrb[154].mxu0 }
 0x24a   : > { %v9387_v60 = vpop.eup %7174  ;;  %v3583_v26 = vmul.f32 0.6931472, %v7173_v27  ;;  %v3204_v31 = vmax.f32 %v2948_v47, 1e-06  ;;  %v2949_v45 = vmax.f32 %v2355_v57, 0.0  ;;  %v4754_v34 = vpack.c.bf16 %v9179_v4, %v9172_v17  ;;  %v9397_v32 = vpop.f32.mrb[155].mxu0 }
 0x24b   : > { %v9393_v61 = vpop.eup %7176  ;;  %7192 = vlog2.f32 %v3199_v18  ;;  %6043 = vmatpush3.bf16.msra.mxu1 %v4752_v40  ;;  %v3202_v38 = vmax.f32 %v2946_v56, 1e-06  ;;  %v2947_v8 = vmax.f32 %v2347_v41, 0.0  ;;  %v2368_v36 = vadd.f32 %v9193_v63, %v9289_v22  ;;  %v9412_v57 = vpop.f32.mrb[16].mxu1 }
 0x24c   : > { %v3963_v25 = vmul.f32 %v8272_v13, %v3583_v26  ;;  %v9402_v48 = vpop.eup %7178  ;;  %7194 = vlog2.f32 %v3204_v31  ;;  %6044 = vmatprep.subr.bf16.mxu1 %v4761_v39  ;;  %v3205_v33 = vmax.f32 %v2949_v45, 1e-06  ;;  %v4763_v54 = vpack.c.bf16 %v9363_v7, %v9349_v49  ;;  %10548 = vst [vmem:[#allocation16_spill] sm:$0xff] %v9412_v57 }
 0x24d   : > { %v2360_v17 = vadd.f32 %v9193_v63, %v9294_v1  ;;  %v7181_v4 = vpop.eup %7180  ;;  %7196 = vlog2.f32 %v3202_v38  ;;  %v3203_v40 = vmax.f32 %v2947_v8, 1e-06  ;;  %v2952_v27 = vmax.f32 %v2368_v36, 0.0 }
 0x24e   : > { %v4351_v9 = vmul.f32 1.442695, %v3963_v25  ;;  %v9408_v18 = vpop.eup %7182  ;;  %v3589_v47 = vmul.f32 0.6931472, %v7181_v4  ;;  %7198 = vlog2.f32 %v3205_v33  ;;  %v4755_v39 = vpack.c.bf16 %v9223_v24, %v9209_v19 }
 0x24f   : > { %v2950_v22 = vmax.f32 %v2360_v17, 0.0  ;;  %v7185_v26 = vpop.eup %7184  ;;  %6045 = vmatpush3.bf16.msra.mxu1 %v4753_v52  ;;  %v3208_v49 = vmax.f32 %v2952_v27, 1e-06  ;;  %v2371_v1 = vadd.f32 %v9193_v63, %v9297_v44  ;;  %v4764_v7 = vpack.c.bf16 %v9355_v3, %v9341_v58  ;;  %v9418_v56 = vpop.f32.mrb[156].mxu0 }
 0x250   : > { %7200 = vpow2.f32 %v4351_v9  ;;  %v7187_v41 = vpop.eup %7186  ;;  %v3966_v31 = vmul.f32 %v8272_v13, %v3589_v47  ;;  %v3585_v45 = vmul.f32 0.6931472, %v7185_v26  ;;  %6046 = vmatprep.subr.bf16.mxu1 %v4762_v42  ;;  %v9421_v24 = vpop.f32.mrb[157].mxu0  ;;  %v2363_v44 = vadd.f32 %v9193_v63, %v9302_v11 }
 0x251   : > { %7202 = vlog2.f32 %v3203_v40  ;;  %v3206_v19 = vmax.f32 %v2950_v22, 1e-06  ;;  %v3595_v52 = vmul.f32 0.6931472, %v7187_v41  ;;  %v2953_v38 = vmax.f32 %v2371_v1, 0.0  ;;  %v9425_v8 = vpop.f32.mrb[158].mxu0 }
 0x252   : > { %v7189_v25 = vpop.eup %7188  ;;  %7204 = vlog2.f32 %v3208_v49  ;;  %v4357_v58 = vmul.f32 1.442695, %v3966_v31  ;;  %v3964_v3 = vmul.f32 %v8272_v13, %v3585_v45  ;;  %v9428_v33 = vpop.f32.mrb[159].mxu0  ;;  %v2951_v40 = vmax.f32 %v2363_v44, 0.0 }
 0x253   : > { %v3591_v36 = vmul.f32 0.6931472, %v7189_v25  ;;  %7206 = vlog2.f32 %v3206_v19  ;;  %v9430_v42 = vpop.f32.mrb[17].mxu1  ;;  %v7191_v17 = vpop.eup %7190  ;;  %v3969_v4 = vmul.f32 %v8272_v13, %v3595_v52  ;;  %6047 = vmatpush3.bf16.msra.mxu1 %v4754_v34  ;;  %v3209_v9 = vmax.f32 %v2953_v38, 1e-06 }
 0x254   : > { %10549 = vst [vmem:[#allocation17_spill] sm:$0xff] %v9430_v42  ;;  %v4756_v11 = vpack.c.bf16 %v9217_v46, %v9201_v2  ;;  %7208 = vpow2.f32 %v4357_v58  ;;  %v4353_v47 = vmul.f32 1.442695, %v3964_v3  ;;  %v3597_v26 = vmul.f32 0.6931472, %v7191_v17  ;;  %6048 = vmatprep.subr.bf16.mxu1 %v4763_v54  ;;  %v9443_v38 = vpop.f32.mrb[18].mxu1 }
 0x255   : > { %v7193_v27 = vpop.eup %7192  ;;  %v3967_v22 = vmul.f32 %v8272_v13, %v3591_v36  ;;  %v4363_v49 = vmul.f32 1.442695, %v3969_v4  ;;  %7210 = vlog2.f32 %v3209_v9  ;;  %v3207_v41 = vmax.f32 %v2951_v40, 1e-06  ;;  %10550 = vst [vmem:[#allocation18_spill] sm:$0xff] %v9443_v38 }
 0x256   : > { %v3593_v1 = vmul.f32 0.6931472, %v7193_v27  ;;  %v7195_v31 = vpop.eup %7194  ;;  %7212 = vpow2.f32 %v4353_v47  ;;  %v3970_v34 = vmul.f32 %v8272_v13, %v3597_v26  ;;  %v4609_v19 = vadd.s32 896, %v8687_v59 }
 0x257   : > { %v4359_v45 = vmul.f32 1.442695, %v3967_v22  ;;  %v7197_v25 = vpop.eup %7196  ;;  %7214 = vpow2.f32 %v4363_v49  ;;  %v3603_v46 = vmul.f32 0.6931472, %v7195_v31  ;;  %6049 = vmatpush3.bf16.msra.mxu1 %v4755_v39  ;;  %v2384_v54 = vadd.f32 %v9193_v63, %v9325_v5  ;;  %v9441_v52 = vpop.f32.mrb[160].mxu0 }
 0x258   : > { %v3968_v2 = vmul.f32 %v8272_v13, %v3593_v1  ;;  %v7199_v44 = vpop.eup %7198  ;;  %v4365_v58 = vmul.f32 1.442695, %v3970_v34  ;;  %v3599_v3 = vmul.f32 0.6931472, %v7197_v25  ;;  %6050 = vmatprep.subr.bf16.mxu1 %v4764_v7  ;;  %vm4626_vm11 = vcmp.ge.s32.totalorder %v4609_v19, %v8696_v0  ;;  %v9446_v36 = vpop.f32.mrb[161].mxu0 }
 0x259   : > { %7216 = vpow2.f32 %v4359_v45  ;;  %v3973_v39 = vmul.f32 %v8272_v13, %v3603_v46  ;;  %v3605_v9 = vmul.f32 0.6931472, %v7199_v44  ;;  %v9451_v5 = vpop.f32.mrb[162].mxu0  ;;  %vm4644_vm12 = vcmp.lt.s32.totalorder %v4609_v19, %v8703_v15 }
 0x25a   : > { %v9448_v17 = vpop.eup %7200  ;;  %v4361_v4 = vmul.f32 1.442695, %v3968_v2  ;;  %7218 = vlog2.f32 %v3207_v41  ;;  %v3971_v27 = vmul.f32 %v8272_v13, %v3599_v3  ;;  %v2956_v7 = vmax.f32 %v2384_v54, 0.0  ;;  %v9455_v47 = vpop.f32.mrb[163].mxu0  ;;  %vm4660_vm13 = vmand %vm4626_vm11, %vm4644_vm12 }
 0x25b   : > { %v7203_v40 = vpop.eup %7202  ;;  %7220 = vpow2.f32 %v4365_v58  ;;  %v4371_v26 = vmul.f32 1.442695, %v3973_v39  ;;  %v3974_v49 = vmul.f32 %v8272_v13, %v3605_v9  ;;  %6051 = vmatpush3.bf16.msra.mxu1 %v4756_v11  ;;  %vm5797_vm14 = vmpackc.low %vm4660_vm13, %vm4660_vm13  ;;  %v2376_v25 = vadd.f32 %v9193_v63, %v9332_v43  ;;  %v9468_v3 = vpop.f32.mrb[19].mxu1 }
 0x25c   : > { %v7205_v22 = vpop.eup %7204  ;;  %7222 = vpow2.f32 %v4361_v4  ;;  %v3601_v1 = vmul.f32 0.6931472, %v7203_v40  ;;  %v4367_v31 = vmul.f32 1.442695, %v3971_v27  ;;  %v3212_v34 = vmax.f32 %v2956_v7, 1e-06  ;;  %5798 = vmatprep.mubr.msk.bf16.mxu1 %vm5797_vm14, %v10546_v12 }
 0x25d   : > { %v7207_v41 = vpop.eup %7206  ;;  %v3611_v45 = vmul.f32 0.6931472, %v7205_v22  ;;  %7224 = vpow2.f32 %v4371_v26  ;;  %v4373_v2 = vmul.f32 1.442695, %v3974_v49  ;;  %v4608_v19 = vadd.s32 768, %v8687_v59  ;;  %10551 = vst [vmem:[#allocation19_spill] sm:$0xff] %v9468_v3 }
 0x25e   : > { %v3972_v46 = vmul.f32 %v8272_v13, %v3601_v1  ;;  %v3607_v54 = vmul.f32 0.6931472, %v7207_v41  ;;  %v9464_v44 = vpop.eup %7208  ;;  %7226 = vpow2.f32 %v4367_v31  ;;  %v2954_v58 = vmax.f32 %v2376_v25, 0.0 }
 0x25f   : > { %v3977_v11 = vmul.f32 %v8272_v13, %v3611_v45  ;;  %v7211_v4 = vpop.eup %7210  ;;  %7228 = vpow2.f32 %v4373_v2  ;;  %v2387_v9 = vadd.f32 %v9193_v63, %v9339_v37  ;;  %v9473_v40 = vpop.f32.mrb[164].mxu0  ;;  %vm4625_vm15 = vcmp.ge.s32.totalorder %v4608_v19, %v8696_v0 }
 0x260   : > { %v4369_v43 = vmul.f32 1.442695, %v3972_v46  ;;  %v3975_v39 = vmul.f32 %v8272_v13, %v3607_v54  ;;  %v9475_v27 = vpop.eup %7212  ;;  %v3613_v22 = vmul.f32 0.6931472, %v7211_v4  ;;  %7230 = vlog2.f32 %v3212_v34  ;;  %v9478_v26 = vpop.f32.mrb[165].mxu0 }
 0x261   : > { %v4379_v7 = vmul.f32 1.442695, %v3977_v11  ;;  %v9480_v49 = vpop.eup %7214  ;;  %vm4643_vm0 = vcmp.lt.s32.totalorder %v4608_v19, %v8703_v15  ;;  %v3210_v41 = vmax.f32 %v2954_v58, 1e-06  ;;  %v9483_v31 = vpop.f32.mrb[166].mxu0  ;;  %v2957_v34 = vmax.f32 %v2387_v9, 0.0 }
 0x262   : > { %7232 = vpow2.f32 %v4369_v43  ;;  %v4375_v1 = vmul.f32 1.442695, %v3975_v39  ;;  %v3978_v45 = vmul.f32 %v8272_v13, %v3613_v22  ;;  %vm4659_vm1 = vmand %vm4625_vm15, %vm4643_vm0  ;;  %v2379_v25 = vadd.f32 %v9193_v63, %v9345_v30  ;;  %v9490_v2 = vpop.f32.mrb[167].mxu0 }
 0x263   : > { %v9485_v37 = vpop.eup %7216  ;;  %7234 = vpow2.f32 %v4379_v7  ;;  %vm5799_vm2 = vmpackc.low %vm4659_vm1, %vm4659_vm1  ;;  %v2400_v54 = vadd.f32 %v9193_v63, %v9377_v23  ;;  %v2392_v11 = vadd.f32 %v9193_v63, %v9385_v51  ;;  %v2403_v19 = vadd.f32 %v9193_v63, %v9391_v50 }
 0x264   : > { %v7219_v46 = vpop.eup %7218  ;;  %7236 = vpow2.f32 %v4375_v1  ;;  %v4381_v4 = vmul.f32 1.442695, %v3978_v45  ;;  %5800 = vmatmul.mubr.msk.bf16.vlgmr.msra.gmra.mrb[72].mxu1 %vm5799_vm2, %v10546_v12  ;;  %v3213_v30 = vmax.f32 %v2957_v34, 1e-06  ;;  %v2955_v9 = vmax.f32 %v2379_v25, 0.0  ;;  %v9503_v1 = vpop.f32.mrb[20].mxu1 }
 0x265   : > { %v9498_v58 = vpop.eup %7220  ;;  %v3609_v43 = vmul.f32 0.6931472, %v7219_v46  ;;  %7238 = vlog2.f32 %v3210_v41  ;;  %v2960_v7 = vmax.f32 %v2400_v54, 0.0  ;;  %v2958_v22 = vmax.f32 %v2392_v11, 0.0  ;;  %10552 = vst [vmem:[#allocation20_spill] sm:$0xff] %v9503_v1  ;;  %v9510_v46 = vpop.f32.mrb[21].mxu1 }
 0x266   : > { %v9501_v39 = vpop.eup %7222  ;;  %v2961_v23 = vmax.f32 %v2403_v19, 0.0  ;;  %7240 = vpow2.f32 %v4381_v4  ;;  %v2395_v50 = vadd.f32 %v9193_v63, %v9397_v32  ;;  %v2416_v45 = vadd.f32 %v9193_v63, %v9418_v56  ;;  %10553 = vst [vmem:[#allocation21_spill] sm:$0xff] %v9510_v46 }
 0x267   : > { %v3976_v51 = vmul.f32 %v8272_v13, %v3609_v43  ;;  %v9512_v41 = vpop.eup %7224  ;;  %7242 = vlog2.f32 %v3213_v30  ;;  %v3211_v34 = vmax.f32 %v2955_v9, 1e-06  ;;  %v3216_v25 = vmax.f32 %v2960_v7, 1e-06  ;;  %v9524_v9 = vpop.f32.mrb[168].mxu0 }
 0x268   : > { %10554 = vst [vmem:[#allocation22_spill] sm:$0xff] %v9512_v41  ;;  %v3214_v54 = vmax.f32 %v2958_v22, 1e-06  ;;  %v9514_v11 = vpop.eup %7226  ;;  %v3217_v4 = vmax.f32 %v2961_v23, 1e-06  ;;  %v2959_v1 = vmax.f32 %v2395_v50, 0.0  ;;  %v2408_v32 = vadd.f32 %v9193_v63, %v9421_v24 }
 0x269   : > { %10555 = vst [vmem:[#allocation23_spill] sm:$0xff] %v9514_v11  ;;  %v4377_v19 = vmul.f32 1.442695, %v3976_v51  ;;  %v2964_v43 = vmax.f32 %v2416_v45, 0.0  ;;  %v9516_v12 = vpop.eup %7228  ;;  %7244 = vlog2.f32 %v3211_v34  ;;  %v2419_v56 = vadd.f32 %v9193_v63, %v9425_v8  ;;  %v9526_v7 = vpop.f32.mrb[22].mxu1 }
 0x26a   : > { %10556 = vst [vmem:[#allocation24_spill] sm:$0xff] %v9516_v12  ;;  %v2411_v30 = vadd.f32 %v9193_v63, %v9428_v33  ;;  %10557 = vst [vmem:[#allocation25_spill] sm:$0xff] %v9526_v7  ;;  %v7231_v22 = vpop.eup %7230  ;;  %v3215_v23 = vmax.f32 %v2959_v1, 1e-06  ;;  %v2432_v50 = vadd.f32 %v9193_v63, %v9441_v52  ;;  %v9530_v45 = vpop.f32.mrb[169].mxu0  ;;  %v2962_v33 = vmax.f32 %v2408_v32, 0.0 }
 0x26b   : > { %7246 = vpow2.f32 %v4377_v19  ;;  %v3220_v51 = vmax.f32 %v2964_v43, 1e-06  ;;  %v9532_v24 = vpop.f32.mrb[23].mxu1  ;;  %v3619_v8 = vmul.f32 0.6931472, %v7231_v22  ;;  %v2965_v46 = vmax.f32 %v2419_v56, 0.0 }
 0x26c   : > { %10558 = vst [vmem:[#allocation26_spill] sm:$0xff] %v9532_v24  ;;  %v9534_v34 = vpop.eup %7232  ;;  %7248 = vlog2.f32 %v3216_v25  ;;  %v9536_v3 = vpop.f32.mrb[170].mxu0  ;;  %v2963_v1 = vmax.f32 %v2411_v30, 0.0  ;;  %v2968_v19 = vmax.f32 %v2432_v50, 0.0  ;;  %v2424_v52 = vadd.f32 %v9193_v63, %v9446_v36 }
 0x26d   : > { %10559 = vst [vmem:[#allocation27_spill] sm:$0xff] %v9534_v34  ;;  %v9538_v7 = vpop.eup %7234  ;;  %7250 = vlog2.f32 %v3214_v54  ;;  %v9542_v43 = vpop.f32.mrb[171].mxu0  ;;  %v3981_v24 = vmul.f32 %v8272_v13, %v3619_v8  ;;  %v3218_v25 = vmax.f32 %v2962_v33, 1e-06  ;;  %v3221_v32 = vmax.f32 %v2965_v46, 1e-06 }
 0x26e   : > { %v9544_v15 = vpop.eup %7236  ;;  %7252 = vlog2.f32 %v3217_v4  ;;  %v3219_v22 = vmax.f32 %v2963_v1, 1e-06  ;;  %v3224_v0 = vmax.f32 %v2968_v19, 1e-06  ;;  %v2966_v59 = vmax.f32 %v2424_v52, 0.0  ;;  %v9551_v38 = vpop.f32.mrb[24].mxu1 }
 0x26f   : > { %v7239_v56 = vpop.eup %7238  ;;  %7254 = vlog2.f32 %v3215_v23  ;;  %v4387_v54 = vmul.f32 1.442695, %v3981_v24  ;;  %v2435_v36 = vadd.f32 %v9193_v63, %v9451_v5  ;;  %v9549_v50 = vpop.f32.mrb[172].mxu0  ;;  %10560 = vst [vmem:[#allocation28_spill] sm:$0xff] %v9551_v38  ;;  %v2427_v46 = vadd.f32 %v9193_v63, %v9455_v47 }
 0x270   : > { %v3615_v30 = vmul.f32 0.6931472, %v7239_v56  ;;  %7256 = vlog2.f32 %v3220_v51  ;;  %v9553_v42 = vpop.eup %7240  ;;  %v3222_v4 = vmax.f32 %v2966_v59, 1e-06  ;;  %v2576_v23 = vadd.f32 %v9193_v63, %v9117_v6  ;;  %v9559_v24 = vpop.f32.mrb[173].mxu0 }
 0x271   : > { %7258 = vlog2.f32 %v3218_v25  ;;  %v9561_v51 = vpop.f32.mrb[25].mxu1  ;;  %v7243_v8 = vpop.eup %7242  ;;  %v2969_v33 = vmax.f32 %v2435_v36, 0.0  ;;  %v2568_v1 = vadd.f32 %v9193_v63, %v9122_v10  ;;  %v2967_v52 = vmax.f32 %v2427_v46, 0.0 }
 0x272   : > { %10561 = vst [vmem:[#allocation29_spill] sm:$0xff] %v9561_v51  ;;  %7260 = vpow2.f32 %v4387_v54  ;;  %v3979_v5 = vmul.f32 %v8272_v13, %v3615_v30  ;;  %v9566_v19 = vpop.f32.mrb[174].mxu0  ;;  %v9568_v59 = vpop.f32.mrb[26].mxu1  ;;  %v3621_v47 = vmul.f32 0.6931472, %v7243_v8  ;;  %v3004_v6 = vmax.f32 %v2576_v23, 0.0 }
 0x273   : > { %10562 = vst [vmem:[#allocation30_spill] sm:$0xff] %v9568_v59  ;;  %7262 = vlog2.f32 %v3221_v32  ;;  %v9570_v25 = vpop.f32.mrb[175].mxu0  ;;  %v9572_v56 = vpop.f32.mrb[27].mxu1  ;;  %v3225_v30 = vmax.f32 %v2969_v33, 1e-06  ;;  %v3002_v36 = vmax.f32 %v2568_v1, 0.0 }
 0x274   : > { %10563 = vst [vmem:[#allocation31_spill] sm:$0xff] %v9572_v56  ;;  %v7245_v51 = vpop.eup %7244  ;;  %v4383_v54 = vmul.f32 1.442695, %v3979_v5  ;;  %7264 = vlog2.f32 %v3219_v22  ;;  %v3982_v10 = vmul.f32 %v8272_v13, %v3621_v47  ;;  %v3223_v59 = vmax.f32 %v2967_v52, 1e-06 }
 0x275   : > { %v9574_v38 = vpop.eup %7246  ;;  %v3617_v63 = vmul.f32 0.6931472, %v7245_v51  ;;  %7266 = vlog2.f32 %v3224_v0  ;;  %v3260_v32 = vmax.f32 %v3004_v6, 1e-06  ;;  %v9577_v46 = vmax.f32 %v3002_v36, 1e-06 }
 0x276   : > { %v7249_v8 = vpop.eup %7248  ;;  %7268 = vpow2.f32 %v4383_v54  ;;  %v9582_v23 = vld [vmem:[%s10508_s3] ss:$0 sm:$0xff]  ;;  %v4389_v33 = vmul.f32 1.442695, %v3982_v10  ;;  %v9591_v36 = vpop.f32.mrb[28].mxu1 }
 0x277   : > { %v2579_v22 = vadd.f32 %v9582_v23, %v9141_v20  ;;  %v7251_v5 = vpop.eup %7250  ;;  %v3980_v1 = vmul.f32 %v8272_v13, %v3617_v63  ;;  %v3627_v51 = vmul.f32 0.6931472, %v7249_v8  ;;  %7270 = vlog2.f32 %v3222_v4  ;;  %v9589_v54 = vpop.f32.mrb[176].mxu0  ;;  %10564 = vst [vmem:[#allocation32_spill] sm:$0xff] %v9591_v36 }
 0x278   : > { %v7253_v0 = vpop.eup %7252  ;;  %v3623_v47 = vmul.f32 0.6931472, %v7251_v5  ;;  %7272 = vlog2.f32 %v3225_v30  ;;  %v2448_v6 = vadd.f32 %v9582_v23, %v9473_v40  ;;  %v9594_v63 = vpop.f32.mrb[177].mxu0 }
 0x279   : > { %v3005_v52 = vmax.f32 %v2579_v22, 0.0  ;;  %v7255_v56 = vpop.eup %7254  ;;  %7274 = vpow2.f32 %v4389_v33  ;;  %v4385_v20 = vmul.f32 1.442695, %v3980_v1  ;;  %v3985_v10 = vmul.f32 %v8272_v13, %v3627_v51  ;;  %v9596_v4 = vpop.f32.mrb[29].mxu1 }
 0x27a   : > { %v3629_v12 = vmul.f32 0.6931472, %v7253_v0  ;;  %10565 = vst [vmem:[#allocation33_spill] sm:$0xff] %v9596_v4  ;;  %v7257_v8 = vpop.eup %7256  ;;  %v3983_v30 = vmul.f32 %v8272_v13, %v3623_v47  ;;  %v3625_v22 = vmul.f32 0.6931472, %v7255_v56  ;;  %7276 = vlog2.f32 %v3223_v59  ;;  %v9601_v5 = vpop.f32.mrb[178].mxu0 }
 0x27b   : > { %v9599_v40 = vmax.f32 %v3005_v52, 1e-06  ;;  %10566 = vst [vmem:[#allocation34_spill] sm:$0xff] %v9601_v5  ;;  %v9603_v36 = vpop.f32.mrb[30].mxu1  ;;  %v7259_v33 = vpop.eup %7258  ;;  %7278 = vpow2.f32 %v4385_v20  ;;  %v4395_v1 = vmul.f32 1.442695, %v3985_v10 }
 0x27c   : > { %10567 = vst [vmem:[#allocation35_spill] sm:$0xff] %v9603_v36  ;;  %v3986_v51 = vmul.f32 %v8272_v13, %v3629_v12  ;;  %v3635_v0 = vmul.f32 0.6931472, %v7257_v8  ;;  %v9606_v41 = vpop.f32.mrb[179].mxu0  ;;  %v9608_v4 = vpop.f32.mrb[31].mxu1  ;;  %v3984_v59 = vmul.f32 %v8272_v13, %v3625_v22  ;;  %7280 = vlog2.f32 %v3260_v32 }
 0x27d   : > { %10568 = vst [vmem:[#allocation36_spill] sm:$0xff] %v9606_v41  ;;  %10569 = vst [vmem:[#allocation37_spill] sm:$0xff] %v9608_v4  ;;  %v9610_v57 = vpop.eup %7260  ;;  %v4391_v56 = vmul.f32 1.442695, %v3983_v30  ;;  %v3631_v47 = vmul.f32 0.6931472, %v7259_v33  ;;  %7282 = vpow2.f32 %v4395_v1 }
 0x27e   : > { %v7263_v52 = vpop.eup %7262  ;;  %v4397_v36 = vmul.f32 1.442695, %v3986_v51  ;;  %v3989_v20 = vmul.f32 %v8272_v13, %v3635_v0  ;;  %v2972_v10 = vmax.f32 %v2448_v6, 0.0  ;;  %v4393_v12 = vmul.f32 1.442695, %v3984_v59  ;;  %v9622_v51 = vpop.f32.mrb[32].mxu1 }
 0x27f   : > { %v7265_v5 = vpop.eup %7264  ;;  %7284 = vpow2.f32 %v4391_v56  ;;  %v3987_v8 = vmul.f32 %v8272_v13, %v3631_v47  ;;  %v3637_v41 = vmul.f32 0.6931472, %v7263_v52  ;;  %v9620_v6 = vpop.f32.mrb[180].mxu0 }
 0x280   : > { %v7267_v4 = vpop.eup %7266  ;;  %7286 = vpow2.f32 %v4397_v36  ;;  %v4403_v34 = vmul.f32 1.442695, %v3989_v20  ;;  %v3633_v30 = vmul.f32 0.6931472, %v7265_v5  ;;  %v9615_v11 = vmax.f32 %v2972_v10, 1e-06 }
 0x281   : > { %v9617_v22 = vpop.eup %7268  ;;  %7288 = vpow2.f32 %v4393_v12  ;;  %v4399_v32 = vmul.f32 1.442695, %v3987_v8  ;;  %v3990_v33 = vmul.f32 %v8272_v13, %v3637_v41  ;;  %v3643_v1 = vmul.f32 0.6931472, %v7267_v4  ;;  %v9629_v59 = vpop.f32.mrb[181].mxu0 }
 0x282   : > { %v7271_v0 = vpop.eup %7270  ;;  %7290 = vpow2.f32 %v4403_v34  ;;  %v3988_v56 = vmul.f32 %v8272_v13, %v3633_v30  ;;  %v2571_v36 = vadd.f32 %v9582_v23, %v9168_v62  ;;  %v4773_v5 = vpack.c.bf16 %v9574_v38, %v9544_v15  ;;  %v9631_v47 = vpop.f32.mrb[33].mxu1 }
 0x283   : > { %10570 = vst [vmem:[#allocation38_spill] sm:$0xff] %v9631_v47  ;;  %v7273_v41 = vpop.eup %7272  ;;  %7292 = vpow2.f32 %v4399_v32  ;;  %v4405_v4 = vmul.f32 1.442695, %v3990_v33  ;;  %v3993_v52 = vmul.f32 %v8272_v13, %v3643_v1  ;;  %v3639_v20 = vmul.f32 0.6931472, %v7271_v0  ;;  %v9634_v10 = vpop.f32.mrb[182].mxu0 }
 0x284   : > { %v9636_v34 = vpop.f32.mrb[34].mxu1  ;;  %v9638_v12 = vpop.eup %7274  ;;  %v4401_v62 = vmul.f32 1.442695, %v3988_v56  ;;  %v3645_v8 = vmul.f32 0.6931472, %v7273_v41  ;;  %7294 = vlog2.f32 %v9577_v46  ;;  %v3003_v15 = vmax.f32 %v2571_v36, 0.0  ;;  %6058 = vmatprep.subr.bf16.mxu1 %v4773_v5 }
 0x285   : > { %10571 = vst [vmem:[#allocation39_spill] sm:$0xff] %v9636_v34  ;;  %v9641_v38 = vpop.f32.mrb[183].mxu0  ;;  %v7277_v30 = vpop.eup %7276  ;;  %7296 = vpow2.f32 %v4405_v4  ;;  %v4411_v32 = vmul.f32 1.442695, %v3993_v52  ;;  %v3991_v33 = vmul.f32 %v8272_v13, %v3639_v20  ;;  %v2440_v1 = vadd.f32 %v9582_v23, %v9478_v26 }
 0x286   : > { %v9646_v0 = vpop.f32.mrb[35].mxu1  ;;  %v9648_v34 = vpop.eup %7278  ;;  %7298 = vpow2.f32 %v4401_v62  ;;  %v3994_v56 = vmul.f32 %v8272_v13, %v3645_v8  ;;  %v3641_v46 = vmul.f32 0.6931472, %v7277_v30  ;;  %v3259_v36 = vmax.f32 %v3003_v15, 1e-06 }
 0x287   : > { %10572 = vst [vmem:[#allocation40_spill] sm:$0xff] %v9646_v0  ;;  %v7281_v5 = vpop.eup %7280  ;;  %7300 = vpow2.f32 %v4411_v32  ;;  %v4407_v41 = vmul.f32 1.442695, %v3991_v33  ;;  %v2970_v47 = vmax.f32 %v2440_v1, 0.0  ;;  %v4765_v4 = vpack.c.bf16 %v9402_v48, %v9387_v60  ;;  %v9663_v60 = vpop.f32.mrb[184].mxu0 }
 0x288   : > { %v9653_v52 = vpop.eup %7282  ;;  %v4413_v20 = vmul.f32 1.442695, %v3994_v56  ;;  %v3992_v26 = vmul.f32 %v8272_v13, %v3641_v46  ;;  %v3715_v0 = vmul.f32 0.6931472, %v7281_v5  ;;  %7302 = vlog2.f32 %v9599_v40  ;;  %v9670_v1 = vpop.f32.mrb[185].mxu0 }
 0x289   : > { %v9657_v62 = vpop.eup %7284  ;;  %7304 = vpow2.f32 %v4407_v41  ;;  %v3226_v8 = vmax.f32 %v2970_v47, 1e-06  ;;  %6059 = vmatpush3.bf16.msra.mxu1 %v4765_v4  ;;  %v2451_v15 = vadd.f32 %v9582_v23, %v9483_v31  ;;  %v4774_v30 = vpack.c.bf16 %v9553_v42, %v9538_v7  ;;  %v9679_v56 = vpop.f32.mrb[186].mxu0 }
 0x28a   : > { %v9665_v48 = vpop.eup %7286  ;;  %7306 = vpow2.f32 %v4413_v20  ;;  %v4409_v32 = vmul.f32 1.442695, %v3992_v26  ;;  %v4029_v33 = vmul.f32 %v8272_v13, %v3715_v0  ;;  %v2443_v40 = vadd.f32 %v9582_v23, %v9490_v2  ;;  %v9685_v41 = vpop.f32.mrb[187].mxu0  ;;  %v10573_v20 = vld [vmem:[#allocation11_spill] sm:$0xff] }
 0x28b   : > { %v9672_v47 = vpop.eup %7288  ;;  %7308 = vlog2.f32 %v9615_v11  ;;  %v2973_v31 = vmax.f32 %v2451_v15, 0.0  ;;  %6060 = vmatprep.subr.bf16.mxu1 %v4774_v30  ;;  %v2592_v42 = vadd.f32 %v9582_v23, %v9199_v28  ;;  %v4766_v7 = vpack.c.bf16 %v9393_v61, %v9371_v35 }
 0x28c   : > { %v9681_v0 = vpop.eup %7290  ;;  %7310 = vpow2.f32 %v4409_v32  ;;  %v4483_v2 = vmul.f32 1.442695, %v4029_v33  ;;  %v2971_v46 = vmax.f32 %v2443_v40, 0.0  ;;  %v2584_v5 = vadd.f32 %v9582_v23, %v9207_v14 }
 0x28d   : > { %v9687_v11 = vpop.eup %7292  ;;  %7312 = vlog2.f32 %v3259_v36  ;;  %v3229_v4 = vmax.f32 %v2973_v31, 1e-06  ;;  %v3008_v28 = vmax.f32 %v2592_v42, 0.0  ;;  %6061 = vmatpush3.bf16.msra.mxu1 %v4766_v7  ;;  %v2595_v35 = vadd.f32 %v9582_v23, %v10573_v20  ;;  %v10574_v7 = vld [vmem:[#allocation12_spill] sm:$0xff] }
 0x28e   : > { %v7295_v61 = vpop.eup %7294  ;;  %7314 = vpow2.f32 %v4483_v2  ;;  %v3227_v26 = vmax.f32 %v2971_v46, 1e-06  ;;  %v3006_v15 = vmax.f32 %v2584_v5, 0.0  ;;  %v2464_v30 = vadd.f32 %v9582_v23, %v9524_v9 }
 0x28f   : > { %v9693_v32 = vpop.eup %7296  ;;  %v3711_v14 = vmul.f32 0.6931472, %v7295_v61  ;;  %7316 = vlog2.f32 %v3226_v8  ;;  %v3264_v33 = vmax.f32 %v3008_v28, 1e-06  ;;  %v3009_v40 = vmax.f32 %v2595_v35, 0.0  ;;  %v9704_v8 = vpop.f32.mrb[188].mxu0 }
 0x290   : > { %v9695_v36 = vpop.eup %7298  ;;  %7318 = vlog2.f32 %v3229_v4  ;;  %v3262_v31 = vmax.f32 %v3006_v15, 1e-06  ;;  %v2976_v42 = vmax.f32 %v2464_v30, 0.0  ;;  %v2587_v20 = vadd.f32 %v9582_v23, %v10574_v7  ;;  %v9708_v15 = vpop.f32.mrb[189].mxu0 }
 0x291   : > { %v9699_v2 = vpop.eup %7300  ;;  %v4027_v46 = vmul.f32 %v8272_v13, %v3711_v14  ;;  %7320 = vlog2.f32 %v3227_v26  ;;  %v3265_v9 = vmax.f32 %v3009_v40, 1e-06  ;;  %v4775_v5 = vpack.c.bf16 %v9648_v34, %v9617_v22  ;;  %v9714_v34 = vpop.f32.mrb[190].mxu0 }
 0x292   : > { %10575 = vst [vmem:[#allocation11_spill] sm:$0xff] %v9699_v2  ;;  %v7303_v28 = vpop.eup %7302  ;;  %7322 = vlog2.f32 %v3264_v33  ;;  %v3232_v35 = vmax.f32 %v2976_v42, 1e-06  ;;  %v3007_v4 = vmax.f32 %v2587_v20, 0.0  ;;  %v2456_v61 = vadd.f32 %v9582_v23, %v9530_v45  ;;  %v9720_v42 = vpop.f32.mrb[191].mxu0 }
 0x293   : > { %v9710_v30 = vpop.eup %7304  ;;  %v4479_v7 = vmul.f32 1.442695, %v4027_v46  ;;  %v3717_v14 = vmul.f32 0.6931472, %v7303_v28  ;;  %7324 = vlog2.f32 %v3262_v31  ;;  %6062 = vmatprep.subr.bf16.mxu1 %v4775_v5  ;;  %v4767_v22 = vpack.c.bf16 %v9475_v27, %v9448_v17 }
 0x294   : > { %10576 = vst [vmem:[#allocation12_spill] sm:$0xff] %v9710_v30  ;;  %v9716_v26 = vpop.eup %7306  ;;  %7326 = vlog2.f32 %v3265_v9  ;;  %v3263_v33 = vmax.f32 %v3007_v4, 1e-06  ;;  %v2974_v40 = vmax.f32 %v2456_v61, 0.0  ;;  %v2467_v45 = vadd.f32 %v9582_v23, %v9536_v3 }
 0x295   : > { %10577 = vst [vmem:[#allocation41_spill] sm:$0xff] %v9716_v26  ;;  %v7309_v20 = vpop.eup %7308  ;;  %7328 = vpow2.f32 %v4479_v7  ;;  %v4030_v31 = vmul.f32 %v8272_v13, %v3717_v14  ;;  %6063 = vmatpush3.bf16.msra.mxu1 %v4767_v22  ;;  %v4776_v17 = vpack.c.bf16 %v9638_v12, %v9610_v57  ;;  %v2459_v27 = vadd.f32 %v9582_v23, %v9542_v43  ;;  %v10579_v7 = vld [vmem:[#allocation13_spill] sm:$0xff] }
 0x296   : > { %v9727_v46 = vpop.eup %7310  ;;  %v3651_v9 = vmul.f32 0.6931472, %v7309_v20  ;;  %7330 = vlog2.f32 %v3232_v35  ;;  %v3230_v5 = vmax.f32 %v2974_v40, 1e-06  ;;  %v2977_v28 = vmax.f32 %v2467_v45, 0.0 }
 0x297   : > { %10578 = vst [vmem:[#allocation42_spill] sm:$0xff] %v9727_v46  ;;  %v7313_v3 = vpop.eup %7312  ;;  %v4485_v4 = vmul.f32 1.442695, %v4030_v31  ;;  %7332 = vlog2.f32 %v3263_v33  ;;  %6064 = vmatprep.subr.bf16.mxu1 %v4776_v17  ;;  %v2975_v61 = vmax.f32 %v2459_v27, 0.0  ;;  %v2608_v14 = vadd.f32 %v9582_v23, %v10579_v7  ;;  %v9736_v33 = vpop.f32.mrb[192].mxu0 }
 0x298   : > { %v9731_v22 = vpop.eup %7314  ;;  %v3997_v57 = vmul.f32 %v8272_v13, %v3651_v9  ;;  %v3713_v12 = vmul.f32 0.6931472, %v7313_v3  ;;  %7334 = vlog2.f32 %v3230_v5  ;;  %v3233_v43 = vmax.f32 %v2977_v28, 1e-06  ;;  %v9739_v7 = vpop.f32.mrb[193].mxu0  ;;  %v10581_v3 = vld [vmem:[#allocation14_spill] sm:$0xff] }
 0x299   : > { %10580 = vst [vmem:[#allocation13_spill] sm:$0xff] %v9731_v22  ;;  %v7317_v26 = vpop.eup %7316  ;;  %7336 = vpow2.f32 %v4485_v4  ;;  %v3231_v35 = vmax.f32 %v2975_v61, 1e-06  ;;  %v3012_v40 = vmax.f32 %v2608_v14, 0.0  ;;  %v4768_v45 = vpack.c.bf16 %v9464_v44, %v9408_v18  ;;  %v9743_v61 = vpop.f32.mrb[194].mxu0 }
 0x29a   : > { %v7319_v20 = vpop.eup %7318  ;;  %v4419_v31 = vmul.f32 1.442695, %v3997_v57  ;;  %v4028_v17 = vmul.f32 %v8272_v13, %v3713_v12  ;;  %v3647_v27 = vmul.f32 0.6931472, %v7317_v26  ;;  %7338 = vlog2.f32 %v3233_v43  ;;  %v9746_v26 = vpop.f32.mrb[195].mxu0 }
 0x29b   : > { %v7321_v9 = vpop.eup %7320  ;;  %v3653_v5 = vmul.f32 0.6931472, %v7319_v20  ;;  %7340 = vlog2.f32 %v3231_v35  ;;  %v3268_v28 = vmax.f32 %v3012_v40, 1e-06  ;;  %6065 = vmatpush3.bf16.msra.mxu1 %v4768_v45  ;;  %v2600_v4 = vadd.f32 %v9582_v23, %v10581_v3  ;;  %v9749_v40 = vpop.f32.mrb[36].mxu1 }
 0x29c   : > { %v7323_v18 = vpop.eup %7322  ;;  %7342 = vpow2.f32 %v4419_v31  ;;  %v4481_v44 = vmul.f32 1.442695, %v4028_v17  ;;  %v3995_v14 = vmul.f32 %v8272_v13, %v3647_v27  ;;  %v3649_v57 = vmul.f32 0.6931472, %v7321_v9  ;;  %10582 = vst [vmem:[#allocation14_spill] sm:$0xff] %v9749_v40 }
 0x29d   : > { %v7325_v12 = vpop.eup %7324  ;;  %v3998_v43 = vmul.f32 %v8272_v13, %v3653_v5  ;;  %v3723_v20 = vmul.f32 0.6931472, %v7323_v18  ;;  %7344 = vlog2.f32 %v3268_v28  ;;  %v3010_v35 = vmax.f32 %v2600_v4, 0.0  ;;  %v10584_v4 = vld [vmem:[#allocation15_spill] sm:$0xff] }
 0x29e   : > { %v7327_v45 = vpop.eup %7326  ;;  %7346 = vpow2.f32 %v4481_v44  ;;  %v4415_v3 = vmul.f32 1.442695, %v3995_v14  ;;  %v3996_v22 = vmul.f32 %v8272_v13, %v3649_v57  ;;  %v3719_v31 = vmul.f32 0.6931472, %v7325_v12 }
 0x29f   : > { %v9752_v17 = vpop.eup %7328  ;;  %v4421_v27 = vmul.f32 1.442695, %v3998_v43  ;;  %v4033_v9 = vmul.f32 %v8272_v13, %v3723_v20  ;;  %v3725_v2 = vmul.f32 0.6931472, %v7327_v45  ;;  %v3266_v46 = vmax.f32 %v3010_v35, 1e-06 }
 0x2a0   : > { %10583 = vst [vmem:[#allocation43_spill] sm:$0xff] %v9752_v17  ;;  %v7331_v30 = vpop.eup %7330  ;;  %7348 = vpow2.f32 %v4415_v3  ;;  %v4417_v5 = vmul.f32 1.442695, %v3996_v22  ;;  %v4031_v28 = vmul.f32 %v8272_v13, %v3719_v31  ;;  %v2611_v18 = vadd.f32 %v9582_v23, %v10584_v4  ;;  %v9759_v17 = vpop.f32.mrb[37].mxu1 }
 0x2a1   : > { %v7333_v44 = vpop.eup %7332  ;;  %7350 = vpow2.f32 %v4421_v27  ;;  %v4491_v14 = vmul.f32 1.442695, %v4033_v9  ;;  %v4034_v57 = vmul.f32 %v8272_v13, %v3725_v2  ;;  %v3659_v12 = vmul.f32 0.6931472, %v7331_v30  ;;  %v9767_v9 = vpop.f32.mrb[38].mxu1 }
 0x2a2   : > { %v7335_v43 = vpop.eup %7334  ;;  %7352 = vpow2.f32 %v4417_v5  ;;  %v4487_v20 = vmul.f32 1.442695, %v4031_v28  ;;  %v3721_v35 = vmul.f32 0.6931472, %v7333_v44  ;;  %v3013_v45 = vmax.f32 %v2611_v18, 0.0 }
 0x2a3   : > { %v9761_v3 = vpop.eup %7336  ;;  %7354 = vpow2.f32 %v4491_v14  ;;  %v4493_v22 = vmul.f32 1.442695, %v4034_v57  ;;  %v4001_v31 = vmul.f32 %v8272_v13, %v3659_v12  ;;  %v3655_v4 = vmul.f32 0.6931472, %v7335_v43 }
 0x2a4   : > { %10585 = vst [vmem:[#allocation15_spill] sm:$0xff] %v9761_v3  ;;  %v7339_v40 = vpop.eup %7338  ;;  %7356 = vpow2.f32 %v4487_v20  ;;  %v4032_v27 = vmul.f32 %v8272_v13, %v3721_v35  ;;  %v3269_v2 = vmax.f32 %v3013_v45, 1e-06  ;;  %v2480_v30 = vadd.f32 %v9582_v23, %v9549_v50  ;;  %v9772_v20 = vpop.f32.mrb[39].mxu1 }
 0x2a5   : > { %v7341_v5 = vpop.eup %7340  ;;  %7358 = vpow2.f32 %v4493_v22  ;;  %v4427_v28 = vmul.f32 1.442695, %v4001_v31  ;;  %v3999_v18 = vmul.f32 %v8272_v13, %v3655_v4  ;;  %v3661_v44 = vmul.f32 0.6931472, %v7339_v40  ;;  %v9777_v31 = vpop.f32.mrb[40].mxu1 }
 0x2a6   : > { %v9770_v14 = vpop.eup %7342  ;;  %v4489_v57 = vmul.f32 1.442695, %v4032_v27  ;;  %v3657_v12 = vmul.f32 0.6931472, %v7341_v5  ;;  %7360 = vlog2.f32 %v3266_v46  ;;  %v2980_v43 = vmax.f32 %v2480_v30, 0.0 }
 0x2a7   : > { %v7345_v35 = vpop.eup %7344  ;;  %7362 = vpow2.f32 %v4427_v28  ;;  %v4423_v45 = vmul.f32 1.442695, %v3999_v18  ;;  %v4002_v50 = vmul.f32 %v8272_v13, %v3661_v44  ;;  %v2603_v22 = vadd.f32 %v9582_v23, %v9309_v55 }
 0x2a8   : > { %v9779_v4 = vpop.eup %7346  ;;  %7364 = vpow2.f32 %v4489_v57  ;;  %v4000_v40 = vmul.f32 %v8272_v13, %v3657_v12  ;;  %v3731_v27 = vmul.f32 0.6931472, %v7345_v35  ;;  %v3236_v46 = vmax.f32 %v2980_v43, 1e-06 }
 0x2a9   : > { %10586 = vst [vmem:[#allocation44_spill] sm:$0xff] %v9779_v4  ;;  %7366 = vpow2.f32 %v4423_v45  ;;  %v4429_v30 = vmul.f32 1.442695, %v4002_v50  ;;  %v3011_v5 = vmax.f32 %v2603_v22, 0.0  ;;  %v4777_v28 = vpack.c.bf16 %v9672_v47, %v9657_v62 }
 0x2aa   : > { %v9784_v18 = vpop.eup %7348  ;;  %v4425_v44 = vmul.f32 1.442695, %v4000_v40  ;;  %v4037_v55 = vmul.f32 %v8272_v13, %v3731_v27  ;;  %7368 = vlog2.f32 %v3269_v2  ;;  %v2472_v3 = vadd.f32 %v9582_v23, %v9559_v24  ;;  %v9799_v24 = vpop.f32.mrb[41].mxu1 }
 0x2ab   : > { %v9789_v57 = vpop.eup %7350  ;;  %7370 = vpow2.f32 %v4429_v30  ;;  %v3267_v12 = vmax.f32 %v3011_v5, 1e-06  ;;  %6066 = vmatprep.subr.bf16.mxu1 %v4777_v28  ;;  %v4769_v43 = vpack.c.bf16 %v9501_v39, %v9485_v37  ;;  %v2483_v62 = vadd.f32 %v9582_v23, %v9566_v19  ;;  %v9807_v19 = vpop.f32.mrb[42].mxu1 }
 0x2ac   : > { %v9795_v47 = vpop.eup %7352  ;;  %7372 = vpow2.f32 %v4425_v44  ;;  %v4499_v35 = vmul.f32 1.442695, %v4037_v55  ;;  %v2978_v45 = vmax.f32 %v2472_v3, 0.0  ;;  %v4778_v2 = vpack.c.bf16 %v9665_v48, %v9653_v52 }
 0x2ad   : > { %v9801_v50 = vpop.eup %7354  ;;  %7374 = vlog2.f32 %v3236_v46  ;;  %6067 = vmatpush3.bf16.msra.mxu1 %v4769_v43  ;;  %v2981_v22 = vmax.f32 %v2483_v62, 0.0  ;;  %v2475_v37 = vadd.f32 %v9582_v23, %v9570_v25  ;;  %v2624_v39 = vadd.f32 %v9582_v23, %v9347_v29  ;;  %v9817_v29 = vpop.f32.mrb[43].mxu1 }
 0x2ae   : > { %10587 = vst [vmem:[#allocation45_spill] sm:$0xff] %v9801_v50  ;;  %v9809_v40 = vpop.eup %7356  ;;  %7376 = vpow2.f32 %v4499_v35  ;;  %v3234_v3 = vmax.f32 %v2978_v45, 1e-06  ;;  %6068 = vmatprep.subr.bf16.mxu1 %v4778_v2  ;;  %v4770_v52 = vpack.c.bf16 %v9498_v58, %v9480_v49  ;;  %v2616_v48 = vadd.f32 %v9582_v23, %v9353_v53  ;;  %v9823_v58 = vpop.f32.mrb[44].mxu1 }
 0x2af   : > { %10588 = vst [vmem:[#allocation46_spill] sm:$0xff] %v9809_v40  ;;  %v9815_v27 = vpop.eup %7358  ;;  %7378 = vlog2.f32 %v3267_v12  ;;  %v3237_v25 = vmax.f32 %v2981_v22, 1e-06  ;;  %v2979_v46 = vmax.f32 %v2475_v37, 0.0  ;;  %v3016_v30 = vmax.f32 %v2624_v39, 0.0  ;;  %v9831_v22 = vpop.f32.mrb[45].mxu1 }
 0x2b0   : > { %10589 = vst [vmem:[#allocation47_spill] sm:$0xff] %v9815_v27  ;;  %v7361_v5 = vpop.eup %7360  ;;  %7380 = vlog2.f32 %v3234_v3  ;;  %v3014_v28 = vmax.f32 %v2616_v48, 0.0  ;;  %v2627_v44 = vadd.f32 %v9582_v23, %v9361_v16  ;;  %v2496_v49 = vadd.f32 %v9582_v23, %v9589_v54  ;;  %v10598_v27 = vld [vmem:[#allocation24_spill] sm:$0xff] }
 0x2b1   : > { %v9825_v53 = vpop.eup %7362  ;;  %v3727_v55 = vmul.f32 0.6931472, %v7361_v5  ;;  %7382 = vlog2.f32 %v3237_v25  ;;  %v3235_v12 = vmax.f32 %v2979_v46, 1e-06  ;;  %v3272_v43 = vmax.f32 %v3016_v30, 1e-06  ;;  %6069 = vmatpush3.bf16.msra.mxu1 %v4770_v52 }
 0x2b2   : > { %v9827_v62 = vpop.eup %7364  ;;  %v3270_v35 = vmax.f32 %v3014_v28, 1e-06  ;;  %v3017_v45 = vmax.f32 %v2627_v44, 0.0  ;;  %v2984_v2 = vmax.f32 %v2496_v49, 0.0  ;;  %v2619_v16 = vadd.f32 %v9582_v23, %v9379_v21  ;;  %v9840_v52 = vpop.f32.mrb[46].mxu1 }
 0x2b3   : > { %10590 = vst [vmem:[#allocation48_spill] sm:$0xff] %v9827_v62  ;;  %v9833_v54 = vpop.eup %7366  ;;  %v4035_v37 = vmul.f32 %v8272_v13, %v3727_v55  ;;  %7384 = vlog2.f32 %v3235_v12  ;;  %v4779_v39 = vpack.c.bf16 %v9695_v36, %v9687_v11  ;;  %v2488_v3 = vadd.f32 %v9582_v23, %v9594_v63  ;;  %v9842_v30 = vpop.f32.mrb[47].mxu1  ;;  %v10591_v36 = vld [vmem:[#allocation23_spill] sm:$0xff] }
 0x2b4   : > { %v7369_v48 = vpop.eup %7368  ;;  %7386 = vlog2.f32 %v3272_v43  ;;  %v3273_v25 = vmax.f32 %v3017_v45, 1e-06  ;;  %v3240_v46 = vmax.f32 %v2984_v2, 1e-06  ;;  %v3015_v21 = vmax.f32 %v2619_v16, 0.0  ;;  %v10592_v55 = vld [vmem:[#allocation27_spill] sm:$0xff] }
 0x2b5   : > { %v9844_v5 = vpop.eup %7370  ;;  %v4495_v28 = vmul.f32 1.442695, %v4035_v37  ;;  %v3733_v44 = vmul.f32 0.6931472, %v7369_v48  ;;  %7388 = vlog2.f32 %v3270_v35  ;;  %6070 = vmatprep.subr.bf16.mxu1 %v4779_v39  ;;  %v2982_v49 = vmax.f32 %v2488_v3, 0.0  ;;  %v10593_v43 = vld [vmem:[#allocation34_spill] sm:$0xff] }
 0x2b6   : > { %v9846_v11 = vpop.eup %7372  ;;  %7390 = vlog2.f32 %v3273_v25  ;;  %v3271_v63 = vmax.f32 %v3015_v21, 1e-06  ;;  %v4771_v12 = vpack.c.bf16 %v10592_v55, %v10591_v36  ;;  %v2499_v45 = vadd.f32 %v9582_v23, %v10593_v43  ;;  %v9852_v2 = vpop.f32.mrb[48].mxu1  ;;  %v10595_v21 = vld [vmem:[#allocation36_spill] sm:$0xff] }
 0x2b7   : > { %v7375_v16 = vpop.eup %7374  ;;  %7392 = vpow2.f32 %v4495_v28  ;;  %v4038_v37 = vmul.f32 %v8272_v13, %v3733_v44  ;;  %v3238_v48 = vmax.f32 %v2982_v49, 1e-06  ;;  %v4780_v35 = vpack.c.bf16 %v9693_v32, %v9681_v0  ;;  %v10596_v28 = vld [vmem:[#allocation16_spill] sm:$0xff]  ;;  %v10597_v49 = vld [vmem:[#allocation22_spill] sm:$0xff] }
 0x2b8   : > { %v9857_v39 = vpop.eup %7376  ;;  %v3667_v3 = vmul.f32 0.6931472, %v7375_v16  ;;  %7394 = vlog2.f32 %v3240_v46  ;;  %6071 = vmatpush3.bf16.msra.mxu1 %v4771_v12  ;;  %v2985_v25 = vmax.f32 %v2499_v45, 0.0  ;;  %v2491_v36 = vadd.f32 %v9582_v23, %v10595_v21 }
 0x2b9   : > { %10594 = vst [vmem:[#allocation23_spill] sm:$0xff] %v9857_v39  ;;  %v7379_v55 = vpop.eup %7378  ;;  %v4501_v43 = vmul.f32 1.442695, %v4038_v37  ;;  %7396 = vlog2.f32 %v3271_v63  ;;  %6072 = vmatprep.subr.bf16.mxu1 %v4780_v35  ;;  %v2640_v44 = vadd.f32 %v9582_v23, %v10596_v28  ;;  %v4772_v50 = vpack.c.bf16 %v10598_v27, %v10597_v49  ;;  %v9866_v37 = vpop.f32.mrb[49].mxu1 }
 0x2ba   : > { %v7381_v0 = vpop.eup %7380  ;;  %v4005_v32 = vmul.f32 %v8272_v13, %v3667_v3  ;;  %v3729_v16 = vmul.f32 0.6931472, %v7379_v55  ;;  %7398 = vlog2.f32 %v3238_v48  ;;  %v3241_v46 = vmax.f32 %v2985_v25, 1e-06  ;;  %v9869_v27 = vpop.f32.mrb[50].mxu1  ;;  %v10600_v55 = vld [vmem:[#allocation17_spill] sm:$0xff] }
 0x2bb   : > { %v7383_v12 = vpop.eup %7382  ;;  %7400 = vpow2.f32 %v4501_v43  ;;  %v3663_v45 = vmul.f32 0.6931472, %v7381_v0  ;;  %v2983_v21 = vmax.f32 %v2491_v36, 0.0  ;;  %v3020_v39 = vmax.f32 %v2640_v44, 0.0  ;;  %10599 = vst [vmem:[#allocation27_spill] sm:$0xff] %v9869_v27  ;;  %v9875_v62 = vpop.f32.mrb[51].mxu1 }
 0x2bc   : > { %v4435_v63 = vmul.f32 1.442695, %v4005_v32  ;;  %v4036_v35 = vmul.f32 %v8272_v13, %v3729_v16  ;;  %v3669_v28 = vmul.f32 0.6931472, %v7383_v12  ;;  %7402 = vlog2.f32 %v3241_v46  ;;  %6073 = vmatpush3.bf16.msra.mxu1 %v4772_v50  ;;  %10601 = vst [vmem:[#allocation34_spill] sm:$0xff] %v9875_v62 }
 0x2bd   : > { %v7385_v49 = vpop.eup %7384  ;;  %v4003_v3 = vmul.f32 %v8272_v13, %v3663_v45  ;;  %v3239_v48 = vmax.f32 %v2983_v21, 1e-06  ;;  %v3276_v25 = vmax.f32 %v3020_v39, 1e-06  ;;  %v2632_v43 = vadd.f32 %v9582_v23, %v10600_v55 }
 0x2be   : > { %v7387_v36 = vpop.eup %7386  ;;  %7404 = vpow2.f32 %v4435_v63  ;;  %v4497_v44 = vmul.f32 1.442695, %v4036_v35  ;;  %v4006_v0 = vmul.f32 %v8272_v13, %v3669_v28  ;;  %v3665_v32 = vmul.f32 0.6931472, %v7385_v49 }
 0x2bf   : > { %v7389_v16 = vpop.eup %7388  ;;  %v4431_v12 = vmul.f32 1.442695, %v4003_v3  ;;  %v3739_v46 = vmul.f32 0.6931472, %v7387_v36  ;;  %7406 = vlog2.f32 %v3239_v48  ;;  %v3018_v50 = vmax.f32 %v2632_v43, 0.0  ;;  %v10603_v43 = vld [vmem:[#allocation18_spill] sm:$0xff] }
 0x2c0   : > { %v7391_v40 = vpop.eup %7390  ;;  %7408 = vpow2.f32 %v4497_v44  ;;  %v4437_v45 = vmul.f32 1.442695, %v4006_v0  ;;  %v4004_v39 = vmul.f32 %v8272_v13, %v3665_v32  ;;  %v3735_v21 = vmul.f32 0.6931472, %v7389_v16 }
 0x2c1   : > { %v9878_v55 = vpop.eup %7392  ;;  %7410 = vpow2.f32 %v4431_v12  ;;  %v4041_v63 = vmul.f32 %v8272_v13, %v3739_v46  ;;  %v3741_v35 = vmul.f32 0.6931472, %v7391_v40  ;;  %v3274_v28 = vmax.f32 %v3018_v50, 1e-06 }
 0x2c2   : > { %10602 = vst [vmem:[#allocation36_spill] sm:$0xff] %v9878_v55  ;;  %v7395_v49 = vpop.eup %7394  ;;  %7412 = vpow2.f32 %v4437_v45  ;;  %v4433_v3 = vmul.f32 1.442695, %v4004_v39  ;;  %v4039_v48 = vmul.f32 %v8272_v13, %v3735_v21  ;;  %v2643_v36 = vadd.f32 %v9582_v23, %v10603_v43  ;;  %v9885_v55 = vpop.f32.mrb[52].mxu1 }
 0x2c3   : > { %v7397_v44 = vpop.eup %7396  ;;  %v4507_v0 = vmul.f32 1.442695, %v4041_v63  ;;  %v4042_v32 = vmul.f32 %v8272_v13, %v3741_v35  ;;  %v3675_v16 = vmul.f32 0.6931472, %v7395_v49  ;;  %7414 = vlog2.f32 %v3276_v25  ;;  %10604 = vst [vmem:[#allocation16_spill] sm:$0xff] %v9885_v55  ;;  %v10606_v25 = vld [vmem:[#allocation8_spill] sm:$0xff] }
 0x2c4   : > { %v7399_v12 = vpop.eup %7398  ;;  %7416 = vpow2.f32 %v4433_v3  ;;  %v4503_v40 = vmul.f32 1.442695, %v4039_v48  ;;  %v3737_v46 = vmul.f32 0.6931472, %v7397_v44  ;;  %v3021_v50 = vmax.f32 %v2643_v36, 0.0 }
 0x2c5   : > { %v9887_v45 = vpop.eup %7400  ;;  %7418 = vpow2.f32 %v4507_v0  ;;  %v4509_v39 = vmul.f32 1.442695, %v4042_v32  ;;  %v4009_v21 = vmul.f32 %v8272_v13, %v3675_v16  ;;  %v3671_v43 = vmul.f32 0.6931472, %v7399_v12  ;;  %v10607_v0 = vld [vmem:[#allocation9_spill] sm:$0xff]  ;;  %v10608_v32 = vld [vmem:[#allocation10_spill] sm:$0xff] }
 0x2c6   : > { %10605 = vst [vmem:[#allocation22_spill] sm:$0xff] %v9887_v45  ;;  %v7403_v4 = vpop.eup %7402  ;;  %7420 = vpow2.f32 %v4503_v40  ;;  %v4040_v63 = vmul.f32 %v8272_v13, %v3737_v46  ;;  %v3277_v35 = vmax.f32 %v3021_v50, 1e-06  ;;  %v4611_v49 = vadd.s32 1152, %v10606_v25 }
 0x2c7   : > { %7422 = vpow2.f32 %v4509_v39  ;;  %v4443_v55 = vmul.f32 1.442695, %v4009_v21  ;;  %v4007_v3 = vmul.f32 %v8272_v13, %v3671_v43  ;;  %v3677_v48 = vmul.f32 0.6931472, %v7403_v4  ;;  %v10610_v39 = vld [vmem:[#allocation19_spill] sm:$0xff]  ;;  %v9905_v43 = vpop.f32.mrb[53].mxu1 }
 0x2c8   : > { %v9893_v36 = vpop.eup %7404  ;;  %v4505_v44 = vmul.f32 1.442695, %v4040_v63  ;;  %7424 = vlog2.f32 %v3274_v28  ;;  %vm4628_vm3 = vcmp.ge.s32.totalorder %v4611_v49, %v10607_v0  ;;  %vm4646_vm4 = vcmp.lt.s32.totalorder %v4611_v49, %v10608_v32  ;;  %10611 = vst [vmem:[#allocation17_spill] sm:$0xff] %v9905_v43 }
 0x2c9   : > { %v7407_v16 = vpop.eup %7406  ;;  %7426 = vpow2.f32 %v4443_v55  ;;  %v4439_v12 = vmul.f32 1.442695, %v4007_v3  ;;  %v4010_v40 = vmul.f32 %v8272_v13, %v3677_v48  ;;  %vm4662_vm5 = vmand %vm4628_vm3, %vm4646_vm4  ;;  %v2512_v46 = vadd.f32 %v9582_v23, %v9620_v6  ;;  %v9912_v48 = vpop.f32.mrb[54].mxu1 }
 0x2ca   : > { %v9900_v50 = vpop.eup %7408  ;;  %7428 = vpow2.f32 %v4505_v44  ;;  %v3673_v4 = vmul.f32 0.6931472, %v7407_v16  ;;  %vm5801_vm6 = vmpackc.low %vm4662_vm5, %vm4662_vm5  ;;  %v2635_v28 = vadd.f32 %v9582_v23, %v10610_v39  ;;  %v4610_v21 = vadd.s32 1024, %v10606_v25  ;;  %10613 = vst [vmem:[#allocation18_spill] sm:$0xff] %v9912_v48 }
 0x2cb   : > { %10609 = vst [vmem:[#allocation24_spill] sm:$0xff] %v9900_v50  ;;  %v9907_v55 = vpop.eup %7410  ;;  %7430 = vpow2.f32 %v4439_v12  ;;  %v4445_v63 = vmul.f32 1.442695, %v4010_v40  ;;  %v10612_v49 = vmov 0.00390625|0.00390625   ;;  %v2988_v3 = vmax.f32 %v2512_v46, 0.0 }
 0x2cc   : > { %5802 = vmatprep.mubr.msk.bf16.mxu1 %vm5801_vm6, %v10612_v49  ;;  %v2504_v6 = vadd.f32 %v9582_v23, %v9629_v59  ;;  %v9914_v44 = vpop.eup %7412  ;;  %v4008_v16 = vmul.f32 %v8272_v13, %v3673_v4  ;;  %7432 = vlog2.f32 %v3277_v35  ;;  %v3019_v39 = vmax.f32 %v2635_v28, 0.0 }
 0x2cd   : > { %vm4627_vm7 = vcmp.ge.s32.totalorder %v4610_v21, %v10607_v0  ;;  %v7415_v45 = vpop.eup %7414  ;;  %7434 = vpow2.f32 %v4445_v63  ;;  %v3244_v12 = vmax.f32 %v2988_v3, 1e-06  ;;  %vm4645_vm8 = vcmp.lt.s32.totalorder %v4610_v21, %v10608_v32  ;;  %v10615_v63 = vld [vmem:[#allocation20_spill] sm:$0xff]  ;;  %v9929_v3 = vpop.f32.mrb[55].mxu1 }
 0x2ce   : > { %v2986_v40 = vmax.f32 %v2504_v6, 0.0  ;;  %v9919_v46 = vpop.eup %7416  ;;  %v4441_v50 = vmul.f32 1.442695, %v4008_v16  ;;  %v3747_v59 = vmul.f32 0.6931472, %v7415_v45  ;;  %vm4661_vm9 = vmand %vm4627_vm7, %vm4645_vm8  ;;  %v2515_v48 = vadd.f32 %v9582_v23, %v9634_v10  ;;  %10616 = vst [vmem:[#allocation20_spill] sm:$0xff] %v9929_v3 }
 0x2cf   : > { %v3275_v43 = vmax.f32 %v3019_v39, 1e-06  ;;  %v9923_v4 = vpop.eup %7418  ;;  %7436 = vlog2.f32 %v3244_v12  ;;  %vm5803_vm10 = vmpackc.low %vm4661_vm9, %vm4661_vm9  ;;  %v2507_v28 = vadd.f32 %v9582_v23, %v9641_v38  ;;  %v2656_v21 = vadd.f32 %v9582_v23, %v10615_v63  ;;  %v9938_v16 = vld [vmem:[%s10508_s3] ss:$0 sm:$0xff]  ;;  %v9942_v12 = vpop.f32.mrb[56].mxu1 }
 0x2d0   : > { %10614 = vst [vmem:[#allocation19_spill] sm:$0xff] %v9923_v4  ;;  %v3242_v35 = vmax.f32 %v2986_v40, 1e-06  ;;  %v9931_v6 = vpop.eup %7420  ;;  %7438 = vpow2.f32 %v4441_v50  ;;  %v4045_v45 = vmul.f32 %v8272_v13, %v3747_v59  ;;  %5804 = vmatmul.mubr.msk.bf16.vlgmr.msra.gmra.mrb[76].mxu1 %vm5803_vm10, %v10612_v49  ;;  %v2989_v10 = vmax.f32 %v2515_v48, 0.0  ;;  %v10617_v39 = vld [vmem:[#allocation21_spill] sm:$0xff]  ;;  %v9948_v3 = vpop.f32.mrb[57].mxu1 }
 0x2d1   : > { %v2648_v38 = vadd.f32 %v9938_v16, %v10617_v39  ;;  %10618 = vst [vmem:[#allocation21_spill] sm:$0xff] %v9942_v12  ;;  %v9944_v23 = vpop.eup %7422  ;;  %7440 = vlog2.f32 %v3275_v43  ;;  %v2987_v40 = vmax.f32 %v2507_v28, 0.0  ;;  %v3024_v50 = vmax.f32 %v2656_v21, 0.0  ;;  %v10620_v63 = vld [vmem:[#allocation25_spill] sm:$0xff]  ;;  %v9950_v0 = vpop.f32.mrb[58].mxu1 }
 0x2d2   : > { %10619 = vst [vmem:[#allocation49_spill] sm:$0xff] %v9944_v23  ;;  %v2659_v59 = vadd.f32 %v9938_v16, %v10620_v63  ;;  %10621 = vst [vmem:[#allocation25_spill] sm:$0xff] %v9948_v3  ;;  %v7425_v48 = vpop.eup %7424  ;;  %v4515_v4 = vmul.f32 1.442695, %v4045_v45  ;;  %7442 = vlog2.f32 %v3242_v35  ;;  %v3245_v49 = vmax.f32 %v2989_v10, 1e-06 }
 0x2d3   : > { %v3022_v32 = vmax.f32 %v2648_v38, 0.0  ;;  %10622 = vst [vmem:[#allocation50_spill] sm:$0xff] %v9950_v0  ;;  %v9952_v39 = vpop.eup %7426  ;;  %v3743_v12 = vmul.f32 0.6931472, %v7425_v48  ;;  %v3243_v62 = vmax.f32 %v2987_v40, 1e-06  ;;  %v2528_v43 = vadd.f32 %v9938_v16, %v9663_v60 }
 0x2d4   : > { %v3280_v23 = vmax.f32 %v3024_v50, 1e-06  ;;  %v9956_v28 = vpop.eup %7428  ;;  %7444 = vpow2.f32 %v4515_v4  ;;  %v3025_v63 = vmax.f32 %v2659_v59, 0.0  ;;  %v10624_v3 = vld [vmem:[#allocation26_spill] sm:$0xff]  ;;  %v9960_v45 = vpop.f32.mrb[59].mxu1  ;;  %v2520_v50 = vadd.f32 %v9938_v16, %v9670_v1 }
 0x2d5   : > { %10623 = vst [vmem:[#allocation51_spill] sm:$0xff] %v9956_v28  ;;  %v3278_v21 = vmax.f32 %v3022_v32, 1e-06  ;;  %v2651_v35 = vadd.f32 %v9938_v16, %v10624_v3  ;;  %10625 = vst [vmem:[#allocation26_spill] sm:$0xff] %v9960_v45  ;;  %v9962_v10 = vpop.eup %7430  ;;  %v4043_v38 = vmul.f32 %v8272_v13, %v3743_v12  ;;  %7446 = vlog2.f32 %v3245_v49 }
 0x2d6   : > { %v2992_v40 = vmax.f32 %v2528_v43, 0.0  ;;  %v7433_v60 = vpop.eup %7432  ;;  %7448 = vlog2.f32 %v3243_v62  ;;  %v3281_v48 = vmax.f32 %v3025_v63, 1e-06  ;;  %v2531_v32 = vadd.f32 %v9938_v16, %v9679_v56  ;;  %v10626_v63 = vld [vmem:[#allocation28_spill] sm:$0xff] }
 0x2d7   : > { %v3023_v4 = vmax.f32 %v2651_v35, 0.0  ;;  %v9969_v59 = vpop.eup %7434  ;;  %v4511_v3 = vmul.f32 1.442695, %v4043_v38  ;;  %v3749_v45 = vmul.f32 0.6931472, %v7433_v60  ;;  %7450 = vlog2.f32 %v3280_v23 }
 0x2d8   : > { %v3248_v0 = vmax.f32 %v2992_v40, 1e-06  ;;  %7452 = vlog2.f32 %v3278_v21  ;;  %v2990_v49 = vmax.f32 %v2520_v50, 0.0  ;;  %v2993_v43 = vmax.f32 %v2531_v32, 0.0 }
 0x2d9   : > { %v3279_v12 = vmax.f32 %v3023_v4, 1e-06  ;;  %v7437_v25 = vpop.eup %7436  ;;  %7454 = vpow2.f32 %v4511_v3  ;;  %v4046_v1 = vmul.f32 %v8272_v13, %v3749_v45  ;;  %v2523_v62 = vadd.f32 %v9938_v16, %v9685_v41  ;;  %v10627_v41 = vld [vmem:[#allocation29_spill] sm:$0xff] }
 0x2da   : > { %v2672_v56 = vadd.f32 %v9938_v16, %v10626_v63  ;;  %v9976_v35 = vpop.eup %7438  ;;  %v3683_v38 = vmul.f32 0.6931472, %v7437_v25  ;;  %7456 = vlog2.f32 %v3281_v48  ;;  %v3246_v23 = vmax.f32 %v2990_v49, 1e-06 }
 0x2db   : > { %v3249_v40 = vmax.f32 %v2993_v43, 1e-06  ;;  %v7441_v21 = vpop.eup %7440  ;;  %v4517_v60 = vmul.f32 1.442695, %v4046_v1  ;;  %7458 = vlog2.f32 %v3248_v0  ;;  %v2991_v50 = vmax.f32 %v2523_v62, 0.0  ;;  %v9984_v1 = vpop.f32.mrb[60].mxu1 }
 0x2dc   : > { %v3028_v4 = vmax.f32 %v2672_v56, 0.0  ;;  %v7443_v32 = vpop.eup %7442  ;;  %v4013_v45 = vmul.f32 %v8272_v13, %v3683_v38  ;;  %v3745_v3 = vmul.f32 0.6931472, %v7441_v21  ;;  %7460 = vlog2.f32 %v3279_v12  ;;  %10629 = vst [vmem:[#allocation29_spill] sm:$0xff] %v9984_v1  ;;  %v10630_v12 = vld [vmem:[#allocation30_spill] sm:$0xff] }
 0x2dd   : > { %v2664_v27 = vadd.f32 %v9938_v16, %v10627_v41  ;;  %7462 = vpow2.f32 %v4517_v60  ;;  %v3679_v63 = vmul.f32 0.6931472, %v7443_v32  ;;  %v3247_v28 = vmax.f32 %v2991_v50, 1e-06  ;;  %v9991_v41 = vpop.f32.mrb[61].mxu1 }
 0x2de   : > { %v3284_v25 = vmax.f32 %v3028_v4, 1e-06  ;;  %v9981_v48 = vpop.eup %7444  ;;  %v4451_v49 = vmul.f32 1.442695, %v4013_v45  ;;  %v4044_v43 = vmul.f32 %v8272_v13, %v3745_v3  ;;  %7464 = vlog2.f32 %v3246_v23  ;;  %10631 = vst [vmem:[#allocation30_spill] sm:$0xff] %v9991_v41 }
 0x2df   : > { %10628 = vst [vmem:[#allocation28_spill] sm:$0xff] %v9981_v48  ;;  %v3026_v0 = vmax.f32 %v2664_v27, 0.0  ;;  %v7447_v62 = vpop.eup %7446  ;;  %v4011_v56 = vmul.f32 %v8272_v13, %v3679_v63  ;;  %7466 = vlog2.f32 %v3249_v40  ;;  %v2675_v38 = vadd.f32 %v9938_v16, %v10630_v12  ;;  %v5989_v48 = vpop.f32.mrb[62].mxu1 }
 0x2e0   : > { %v2544_v21 = vadd.f32 %v9938_v16, %v9704_v8  ;;  %v7449_v60 = vpop.eup %7448  ;;  %7468 = vpow2.f32 %v4451_v49  ;;  %v4513_v50 = vmul.f32 1.442695, %v4044_v43  ;;  %v3685_v4 = vmul.f32 0.6931472, %v7447_v62  ;;  %v5990_v62 = vpop.f32.mrb[63].mxu1 }
 0x2e1   : > { %v3282_v32 = vmax.f32 %v3026_v0, 1e-06  ;;  %v7451_v45 = vpop.eup %7450  ;;  %v4447_v23 = vmul.f32 1.442695, %v4011_v56  ;;  %v3681_v27 = vmul.f32 0.6931472, %v7449_v60  ;;  %7470 = vlog2.f32 %v3247_v28 }
 0x2e2   : > { %v3029_v3 = vmax.f32 %v2675_v38, 0.0  ;;  %v7453_v63 = vpop.eup %7452  ;;  %7472 = vpow2.f32 %v4513_v50  ;;  %v4014_v40 = vmul.f32 %v8272_v13, %v3685_v4  ;;  %v3755_v12 = vmul.f32 0.6931472, %v7451_v45  ;;  %v9998_v50 = vpop.f32.mrb[64].mxu1  ;;  %v10634_v62 = vld [vmem:[#allocation31_spill] sm:$0xff] }
 0x2e3   : > { %v2996_v1 = vmax.f32 %v2544_v21, 0.0  ;;  %v9994_v8 = vpop.eup %7454  ;;  %7474 = vpow2.f32 %v4447_v23  ;;  %v4012_v49 = vmul.f32 %v8272_v13, %v3681_v27  ;;  %v3751_v43 = vmul.f32 0.6931472, %v7453_v63  ;;  %10632 = vst [vmem:[#allocation52_spill] sm:$0xff] %v9998_v50  ;;  %v10001_v23 = vpop.f32.mrb[65].mxu1 }
 0x2e4   : > { %v3285_v0 = vmax.f32 %v3029_v3, 1e-06  ;;  %v7457_v56 = vpop.eup %7456  ;;  %v4453_v28 = vmul.f32 1.442695, %v4014_v40  ;;  %v4049_v38 = vmul.f32 %v8272_v13, %v3755_v12  ;;  %7476 = vlog2.f32 %v3284_v25  ;;  %10633 = vst [vmem:[#allocation53_spill] sm:$0xff] %v10001_v23  ;;  %v6011_v12 = vpop.f32.mrb[66].mxu1 }
 0x2e5   : > { %v3252_v60 = vmax.f32 %v2996_v1, 1e-06  ;;  %v7459_v4 = vpop.eup %7458  ;;  %v4449_v45 = vmul.f32 1.442695, %v4012_v49  ;;  %v4047_v48 = vmul.f32 %v8272_v13, %v3751_v43  ;;  %v3757_v21 = vmul.f32 0.6931472, %v7457_v56 }
 0x2e6   : > { %7478 = vlog2.f32 %v3282_v32  ;;  %v7461_v27 = vpop.eup %7460  ;;  %v4523_v3 = vmul.f32 1.442695, %v4049_v38  ;;  %v3691_v63 = vmul.f32 0.6931472, %v7459_v4  ;;  %v2667_v40 = vadd.f32 %v9938_v16, %v10634_v62  ;;  %v6012_v43 = vpop.f32.mrb[67].mxu1 }
 0x2e7   : > { %7480 = vpow2.f32 %v4453_v28  ;;  %v10005_v25 = vpop.eup %7462  ;;  %v4519_v1 = vmul.f32 1.442695, %v4047_v48  ;;  %v4050_v49 = vmul.f32 %v8272_v13, %v3757_v21  ;;  %v3753_v50 = vmul.f32 0.6931472, %v7461_v27 }
 0x2e8   : > { %10635 = vst [vmem:[#allocation31_spill] sm:$0xff] %v10005_v25  ;;  %7482 = vpow2.f32 %v4449_v45  ;;  %v7465_v56 = vpop.eup %7464  ;;  %v4017_v32 = vmul.f32 %v8272_v13, %v3691_v63  ;;  %v3027_v23 = vmax.f32 %v2667_v40, 0.0  ;;  %v2536_v28 = vadd.f32 %v9938_v16, %v9708_v15  ;;  %v10643_v25 = vld [vmem:[#allocation37_spill] sm:$0xff] }
 0x2e9   : > { %7484 = vpow2.f32 %v4523_v3  ;;  %v7467_v38 = vpop.eup %7466  ;;  %v4525_v4 = vmul.f32 1.442695, %v4050_v49  ;;  %v4048_v62 = vmul.f32 %v8272_v13, %v3753_v50  ;;  %v3687_v12 = vmul.f32 0.6931472, %v7465_v56 }
 0x2ea   : > { %7486 = vpow2.f32 %v4519_v1  ;;  %v10012_v45 = vpop.eup %7468  ;;  %v4459_v48 = vmul.f32 1.442695, %v4017_v32  ;;  %v3693_v21 = vmul.f32 0.6931472, %v7467_v38  ;;  %v3283_v27 = vmax.f32 %v3027_v23, 1e-06 }
 0x2eb   : > { %7488 = vlog2.f32 %v3285_v0  ;;  %v7471_v43 = vpop.eup %7470  ;;  %v4521_v3 = vmul.f32 1.442695, %v4048_v62  ;;  %v4015_v63 = vmul.f32 %v8272_v13, %v3687_v12  ;;  %v2994_v40 = vmax.f32 %v2536_v28, 0.0 }
 0x2ec   : > { %7490 = vpow2.f32 %v4525_v4  ;;  %v10015_v41 = vpop.eup %7472  ;;  %v4018_v15 = vmul.f32 %v8272_v13, %v3693_v21  ;;  %v3689_v1 = vmul.f32 0.6931472, %v7471_v43  ;;  %v2547_v50 = vadd.f32 %v9938_v16, %v9714_v34  ;;  %v10637_v21 = vld [vmem:[#allocation32_spill] sm:$0xff] }
 0x2ed   : > { %10636 = vst [vmem:[#allocation54_spill] sm:$0xff] %v10015_v41  ;;  %7492 = vpow2.f32 %v4459_v48  ;;  %v10020_v49 = vpop.eup %7474  ;;  %v4455_v0 = vmul.f32 1.442695, %v4015_v63  ;;  %v3250_v23 = vmax.f32 %v2994_v40, 1e-06  ;;  %v2539_v56 = vadd.f32 %v9938_v16, %v9720_v42 }
 0x2ee   : > { %7494 = vpow2.f32 %v4521_v3  ;;  %v7477_v32 = vpop.eup %7476  ;;  %v4461_v38 = vmul.f32 1.442695, %v4018_v15  ;;  %v4016_v28 = vmul.f32 %v8272_v13, %v3689_v1  ;;  %v2997_v4 = vmax.f32 %v2547_v50, 0.0 }
 0x2ef   : > { %7496 = vlog2.f32 %v3252_v60  ;;  %v3763_v12 = vmul.f32 0.6931472, %v7477_v32  ;;  %v2995_v48 = vmax.f32 %v2539_v56, 0.0  ;;  %v2688_v34 = vadd.f32 %v9938_v16, %v10637_v21  ;;  %v10639_v56 = vld [vmem:[#allocation33_spill] sm:$0xff]  ;;  %v10640_v21 = vld [vmem:[#allocation35_spill] sm:$0xff] }
 0x2f0   : > { %v7479_v62 = vpop.eup %7478  ;;  %7498 = vpow2.f32 %v4455_v0  ;;  %v4457_v3 = vmul.f32 1.442695, %v4016_v28  ;;  %v3253_v40 = vmax.f32 %v2997_v4, 1e-06  ;;  %v2680_v32 = vadd.f32 %v9938_v16, %v10639_v56 }
 0x2f1   : > { %v10027_v43 = vpop.eup %7480  ;;  %7500 = vpow2.f32 %v4461_v38  ;;  %v3759_v63 = vmul.f32 0.6931472, %v7479_v62  ;;  %v4053_v15 = vmul.f32 %v8272_v13, %v3763_v12  ;;  %v3251_v60 = vmax.f32 %v2995_v48, 1e-06 }
 0x2f2   : > { %v10029_v42 = vpop.eup %7482  ;;  %7502 = vlog2.f32 %v3283_v27  ;;  %v3032_v1 = vmax.f32 %v2688_v34, 0.0  ;;  %v2691_v38 = vadd.f32 %v9938_v16, %v10640_v21  ;;  %v2560_v27 = vadd.f32 %v9938_v16, %v9736_v33 }
 0x2f3   : > { %v10032_v50 = vpop.eup %7484  ;;  %7504 = vpow2.f32 %v4457_v3  ;;  %v4051_v0 = vmul.f32 %v8272_v13, %v3759_v63  ;;  %v4531_v4 = vmul.f32 1.442695, %v4053_v15  ;;  %v3030_v34 = vmax.f32 %v2680_v32, 0.0 }
 0x2f4   : > { %10638 = vst [vmem:[#allocation32_spill] sm:$0xff] %v10032_v50  ;;  %v10039_v28 = vpop.eup %7486  ;;  %7506 = vlog2.f32 %v3250_v23  ;;  %v3288_v62 = vmax.f32 %v3032_v1, 1e-06  ;;  %v3033_v3 = vmax.f32 %v2691_v38, 0.0  ;;  %v3000_v50 = vmax.f32 %v2560_v27, 0.0 }
 0x2f5   : > { %10641 = vst [vmem:[#allocation33_spill] sm:$0xff] %v10039_v28  ;;  %v7489_v12 = vpop.eup %7488  ;;  %v4527_v48 = vmul.f32 1.442695, %v4051_v0  ;;  %7508 = vlog2.f32 %v3253_v40  ;;  %v2683_v21 = vadd.f32 %v9938_v16, %v10643_v25  ;;  %v3286_v23 = vmax.f32 %v3030_v34, 1e-06 }
 0x2f6   : > { %v10043_v63 = vpop.eup %7490  ;;  %7510 = vpow2.f32 %v4531_v4  ;;  %v3765_v56 = vmul.f32 0.6931472, %v7489_v12  ;;  %v3289_v15 = vmax.f32 %v3033_v3, 1e-06  ;;  %v2552_v33 = vadd.f32 %v9938_v16, %v9739_v7 }
 0x2f7   : > { %10642 = vst [vmem:[#allocation35_spill] sm:$0xff] %v10043_v63  ;;  %v10047_v28 = vpop.eup %7492  ;;  %7512 = vpow2.f32 %v4527_v48  ;;  %v3256_v0 = vmax.f32 %v3000_v50, 1e-06  ;;  %v3031_v32 = vmax.f32 %v2683_v21, 0.0  ;;  %v2563_v25 = vadd.f32 %v9938_v16, %v9743_v61 }
 0x2f8   : > { %v10051_v1 = vpop.eup %7494  ;;  %v4054_v40 = vmul.f32 %v8272_v13, %v3765_v56  ;;  %7514 = vlog2.f32 %v3251_v60  ;;  %v2998_v4 = vmax.f32 %v2552_v33, 0.0  ;;  %v2555_v27 = vadd.f32 %v9938_v16, %v9746_v26  ;;  %v10645_v26 = vld [vmem:[#allocation38_spill] sm:$0xff] }
 0x2f9   : > { %10644 = vst [vmem:[#allocation37_spill] sm:$0xff] %v10051_v1  ;;  %v7497_v38 = vpop.eup %7496  ;;  %7516 = vlog2.f32 %v3288_v62  ;;  %v3287_v34 = vmax.f32 %v3031_v32, 1e-06  ;;  %v3001_v50 = vmax.f32 %v2563_v25, 0.0  ;;  %v2704_v61 = vadd.f32 %v9938_v16, %v9622_v51  ;;  %v10646_v51 = vld [vmem:[#allocation39_spill] sm:$0xff] }
 0x2fa   : > { %v10058_v12 = vpop.eup %7498  ;;  %v4533_v48 = vmul.f32 1.442695, %v4054_v40  ;;  %v3699_v7 = vmul.f32 0.6931472, %v7497_v38  ;;  %7518 = vlog2.f32 %v3286_v23  ;;  %v3254_v60 = vmax.f32 %v2998_v4, 1e-06 }
 0x2fb   : > { %v10060_v3 = vpop.eup %7500  ;;  %7520 = vlog2.f32 %v3289_v15  ;;  %v2999_v56 = vmax.f32 %v2555_v27, 0.0  ;;  %v2696_v33 = vadd.f32 %v9938_v16, %v10645_v26  ;;  %v3257_v32 = vmax.f32 %v3001_v50, 1e-06 }
 0x2fc   : > { %v7503_v62 = vpop.eup %7502  ;;  %7522 = vpow2.f32 %v4533_v48  ;;  %v4021_v21 = vmul.f32 %v8272_v13, %v3699_v7  ;;  %v3036_v25 = vmax.f32 %v2704_v61, 0.0  ;;  %v2707_v1 = vadd.f32 %v9938_v16, %v10646_v51 }
 0x2fd   : > { %v10067_v40 = vpop.eup %7504  ;;  %v3761_v23 = vmul.f32 0.6931472, %v7503_v62  ;;  %7524 = vlog2.f32 %v3256_v0  ;;  %v3255_v38 = vmax.f32 %v2999_v56, 1e-06  ;;  %v3034_v27 = vmax.f32 %v2696_v33, 0.0 }
 0x2fe   : > { %v7507_v15 = vpop.eup %7506  ;;  %v4467_v4 = vmul.f32 1.442695, %v4021_v21  ;;  %7526 = vlog2.f32 %v3287_v34  ;;  %v3292_v0 = vmax.f32 %v3036_v25, 1e-06  ;;  %v3037_v61 = vmax.f32 %v2707_v1, 0.0 }
 0x2ff   : > { %v7509_v48 = vpop.eup %7508  ;;  %v4052_v7 = vmul.f32 %v8272_v13, %v3761_v23  ;;  %v3695_v63 = vmul.f32 0.6931472, %v7507_v15  ;;  %7528 = vlog2.f32 %v3254_v60  ;;  %v3290_v50 = vmax.f32 %v3034_v27, 1e-06  ;;  %v10649_v60 = vld [vmem:[#allocation40_spill] sm:$0xff] }
 0x300   : > { %v10072_v26 = vpop.eup %7510  ;;  %7530 = vpow2.f32 %v4467_v4  ;;  %v3701_v62 = vmul.f32 0.6931472, %v7509_v48  ;;  %v2699_v15 = vadd.f32 %v9938_v16, %v10649_v60  ;;  %v4789_v4 = vpack.c.bf16 %v9976_v35, %v9962_v10  ;;  %v10650_v60 = vld [vmem:[#allocation12_spill] sm:$0xff] }
 0x301   : > { %10647 = vst [vmem:[#allocation38_spill] sm:$0xff] %v10072_v26  ;;  %v10074_v56 = vpop.eup %7512  ;;  %v4529_v21 = vmul.f32 1.442695, %v4052_v7  ;;  %v4019_v34 = vmul.f32 %v8272_v13, %v3695_v63  ;;  %7532 = vlog2.f32 %v3257_v32  ;;  %v3293_v51 = vmax.f32 %v3037_v61, 1e-06 }
 0x302   : > { %10648 = vst [vmem:[#allocation39_spill] sm:$0xff] %v10074_v56  ;;  %v7515_v33 = vpop.eup %7514  ;;  %v4022_v23 = vmul.f32 %v8272_v13, %v3701_v62  ;;  %7534 = vlog2.f32 %v3255_v38  ;;  %v3035_v1 = vmax.f32 %v2699_v15, 0.0  ;;  %6080 = vmatprep.subr.bf16.mxu1 %v4789_v4  ;;  %v10651_v56 = vld [vmem:[#allocation42_spill] sm:$0xff] }
 0x303   : > { %v7517_v48 = vpop.eup %7516  ;;  %7536 = vpow2.f32 %v4529_v21  ;;  %v4463_v25 = vmul.f32 1.442695, %v4019_v34  ;;  %v3697_v27 = vmul.f32 0.6931472, %v7515_v33  ;;  %v4781_v41 = vpack.c.bf16 %v10651_v56, %v10650_v60 }
 0x304   : > { %v7519_v7 = vpop.eup %7518  ;;  %v4469_v26 = vmul.f32 1.442695, %v4022_v23  ;;  %v3771_v63 = vmul.f32 0.6931472, %v7517_v48  ;;  %7538 = vlog2.f32 %v3292_v0  ;;  %v3291_v34 = vmax.f32 %v3035_v1, 1e-06 }
 0x305   : > { %v7521_v32 = vpop.eup %7520  ;;  %7540 = vpow2.f32 %v4463_v25  ;;  %v4020_v38 = vmul.f32 %v8272_v13, %v3697_v27  ;;  %v3767_v62 = vmul.f32 0.6931472, %v7519_v7  ;;  %6081 = vmatpush3.bf16.msra.mxu1 %v4781_v41  ;;  %v4790_v23 = vpack.c.bf16 %v9969_v59, %v9952_v39  ;;  %v10652_v7 = vld [vmem:[#allocation14_spill] sm:$0xff] }
 0x306   : > { %v10085_v10 = vpop.eup %7522  ;;  %7542 = vpow2.f32 %v4469_v26  ;;  %v4057_v35 = vmul.f32 %v8272_v13, %v3771_v63  ;;  %v3773_v21 = vmul.f32 0.6931472, %v7521_v32  ;;  %v2720_v63 = vadd.f32 %v9938_v16, %v10652_v7 }
 0x307   : > { %v7525_v61 = vpop.eup %7524  ;;  %v4465_v33 = vmul.f32 1.442695, %v4020_v38  ;;  %v4055_v0 = vmul.f32 %v8272_v13, %v3767_v62  ;;  %7544 = vlog2.f32 %v3290_v50  ;;  %6082 = vmatprep.subr.bf16.mxu1 %v4790_v23  ;;  %v10653_v38 = vld [vmem:[#allocation11_spill] sm:$0xff]  ;;  %v10654_v62 = vld [vmem:[#allocation41_spill] sm:$0xff] }
 0x308   : > { %v7527_v15 = vpop.eup %7526  ;;  %v4539_v4 = vmul.f32 1.442695, %v4057_v35  ;;  %v4058_v56 = vmul.f32 %v8272_v13, %v3773_v21  ;;  %v3707_v48 = vmul.f32 0.6931472, %v7525_v61  ;;  %7546 = vlog2.f32 %v3293_v51 }
 0x309   : > { %v7529_v26 = vpop.eup %7528  ;;  %7548 = vpow2.f32 %v4465_v33  ;;  %v4535_v25 = vmul.f32 1.442695, %v4055_v0  ;;  %v3769_v27 = vmul.f32 0.6931472, %v7527_v15  ;;  %v3040_v51 = vmax.f32 %v2720_v63, 0.0 }
 0x30a   : > { %v10094_v1 = vpop.eup %7530  ;;  %7550 = vpow2.f32 %v4539_v4  ;;  %v4541_v41 = vmul.f32 1.442695, %v4058_v56  ;;  %v4025_v39 = vmul.f32 %v8272_v13, %v3707_v48  ;;  %v3703_v59 = vmul.f32 0.6931472, %v7529_v26 }
 0x30b   : > { %v7533_v50 = vpop.eup %7532  ;;  %7552 = vpow2.f32 %v4535_v25  ;;  %v4056_v32 = vmul.f32 %v8272_v13, %v3769_v27  ;;  %v4782_v60 = vpack.c.bf16 %v10654_v62, %v10653_v38  ;;  %v3296_v4 = vmax.f32 %v3040_v51, 1e-06 }
 0x30c   : > { %v7535_v35 = vpop.eup %7534  ;;  %7554 = vpow2.f32 %v4541_v41  ;;  %v4475_v21 = vmul.f32 1.442695, %v4025_v39  ;;  %v4023_v61 = vmul.f32 %v8272_v13, %v3703_v59  ;;  %v3709_v33 = vmul.f32 0.6931472, %v7533_v50 }
 0x30d   : > { %v10101_v0 = vpop.eup %7536  ;;  %v4537_v23 = vmul.f32 1.442695, %v4056_v32  ;;  %v3705_v15 = vmul.f32 0.6931472, %v7535_v35  ;;  %7556 = vlog2.f32 %v3291_v34  ;;  %6083 = vmatpush3.bf16.msra.mxu1 %v4782_v60  ;;  %v2712_v25 = vadd.f32 %v9938_v16, %v9759_v17 }
 0x30e   : > { %v7539_v56 = vpop.eup %7538  ;;  %7558 = vpow2.f32 %v4475_v21  ;;  %v4471_v48 = vmul.f32 1.442695, %v4023_v61  ;;  %v4026_v26 = vmul.f32 %v8272_v13, %v3709_v33  ;;  %v2723_v41 = vadd.f32 %v9938_v16, %v9767_v9 }
 0x30f   : > { %v10106_v27 = vpop.eup %7540  ;;  %7560 = vpow2.f32 %v4537_v23  ;;  %v4024_v7 = vmul.f32 %v8272_v13, %v3705_v15  ;;  %v3779_v63 = vmul.f32 0.6931472, %v7539_v56  ;;  %v3038_v59 = vmax.f32 %v2712_v25, 0.0 }
 0x310   : > { %v10111_v34 = vpop.eup %7542  ;;  %7562 = vpow2.f32 %v4471_v48  ;;  %v4477_v39 = vmul.f32 1.442695, %v4026_v26  ;;  %v2715_v50 = vadd.f32 %v9938_v16, %v9772_v20  ;;  %v3041_v38 = vmax.f32 %v2723_v41, 0.0 }
 0x311   : > { %v7545_v32 = vpop.eup %7544  ;;  %v4473_v51 = vmul.f32 1.442695, %v4024_v7  ;;  %v4061_v17 = vmul.f32 %v8272_v13, %v3779_v63  ;;  %7564 = vlog2.f32 %v3296_v4  ;;  %v3294_v35 = vmax.f32 %v3038_v59, 1e-06  ;;  %v10123_v48 = vpop.f32.mrb[68].mxu1 }
 0x312   : > { %v7547_v62 = vpop.eup %7546  ;;  %7566 = vpow2.f32 %v4477_v39  ;;  %v3775_v60 = vmul.f32 0.6931472, %v7545_v32  ;;  %v3039_v21 = vmax.f32 %v2715_v50, 0.0  ;;  %v3297_v23 = vmax.f32 %v3041_v38, 1e-06  ;;  %v10132_v41 = vpop.f32.mrb[69].mxu1 }
 0x313   : > { %v10116_v9 = vpop.eup %7548  ;;  %7568 = vpow2.f32 %v4473_v51  ;;  %v4547_v61 = vmul.f32 1.442695, %v4061_v17  ;;  %v3781_v33 = vmul.f32 0.6931472, %v7547_v62  ;;  %v4791_v4 = vpack.c.bf16 %v10029_v42, %v10020_v49  ;;  %v6033_v50 = vpop.f32.mrb[70].mxu1 }
 0x314   : > { %v10118_v15 = vpop.eup %7550  ;;  %v4059_v20 = vmul.f32 %v8272_v13, %v3775_v60  ;;  %7570 = vlog2.f32 %v3294_v35  ;;  %v3295_v56 = vmax.f32 %v3039_v21, 1e-06  ;;  %v4783_v7 = vpack.c.bf16 %v9795_v47, %v9784_v18 }
 0x315   : > { %v10125_v26 = vpop.eup %7552  ;;  %7572 = vpow2.f32 %v4547_v61  ;;  %v4062_v25 = vmul.f32 %v8272_v13, %v3781_v33  ;;  %v4792_v63 = vpack.c.bf16 %v10027_v43, %v10012_v45  ;;  %6084 = vmatprep.subr.bf16.mxu1 %v4791_v4  ;;  %v2736_v49 = vadd.f32 %v9938_v16, %v9777_v31  ;;  %v6034_v45 = vpop.f32.mrb[71].mxu1 }
 0x316   : > { %v10134_v39 = vpop.eup %7554  ;;  %v4543_v59 = vmul.f32 1.442695, %v4059_v20  ;;  %7574 = vlog2.f32 %v3297_v23  ;;  %v4784_v42 = vpack.c.bf16 %v9789_v57, %v9770_v14  ;;  %6085 = vmatpush3.bf16.msra.mxu1 %v4783_v7  ;;  %v2728_v18 = vadd.f32 %v9938_v16, %v9799_v24 }
 0x317   : > { %v7557_v32 = vpop.eup %7556  ;;  %v4549_v51 = vmul.f32 1.442695, %v4062_v25  ;;  %7576 = vlog2.f32 %v3295_v56  ;;  %v2739_v47 = vadd.f32 %v9938_v16, %v9807_v19  ;;  %6086 = vmatprep.subr.bf16.mxu1 %v4792_v63  ;;  %v3044_v31 = vmax.f32 %v2736_v49, 0.0 }
 0x318   : > { %v10144_v43 = vpop.eup %7558  ;;  %7578 = vpow2.f32 %v4543_v59  ;;  %v3777_v17 = vmul.f32 0.6931472, %v7557_v32  ;;  %v2731_v14 = vadd.f32 %v9938_v16, %v9817_v29  ;;  %v3042_v38 = vmax.f32 %v2728_v18, 0.0 }
 0x319   : > { %v10148_v57 = vpop.eup %7560  ;;  %7580 = vpow2.f32 %v4549_v51  ;;  %v3045_v62 = vmax.f32 %v2739_v47, 0.0  ;;  %v4793_v24 = vpack.c.bf16 %v10067_v40, %v10058_v12  ;;  %v3300_v35 = vmax.f32 %v3044_v31, 1e-06 }
 0x31a   : > { %v10152_v60 = vpop.eup %7562  ;;  %v4060_v19 = vmul.f32 %v8272_v13, %v3777_v17  ;;  %v3043_v21 = vmax.f32 %v2731_v14, 0.0  ;;  %v4785_v61 = vpack.c.bf16 %v9846_v11, %v9833_v54  ;;  %6087 = vmatpush3.bf16.msra.mxu1 %v4784_v42  ;;  %v3298_v29 = vmax.f32 %v3042_v38, 1e-06 }
 0x31b   : > { %v7565_v33 = vpop.eup %7564  ;;  %v3301_v23 = vmax.f32 %v3045_v62, 1e-06  ;;  %v4794_v20 = vpack.c.bf16 %v10060_v3, %v10047_v28  ;;  %v2752_v56 = vadd.f32 %v9938_v16, %v9823_v58  ;;  %7582 = vlog2.f32 %v3300_v35  ;;  %6088 = vmatprep.subr.bf16.mxu1 %v4793_v24 }
 0x31c   : > { %v10161_v12 = vpop.eup %7566  ;;  %v4545_v40 = vmul.f32 1.442695, %v4060_v19  ;;  %v3787_v4 = vmul.f32 0.6931472, %v7565_v33  ;;  %v3299_v25 = vmax.f32 %v3043_v21, 1e-06  ;;  %7584 = vlog2.f32 %v3298_v29 }
 0x31d   : > { %v10163_v7 = vpop.eup %7568  ;;  %v3048_v54 = vmax.f32 %v2752_v56, 0.0  ;;  %v4786_v11 = vpack.c.bf16 %v9844_v5, %v9825_v53  ;;  %v2744_v28 = vadd.f32 %v9938_v16, %v9831_v22  ;;  %v2755_v63 = vadd.f32 %v9938_v16, %v9840_v52 }
 0x31e   : > { %v7571_v3 = vpop.eup %7570  ;;  %7586 = vpow2.f32 %v4545_v40  ;;  %v4065_v58 = vmul.f32 %v8272_v13, %v3787_v4  ;;  %v2747_v59 = vadd.f32 %v9938_v16, %v9842_v30  ;;  %6089 = vmatpush3.bf16.msra.mxu1 %v4785_v61  ;;  %v4795_v19 = vpack.c.bf16 %v10116_v9, %v10106_v27  ;;  %v10656_v40 = vld [vmem:[#allocation27_spill] sm:$0xff] }
 0x31f   : > { %v10174_v49 = vpop.eup %7572  ;;  %v3783_v42 = vmul.f32 0.6931472, %v7571_v3  ;;  %7588 = vlog2.f32 %v3301_v23  ;;  %v3304_v50 = vmax.f32 %v3048_v54, 1e-06  ;;  %v3046_v53 = vmax.f32 %v2744_v28, 0.0  ;;  %6090 = vmatprep.subr.bf16.mxu1 %v4794_v20  ;;  %v10658_v3 = vld [vmem:[#allocation34_spill] sm:$0xff] }
 0x320   : > { %v7575_v5 = vpop.eup %7574  ;;  %v4555_v32 = vmul.f32 1.442695, %v4065_v58  ;;  %7590 = vlog2.f32 %v3299_v25  ;;  %v3049_v22 = vmax.f32 %v2755_v63, 0.0  ;;  %v3047_v51 = vmax.f32 %v2747_v59, 0.0  ;;  %v10657_v25 = vld [vmem:[#allocation8_spill] sm:$0xff] }
 0x321   : > { %v7577_v18 = vpop.eup %7576  ;;  %v4063_v47 = vmul.f32 %v8272_v13, %v3783_v42  ;;  %v3789_v52 = vmul.f32 0.6931472, %v7575_v5  ;;  %7592 = vlog2.f32 %v3304_v50  ;;  %v3302_v45 = vmax.f32 %v3046_v53, 1e-06  ;;  %v10659_v53 = vld [vmem:[#allocation9_spill] sm:$0xff] }
 0x322   : > { %v10177_v30 = vpop.eup %7578  ;;  %7594 = vpow2.f32 %v4555_v32  ;;  %v3785_v17 = vmul.f32 0.6931472, %v7577_v18  ;;  %v3305_v31 = vmax.f32 %v3049_v22, 1e-06  ;;  %v3303_v14 = vmax.f32 %v3047_v51, 1e-06  ;;  %6091 = vmatpush3.bf16.msra.mxu1 %v4786_v11 }
 0x323   : > { %v10179_v38 = vpop.eup %7580  ;;  %v4551_v62 = vmul.f32 1.442695, %v4063_v47  ;;  %v4066_v24 = vmul.f32 %v8272_v13, %v3789_v52  ;;  %7596 = vlog2.f32 %v3302_v45  ;;  %v4787_v21 = vpack.c.bf16 %v9919_v46, %v9907_v55  ;;  %6092 = vmatprep.subr.bf16.mxu1 %v4795_v19  ;;  %v10655_v55 = vld [vmem:[#allocation51_spill] sm:$0xff] }
 0x324   : > { %v4064_v35 = vmul.f32 %v8272_v13, %v3785_v17  ;;  %7598 = vlog2.f32 %v3305_v31  ;;  %v4796_v61 = vpack.c.bf16 %v10111_v34, %v10094_v1  ;;  %v2768_v29 = vadd.f32 %v9938_v16, %v9852_v2  ;;  %v10660_v31 = vld [vmem:[#allocation10_spill] sm:$0xff] }
 0x325   : > { %7600 = vpow2.f32 %v4551_v62  ;;  %v4557_v33 = vmul.f32 1.442695, %v4066_v24  ;;  %v4788_v23 = vpack.c.bf16 %v9914_v44, %v9893_v36  ;;  %v7583_v20 = vpop.eup %7582  ;;  %v2760_v9 = vadd.f32 %v9938_v16, %v9866_v37 }
 0x326   : > { %v4553_v27 = vmul.f32 1.442695, %v4064_v35  ;;  %7602 = vlog2.f32 %v3303_v14  ;;  %v4805_v46 = vpack.c.bf16 %v10655_v55, %v9931_v6  ;;  %v7585_v56 = vpop.eup %7584  ;;  %v3795_v1 = vmul.f32 0.6931472, %v7583_v20  ;;  %6093 = vmatpush3.bf16.msra.mxu1 %v4787_v21 }
 0x327   : > { %7604 = vpow2.f32 %v4557_v33  ;;  %v3052_v34 = vmax.f32 %v2768_v29, 0.0  ;;  %v2771_v2 = vadd.f32 %v9938_v16, %v10656_v40  ;;  %v3791_v36 = vmul.f32 0.6931472, %v7585_v56  ;;  %6094 = vmatprep.subr.bf16.mxu1 %v4796_v61 }
 0x328   : > { %v10199_v4 = vpop.eup %7586  ;;  %7606 = vpow2.f32 %v4553_v27  ;;  %v3050_v44 = vmax.f32 %v2760_v9, 0.0  ;;  %v4613_v54 = vadd.s32 1408, %v10657_v25  ;;  %v4069_v11 = vmul.f32 %v8272_v13, %v3795_v1 }
 0x329   : > { %v7589_v37 = vpop.eup %7588  ;;  %v3308_v6 = vmax.f32 %v3052_v34, 1e-06  ;;  %v3053_v28 = vmax.f32 %v2771_v2, 0.0  ;;  %v2763_v58 = vadd.f32 %v9938_v16, %v10658_v3  ;;  %v4067_v59 = vmul.f32 %v8272_v13, %v3791_v36  ;;  %v10665_v3 = vld [vmem:[#allocation17_spill] sm:$0xff] }
 0x32a   : > { %v7591_v63 = vpop.eup %7590  ;;  %v3797_v42 = vmul.f32 0.6931472, %v7589_v37  ;;  %v3306_v50 = vmax.f32 %v3050_v44, 1e-06  ;;  %vm4630_vm11 = vcmp.ge.s32.totalorder %v4613_v54, %v10659_v53  ;;  %v4563_v32 = vmul.f32 1.442695, %v4069_v11  ;;  %6095 = vmatpush3.bf16.msra.mxu1 %v4788_v23 }
 0x32b   : > { %v7593_v5 = vpop.eup %7592  ;;  %v3793_v22 = vmul.f32 0.6931472, %v7591_v63  ;;  %7608 = vlog2.f32 %v3308_v6  ;;  %v3309_v51 = vmax.f32 %v3053_v28, 1e-06  ;;  %v4559_v47 = vmul.f32 1.442695, %v4067_v59  ;;  %6102 = vmatprep.subr.bf16.mxu1 %v4805_v46 }
 0x32c   : > { %v10207_v18 = vpop.eup %7594  ;;  %v4070_v52 = vmul.f32 %v8272_v13, %v3797_v42  ;;  %v3803_v45 = vmul.f32 0.6931472, %v7593_v5  ;;  %7610 = vlog2.f32 %v3306_v50  ;;  %vm4648_vm12 = vcmp.lt.s32.totalorder %v4613_v54, %v10660_v31  ;;  %v10662_v54 = vld [vmem:[#allocation19_spill] sm:$0xff]  ;;  %v10663_v37 = vld [vmem:[#allocation49_spill] sm:$0xff]  ;;  %v10666_v42 = vld [vmem:[#allocation54_spill] sm:$0xff] }
 0x32d   : > { %v7597_v16 = vpop.eup %7596  ;;  %7612 = vpow2.f32 %v4563_v32  ;;  %v4068_v17 = vmul.f32 %v8272_v13, %v3793_v22  ;;  %v3051_v14 = vmax.f32 %v2763_v58, 0.0  ;;  %vm4664_vm13 = vmand %vm4630_vm11, %vm4648_vm12  ;;  %v10661_v9 = vmov 0.00390625|0.00390625   ;;  %v10667_v5 = vld [vmem:[#allocation18_spill] sm:$0xff] }
 0x32e   : > { %v7599_v62 = vpop.eup %7598  ;;  %7614 = vpow2.f32 %v4559_v47  ;;  %v4565_v24 = vmul.f32 1.442695, %v4070_v52  ;;  %v4073_v19 = vmul.f32 %v8272_v13, %v3803_v45  ;;  %v3799_v35 = vmul.f32 0.6931472, %v7597_v16  ;;  %vm5805_vm14 = vmpackc.low %vm4664_vm13, %vm4664_vm13  ;;  %v10668_v45 = vld [vmem:[#allocation20_spill] sm:$0xff] }
 0x32f   : > { %v10215_v21 = vpop.eup %7600  ;;  %v4561_v61 = vmul.f32 1.442695, %v4068_v17  ;;  %v3805_v33 = vmul.f32 0.6931472, %v7599_v62  ;;  %7616 = vlog2.f32 %v3309_v51  ;;  %v3307_v29 = vmax.f32 %v3051_v14, 1e-06  ;;  %5806 = vmatprep.mubr.msk.bf16.mxu1 %vm5805_vm14, %v10661_v9 }
 0x330   : > { %v7603_v23 = vpop.eup %7602  ;;  %7618 = vpow2.f32 %v4565_v24  ;;  %v4571_v20 = vmul.f32 1.442695, %v4073_v19  ;;  %v4071_v27 = vmul.f32 %v8272_v13, %v3799_v35  ;;  %v4612_v55 = vadd.s32 1280, %v10657_v25  ;;  %v10669_v14 = vld [vmem:[#allocation43_spill] sm:$0xff]  ;;  %v10670_v62 = vld [vmem:[#allocation44_spill] sm:$0xff] }
 0x331   : > { %v10220_v46 = vpop.eup %7604  ;;  %7620 = vpow2.f32 %v4561_v61  ;;  %v4074_v56 = vmul.f32 %v8272_v13, %v3805_v33  ;;  %v3801_v1 = vmul.f32 0.6931472, %v7603_v23  ;;  %v4797_v34 = vpack.c.bf16 %v10163_v7, %v10152_v60  ;;  %v7687_v60 = vld [vmem:[%s10508_s3] ss:$0 sm:$0xff]  ;;  %v10664_v7 = vld [vmem:[#allocation16_spill] sm:$0xff] }
 0x332   : > { %v10225_v40 = vpop.eup %7606  ;;  %7622 = vpow2.f32 %v4571_v20  ;;  %v4567_v2 = vmul.f32 1.442695, %v4071_v27  ;;  %vm4629_vm15 = vcmp.ge.s32.totalorder %v4612_v55, %v10659_v53  ;;  %vm4647_vm0 = vcmp.lt.s32.totalorder %v4612_v55, %v10660_v31  ;;  %v10671_v27 = vld [vmem:[#allocation28_spill] sm:$0xff]  ;;  %v10672_v55 = vld [vmem:[#allocation31_spill] sm:$0xff] }
 0x333   : > { %v4573_v36 = vmul.f32 1.442695, %v4074_v56  ;;  %v4072_v44 = vmul.f32 %v8272_v13, %v3801_v1  ;;  %7624 = vlog2.f32 %v3307_v29  ;;  %vm4663_vm1 = vmand %vm4629_vm15, %vm4647_vm0  ;;  %v4806_v11 = vpack.c.bf16 %v10663_v37, %v10662_v54  ;;  %v10673_v1 = vld [vmem:[#allocation21_spill] sm:$0xff] }
 0x334   : > { %7626 = vpow2.f32 %v4567_v2  ;;  %vm5807_vm2 = vmpackc.low %vm4663_vm1, %vm4663_vm1  ;;  %v2784_v6 = vadd.f32 %v7687_v60, %v10664_v7  ;;  %v4798_v28 = vpack.c.bf16 %v10161_v12, %v10144_v43  ;;  %v2776_v58 = vadd.f32 %v7687_v60, %v10665_v3  ;;  %v10675_v3 = vld [vmem:[#allocation15_spill] sm:$0xff] }
 0x335   : > { %v7609_v63 = vpop.eup %7608  ;;  %7628 = vpow2.f32 %v4573_v36  ;;  %v4569_v59 = vmul.f32 1.442695, %v4072_v44  ;;  %5808 = vmatmul.mubr.msk.bf16.vlgmr.msra.gmra.mrb[80].mxu1 %vm5807_vm2, %v10661_v9  ;;  %v4807_v50 = vpack.c.bf16 %v10666_v42, %v9994_v8  ;;  %v2787_v32 = vadd.f32 %v7687_v60, %v10667_v5  ;;  %v10676_v5 = vld [vmem:[#allocation25_spill] sm:$0xff] }
 0x336   : > { %v7611_v22 = vpop.eup %7610  ;;  %v3811_v51 = vmul.f32 0.6931472, %v7609_v63  ;;  %6103 = vmatpush3.bf16.msra.mxu1 %v4797_v34  ;;  %v3056_v47 = vmax.f32 %v2784_v6, 0.0  ;;  %v3054_v52 = vmax.f32 %v2776_v58, 0.0  ;;  %v2779_v16 = vadd.f32 %v7687_v60, %v10668_v45  ;;  %v10674_v6 = vld [vmem:[#allocation13_spill] sm:$0xff]  ;;  %v10679_v45 = vld [vmem:[#allocation50_spill] sm:$0xff] }
 0x337   : > { %v10244_v43 = vpop.eup %7612  ;;  %7630 = vpow2.f32 %v4569_v59  ;;  %v3807_v12 = vmul.f32 0.6931472, %v7611_v22  ;;  %6104 = vmatprep.subr.bf16.mxu1 %v4806_v11  ;;  %v3057_v17 = vmax.f32 %v2787_v32, 0.0  ;;  %v4799_v24 = vpack.c.bf16 %v10670_v62, %v10669_v14  ;;  %v10261_v63 = vpop.f32.mrb[72].mxu1  ;;  %v10678_v22 = vld [vmem:[#allocation37_spill] sm:$0xff] }
 0x338   : > { %v10248_v19 = vpop.eup %7614  ;;  %v4077_v8 = vmul.f32 %v8272_v13, %v3811_v51  ;;  %v3312_v35 = vmax.f32 %v3056_v47, 1e-06  ;;  %v3310_v61 = vmax.f32 %v3054_v52, 1e-06  ;;  %v3055_v33 = vmax.f32 %v2779_v16, 0.0  ;;  %v10269_v47 = vpop.f32.mrb[73].mxu1 }
 0x339   : > { %v7617_v29 = vpop.eup %7616  ;;  %v4075_v23 = vmul.f32 %v8272_v13, %v3807_v12  ;;  %v3313_v20 = vmax.f32 %v3057_v17, 1e-06  ;;  %v4808_v56 = vpack.c.bf16 %v10672_v55, %v10671_v27  ;;  %v2800_v34 = vadd.f32 %v7687_v60, %v10673_v1  ;;  %v10680_v12 = vld [vmem:[#allocation26_spill] sm:$0xff]  ;;  %v6055_v14 = vpop.f32.mrb[74].mxu1  ;;  %v10682_v1 = vld [vmem:[#allocation48_spill] sm:$0xff] }
 0x33a   : > { %v10255_v2 = vpop.eup %7618  ;;  %v4579_v36 = vmul.f32 1.442695, %v4077_v8  ;;  %v3813_v44 = vmul.f32 0.6931472, %v7617_v29  ;;  %7632 = vlog2.f32 %v3312_v35  ;;  %6105 = vmatpush3.bf16.msra.mxu1 %v4798_v28  ;;  %v3311_v54 = vmax.f32 %v3055_v33, 1e-06 }
 0x33b   : > { %v10257_v37 = vpop.eup %7620  ;;  %v4575_v11 = vmul.f32 1.442695, %v4075_v23  ;;  %7634 = vlog2.f32 %v3310_v61  ;;  %6106 = vmatprep.subr.bf16.mxu1 %v4807_v50  ;;  %v3060_v7 = vmax.f32 %v2800_v34, 0.0  ;;  %v4800_v58 = vpack.c.bf16 %v10675_v3, %v10674_v6  ;;  %v10677_v28 = vld [vmem:[#allocation33_spill] sm:$0xff]  ;;  %v6056_v33 = vpop.f32.mrb[75].mxu1  ;;  %v10681_v55 = vld [vmem:[#allocation46_spill] sm:$0xff] }
 0x33c   : > { %v10263_v59 = vpop.eup %7622  ;;  %7636 = vpow2.f32 %v4579_v36  ;;  %v4078_v42 = vmul.f32 %v8272_v13, %v3813_v44  ;;  %v2792_v32 = vadd.f32 %v7687_v60, %v10676_v5  ;;  %v4809_v51 = vpack.c.bf16 %v10678_v22, %v10677_v28  ;;  %v10683_v44 = vld [vmem:[#allocation32_spill] sm:$0xff]  ;;  %v10685_v3 = vld [vmem:[#allocation45_spill] sm:$0xff]  ;;  %v10687_v5 = vld [vmem:[#allocation39_spill] sm:$0xff] }
 0x33d   : > { %v7625_v52 = vpop.eup %7624  ;;  %7638 = vpow2.f32 %v4575_v11  ;;  %v3316_v50 = vmax.f32 %v3060_v7, 1e-06  ;;  %v2803_v16 = vadd.f32 %v7687_v60, %v10679_v45  ;;  %v2795_v17 = vadd.f32 %v7687_v60, %v10680_v12  ;;  %v10684_v11 = vld [vmem:[#allocation35_spill] sm:$0xff]  ;;  %v10688_v28 = vld [vmem:[#allocation36_spill] sm:$0xff]  ;;  %v10690_v45 = vld [vmem:[#allocation38_spill] sm:$0xff] }
 0x33e   : > { %v10273_v62 = vpop.eup %7626  ;;  %v4581_v8 = vmul.f32 1.442695, %v4078_v42  ;;  %v3809_v35 = vmul.f32 0.6931472, %v7625_v52  ;;  %7640 = vlog2.f32 %v3313_v20  ;;  %6107 = vmatpush3.bf16.msra.mxu1 %v4799_v24  ;;  %v3058_v61 = vmax.f32 %v2792_v32, 0.0  ;;  %v10689_v22 = vld [vmem:[#allocation24_spill] sm:$0xff] }
 0x33f   : > { %v10275_v29 = vpop.eup %7628  ;;  %7642 = vlog2.f32 %v3311_v54  ;;  %6108 = vmatprep.subr.bf16.mxu1 %v4808_v56  ;;  %v3061_v23 = vmax.f32 %v2803_v16, 0.0  ;;  %v3059_v27 = vmax.f32 %v2795_v17, 0.0  ;;  %v4801_v34 = vpack.c.bf16 %v10682_v1, %v10681_v55  ;;  %v10686_v54 = vld [vmem:[#allocation47_spill] sm:$0xff]  ;;  %v10692_v12 = vld [vmem:[#allocation22_spill] sm:$0xff] }
 0x340   : > { %7644 = vpow2.f32 %v4581_v8  ;;  %v4076_v60 = vmul.f32 %v8272_v13, %v3809_v35  ;;  %v3314_v36 = vmax.f32 %v3058_v61, 1e-06  ;;  %v4810_v7 = vpack.c.bf16 %v10684_v11, %v10683_v44 }
 0x341   : > { %v10282_v20 = vpop.eup %7630  ;;  %7646 = vlog2.f32 %v3316_v50  ;;  %v3317_v24 = vmax.f32 %v3061_v23, 1e-06  ;;  %v3315_v6 = vmax.f32 %v3059_v27, 1e-06  ;;  %v4802_v56 = vpack.c.bf16 %v10686_v54, %v10685_v3  ;;  %v10691_v50 = vld [vmem:[#allocation23_spill] sm:$0xff] }
 0x342   : > { %v4577_v42 = vmul.f32 1.442695, %v4076_v60  ;;  %6109 = vmatpush3.bf16.msra.mxu1 %v4800_v58  ;;  %7648 = vlog2.f32 %v3314_v36  ;;  %v4811_v32 = vpack.c.bf16 %v10101_v0, %v10687_v5  ;;  %v4803_v52 = vpack.c.bf16 %v10689_v22, %v10688_v28 }
 0x343   : > { %6110 = vmatprep.subr.bf16.mxu1 %v4809_v51  ;;  %7650 = vlog2.f32 %v3317_v24  ;;  %v4812_v16 = vpack.c.bf16 %v10085_v10, %v10690_v45  ;;  %v4804_v17 = vpack.c.bf16 %v10692_v12, %v10691_v50  ;;  %v4821_v14 = vpack.c.bf16 %v10282_v20, %v10273_v62  ;;  %v10693_v24 = vld [vmem:[#allocation29_spill] sm:$0xff] }
 0x344   : > { %v7633_v8 = vpop.eup %7632  ;;  %7652 = vpow2.f32 %v4577_v42  ;;  %v4615_v58 = vadd.s32 1664, %v10657_v25  ;;  %v4614_v0 = vadd.s32 1536, %v10657_v25  ;;  %v4813_v35 = vpack.c.bf16 %v10148_v57, %v10125_v26  ;;  %v10696_v42 = vld [vmem:[#allocation53_spill] sm:$0xff] }
 0x345   : > { %v7635_v51 = vpop.eup %7634  ;;  %v3819_v61 = vmul.f32 0.6931472, %v7633_v8  ;;  %7654 = vlog2.f32 %v3315_v6  ;;  %v4822_v33 = vpack.c.bf16 %v10275_v29, %v10263_v59  ;;  %v4814_v23 = vpack.c.bf16 %v10134_v39, %v10118_v15  ;;  %v10694_v6 = vld [vmem:[#allocation30_spill] sm:$0xff] }
 0x346   : > { %v10304_v27 = vpop.eup %7636  ;;  %v3815_v55 = vmul.f32 0.6931472, %v7635_v51  ;;  %6111 = vmatpush3.bf16.msra.mxu1 %v4801_v34  ;;  %vm4632_vm3 = vcmp.ge.s32.totalorder %v4615_v58, %v10659_v53  ;;  %vm4650_vm4 = vcmp.lt.s32.totalorder %v4615_v58, %v10660_v31  ;;  %vm4631_vm6 = vcmp.ge.s32.totalorder %v4614_v0, %v10659_v53 }
 0x347   : > { %v10308_v1 = vpop.eup %7638  ;;  %v4081_v60 = vmul.f32 %v8272_v13, %v3819_v61  ;;  %6112 = vmatprep.subr.bf16.mxu1 %v4810_v7  ;;  %vm4666_vm5 = vmand %vm4632_vm3, %vm4650_vm4  ;;  %v5988_v3 = vadd.f32 %v10694_v6, %v10693_v24  ;;  %v10695_v7 = vld [vmem:[#allocation52_spill] sm:$0xff]  ;;  %vm4649_vm8 = vcmp.lt.s32.totalorder %v4614_v0, %v10660_v31  ;;  %v10699_v57 = vpack.c.bf16 %v10199_v4, %v10177_v30 }
 0x348   : > { %v7641_v11 = vpop.eup %7640  ;;  %v4079_v34 = vmul.f32 %v8272_v13, %v3815_v55  ;;  %vm5809_vm7 = vmpackc.low %vm4666_vm5, %vm4666_vm5  ;;  %v6010_v5 = vadd.f32 %v10696_v42, %v10695_v7  ;;  %v6032_v55 = vadd.f32 %v10132_v41, %v10123_v48  ;;  %v4820_v48 = vpack.c.bf16 %v10255_v2, %v10244_v43  ;;  %v6642_v43 = vld [vmem:[%s10509_s4 + $0x10] sm:$0xff]   ;;  %v6645_v2 = vld [vmem:[%s10509_s4 + $0x28] sm:$0xff]  }
 0x349   : > { %v7643_v8 = vpop.eup %7642  ;;  %v4587_v58 = vmul.f32 1.442695, %v4081_v60  ;;  %v3821_v51 = vmul.f32 0.6931472, %v7641_v11  ;;  %5810 = vmatprep.mubr.msk.bf16.mxu1 %vm5809_vm7, %v10661_v9  ;;  %vm10348_vm9 = vmand %vm4631_vm6, %vm4649_vm8  ;;  %v10701_v15 = vpack.c.bf16 %v10225_v40, %v10215_v21  ;;  %v4616_v39 = vadd.s32 1792, %v10657_v25 }
 0x34a   : > { %v10328_v44 = vpop.eup %7644  ;;  %v4583_v24 = vmul.f32 1.442695, %v4079_v34  ;;  %v3817_v6 = vmul.f32 0.6931472, %v7643_v8  ;;  %6113 = vmatpush3.bf16.msra.mxu1 %v4802_v56  ;;  %v4904_v54 = vadd.f32 %v6010_v5, %v5988_v3  ;;  %vm5811_vm11 = vmpackc.low %vm10348_vm9, %vm10348_vm9  ;;  %v10702_v30 = vpack.c.bf16 %v10220_v46, %v10207_v18  ;;  %v6640_v46 = vld [vmem:[%s10509_s4] sm:$0xff]  }
 0x34b   : > { %v7647_v42 = vpop.eup %7646  ;;  %v4082_v60 = vmul.f32 %v8272_v13, %v3821_v51  ;;  %6114 = vmatprep.subr.bf16.mxu1 %v4811_v32  ;;  %v4824_v11 = vpack.c.bf16 %v10328_v44, %v10304_v27  ;;  %7656 = vpow2.f32 %v4587_v58  ;;  %v4617_v32 = vadd.s32 1920, %v10657_v25 }
 0x34c   : > { %v7649_v41 = vpop.eup %7648  ;;  %v4080_v56 = vmul.f32 %v8272_v13, %v3817_v6  ;;  %v3827_v34 = vmul.f32 0.6931472, %v7647_v42  ;;  %v4944_v3 = vadd.f32 %v6032_v55, %v4904_v54  ;;  %7658 = vpow2.f32 %v4583_v24 }
 0x34d   : > { %v7651_v5 = vpop.eup %7650  ;;  %v4589_v8 = vmul.f32 1.442695, %v4082_v60  ;;  %v3823_v7 = vmul.f32 0.6931472, %v7649_v41  ;;  %v6054_v54 = vadd.f32 %v10269_v47, %v10261_v63  ;;  %vm4634_vm10 = vcmp.ge.s32.totalorder %v4617_v32, %v10659_v53 }
 0x34e   : > { %v7653_v51 = vpop.eup %7652  ;;  %v4585_v61 = vmul.f32 1.442695, %v4080_v56  ;;  %v4085_v36 = vmul.f32 %v8272_v13, %v3827_v34  ;;  %v3829_v27 = vmul.f32 0.6931472, %v7651_v5  ;;  %6115 = vmatpush3.bf16.msra.mxu1 %v4803_v52  ;;  %vm4652_vm12 = vcmp.lt.s32.totalorder %v4617_v32, %v10660_v31 }
 0x34f   : > { %v7655_v58 = vpop.eup %7654  ;;  %7660 = vpow2.f32 %v4589_v8  ;;  %v4083_v55 = vmul.f32 %v8272_v13, %v3823_v7  ;;  %6116 = vmatprep.subr.bf16.mxu1 %v4812_v16  ;;  %v4823_v28 = vpack.c.bf16 %v7653_v51, %v10308_v1  ;;  %vm4668_vm13 = vmand %vm4634_vm10, %vm4652_vm12  ;;  %v4984_v47 = vadd.f32 %v6054_v54, %v4944_v3 }
 0x350   : > { %7662 = vpow2.f32 %v4585_v61  ;;  %v4595_v22 = vmul.f32 1.442695, %v4085_v36  ;;  %v4086_v52 = vmul.f32 %v8272_v13, %v3829_v27  ;;  %v3825_v0 = vmul.f32 0.6931472, %v7655_v58  ;;  %vm5813_vm14 = vmpackc.low %vm4668_vm13, %vm4668_vm13 }
 0x351   : > { %v4591_v24 = vmul.f32 1.442695, %v4083_v55  ;;  %vm4633_vm15 = vcmp.ge.s32.totalorder %v4616_v39, %v10659_v53  ;;  %vm4651_vm0 = vcmp.lt.s32.totalorder %v4616_v39, %v10660_v31  ;;  %v7765_v40 = vmov 0.0  }
 0x352   : > { %7664 = vpow2.f32 %v4595_v22  ;;  %v4597_v63 = vmul.f32 1.442695, %v4086_v52  ;;  %v4084_v10 = vmul.f32 %v8272_v13, %v3825_v0  ;;  %6117 = vmatpush3.bf16.msra.mxu1 %v4804_v17  ;;  %vm4667_vm1 = vmand %vm4633_vm15, %vm4651_vm0  ;;  %vm7766_vm3 = vmmov 0  }
 0x353   : > { %7666 = vpow2.f32 %v4591_v24  ;;  %6124 = vmatprep.subr.bf16.mxu1 %v4821_v14  ;;  %vm5815_vm2 = vmpackc.low %vm4667_vm1, %vm4667_vm1  ;;  %v5817_v24 = vld [vmem:[%s10510_s5] ss:$0 sm:$0xff] }
 0x354   : > { %7668 = vpow2.f32 %v4597_v63  ;;  %v4593_v45 = vmul.f32 1.442695, %v4084_v10 }
 0x355   : > { %5812 = vmatmul.mubr.msk.bf16.vlgmr.msra.gmra.mrb[84].mxu1 %vm5811_vm11, %v10661_v9  ;;  %v7657_v16 = vpop.eup %7656 }
 0x356   : > { %7670 = vpow2.f32 %v4593_v45  ;;  %6125 = vmatpush3.bf16.msra.mxu1 %v4813_v35  ;;  %5814 = vmatprep.mubr.msk.bf16.mxu1 %vm5813_vm14, %v10661_v9  ;;  %v7659_v50 = vpop.eup %7658 }
 0x357   : > { %6126 = vmatprep.subr.bf16.mxu1 %v4822_v33  ;;  %v10700_v33 = vpack.c.bf16 %v10179_v38, %v10174_v49  ;;  %v10703_v49 = vpack.c.bf16 %v10257_v37, %v10248_v19  ;;  %7672 = vrcp.f32 %v8272_v13  ;;  %v6643_v13 = vld [vmem:[%s10509_s4 + $0x18] sm:$0xff]   ;;  %v6644_v19 = vld [vmem:[%s10509_s4 + $0x20] sm:$0xff]   ;;  %v6646_v37 = vld [vmem:[%s10509_s4 + $0x30] sm:$0xff]  }
 0x359   : > { %v7661_v62 = vpop.eup %7660 }
 0x35a   : > { %v7663_v20 = vpop.eup %7662  ;;  %6127 = vmatpush3.bf16.msra.mxu1 %v4814_v23  ;;  %v4826_v12 = vpack.c.bf16 %v7661_v62, %v7657_v16  ;;  %v6647_v23 = vld [vmem:[%s10509_s4 + $0x38] sm:$0xff]  }
 0x35b   : > { %6128 = vmatprep.subr.bf16.mxu1 %v4823_v28  ;;  %v4825_v17 = vpack.c.bf16 %v7663_v20, %v7659_v50 }
 0x35c   : > { %v7665_v14 = vpop.eup %7664 }
 0x35d   : > { %v7667_v1 = vpop.eup %7666 }
 0x35e   : > { %v7669_v26 = vpop.eup %7668  ;;  %6129 = vmatpush3.bf16.msra.mxu1 %v10699_v57 }
 0x35f   : > { %6130 = vmatprep.subr.bf16.mxu1 %v4824_v11  ;;  %v4828_v35 = vpack.c.bf16 %v7669_v26, %v7665_v14 }
 0x360   : > { %v7671_v59 = vpop.eup %7670 }
 0x361   : > { %v4827_v29 = vpack.c.bf16 %v7671_v59, %v7667_v1  ;;  %v7673_v31 = vpop.eup %7672 }
 0x362   : > { %6131 = vmatpush3.bf16.msra.mxu1 %v10700_v33  ;;  %6464 = vpush %v7673_v31 }
 0x363   : > { %6132 = vmatprep.subr.bf16.mxu1 %v4825_v17 }
 0x366   : > { %6133 = vmatpush3.bf16.msra.mxu1 %v10701_v15 }
 0x367   : > { %6134 = vmatprep.subr.bf16.mxu1 %v4826_v12 }
 0x36a   : > { %6135 = vmatpush3.bf16.msra.mxu1 %v10702_v30 }
 0x36b   : > { %6136 = vmatprep.subr.bf16.mxu1 %v4827_v29 }
 0x36e   : > { %6137 = vmatpush3.bf16.msra.mxu1 %v10703_v49 }
 0x36f   : > { %6138 = vmatprep.subr.bf16.mxu1 %v4828_v35 }
 0x372   : > { %6139 = vmatpush3.bf16.msra.mxu1 %v4820_v48 }
 0x373   : > { %6422 = vmatprep.subr.bf16.mxu1 %v7765_v40 }
 0x375   : > { %5816 = vmatmul.mubr.msk.bf16.vlgmr.msra.gmra.mrb[88].mxu1 %vm5815_vm2, %v10661_v9  ;;  %v6641_v9 = vld [vmem:[%s10509_s4 + $0x8] sm:$0xff]  }
 0x376   : > { %6423 = vmatpush3.bf16.msra.mxu1 %v6640_v46  ;;  %6438 = vmatprep.mubr.msk.bf16.mxu1 %vm7766_vm3, %v7765_v40 }
 0x377   : > { %6424 = vmatprep.subr.bf16.mxu1 %v7765_v40 }
 0x37a   : > { %6425 = vmatpush3.bf16.msra.mxu1 %v6641_v9 }
 0x37b   : > { %6426 = vmatprep.subr.bf16.mxu1 %v7765_v40 }
 0x37e   : > { %6427 = vmatpush3.bf16.msra.mxu1 %v6642_v43 }
 0x37f   : > { %6428 = vmatprep.subr.bf16.mxu1 %v7765_v40 }
 0x382   : > { %6429 = vmatpush3.bf16.msra.mxu1 %v6643_v13 }
 0x383   : > { %6430 = vmatprep.subr.bf16.mxu1 %v7765_v40 }
 0x386   : > { %6431 = vmatpush3.bf16.msra.mxu1 %v6644_v19 }
 0x387   : > { %6432 = vmatprep.subr.bf16.mxu1 %v7765_v40 }
 0x38a   : > { %6433 = vmatpush3.bf16.msra.mxu1 %v6645_v2 }
 0x38b   : > { %6434 = vmatprep.subr.bf16.mxu1 %v7765_v40 }
 0x38e   : > { %6435 = vmatpush3.bf16.msra.mxu1 %v6646_v37 }
 0x38f   : > { %6436 = vmatprep.subr.bf16.mxu1 %v7765_v40 }
 0x392   : > { %6437 = vmatpush3.bf16.msra.mxu1 %v6647_v23 }
 0x393   : > { %s6465_s25 = spop %6464 }
 0x394   : > { %v5154_v58 = vstv %s6465_s25 }
 0x3a3   : > { %v6074_v38 = vpop.f32.mrb[76].mxu1 }
 0x3a4   : > { %v6075_v4 = vpop.f32.mrb[77].mxu1 }
 0x3a5   : > { %v6076_v25 = vadd.f32 %v6075_v4, %v6074_v38  ;;  %v6077_v18 = vpop.f32.mrb[78].mxu1 }
 0x3a6   : > { %v6078_v53 = vpop.f32.mrb[79].mxu1 }
 0x3a7   : > { %v5024_v21 = vadd.f32 %v6076_v25, %v4984_v47 }
 0x408   : > { %v6096_v36 = vpop.f32.mrb[80].mxu1 }
 0x409   : > { %v6097_v61 = vpop.f32.mrb[81].mxu1 }
 0x40a   : > { %v6098_v6 = vadd.f32 %v6097_v61, %v6096_v36  ;;  %v6099_v7 = vpop.f32.mrb[82].mxu1 }
 0x40b   : > { %v6100_v42 = vpop.f32.mrb[83].mxu1 }
 0x40c   : > { %v5064_v60 = vadd.f32 %v6098_v6, %v5024_v21 }
 0x428   : > { %v6118_v11 = vpop.f32.mrb[84].mxu1 }
 0x429   : > { %v6119_v48 = vpop.f32.mrb[85].mxu1 }
 0x42a   : > { %v6120_v41 = vadd.f32 %v6119_v48, %v6118_v11  ;;  %v6121_v56 = vpop.f32.mrb[86].mxu1 }
 0x42b   : > { %v6122_v34 = vpop.f32.mrb[87].mxu1 }
 0x42c   : > { %v5104_v3 = vadd.f32 %v6120_v41, %v5064_v60 }
 0x448   : > { %v6140_v5 = vpop.f32.mrb[88].mxu1 }
 0x449   : > { %v6141_v8 = vpop.f32.mrb[89].mxu1 }
 0x44a   : > { %v6142_v32 = vadd.f32 %v6141_v8, %v6140_v5  ;;  %v6143_v51 = vpop.f32.mrb[90].mxu1 }
 0x44b   : > { %v6144_v27 = vpop.f32.mrb[91].mxu1 }
 0x44c   : > { %v5144_v44 = vadd.f32 %v6142_v32, %v5104_v3 }
 0x44e   : > { %7674 = vlog2.f32 %v5144_v44 }
 0x458   : > { %v7675_v54 = vpop.eup %7674 }
 0x459   : > { %v5150_v55 = vmul.f32 0.6931472, %v7675_v54 }
 0x45b   : > { %v5155_v28 = vmul.f32 %v5154_v58, %v5150_v55 }
 0x45d   : > { %v5156_v22 = vmul.f32 1.442695, %v5155_v28 }
 0x45f   : > { %7676 = vpow2.f32 %v5156_v22 }
 0x469   : > { %v7677_v52 = vpop.eup %7676 }
 0x46a   : > { %v5158_v0 = vpack.c.bf16 %v7677_v52, %v7677_v52 }
 0x46c   : > { %6439 = vmatmul.mubr.bf16.vlgmr.msra.gmra.mrb[92].mxu1 %v5158_v0 }
 0x53f   : > { %v5264_v63 = vpop.f32.mrb[92].mxu1 }
 0x540   : > { %v5265_v10 = vadd.f32 %v5817_v24, %v5264_v63  ;;  %v6440_v47 = vpop.f32.mrb[93].mxu1 }
 0x541   : > { %v5267_v45 = vpop.f32.mrb[94].mxu1 }
 0x542   : > { %v6441_v16 = vpop.f32.mrb[95].mxu1  ;;  %v5270_v50 = vmul.f32 %v5265_v10, %v5265_v10 }
 0x544   : > { %5271 = vadd.xlane.f32.xlu0 %v5270_v50 }
 0x5d1   : > { %v5272_v62 = vpop.xlane.xlu0 %5271 }
 0x5d2   : > { %7678 = vrsqrt.f32 %v5272_v62  ;;  %vm5275_vm4 = vcmp.eq.f32.partialorder %v5272_v62, inf  ;;  %v5278_v17 = vand.u32 2147483648, %v5272_v62  ;;  %vm5277_vm5 = vcmp.eq.f32.partialorder %v5272_v62, 0.0 }
 0x5dc   : > { %v7679_v20 = vpop.eup %7678 }
 0x5dd   : > { %v5274_v12 = vmul.f32 %v7679_v20, %v5272_v62 }
 0x5df   : > { %v5276_v14 = vsel %vm5275_vm4, %v5272_v62, %v5274_v12 }
 0x5e0   : > { %v5279_v1 = vsel %vm5277_vm5, %v5278_v17, %v5276_v14 }
 0x5e1   : > { %v5280_v26 = vmax.f32 %v5279_v1, 1e-12 }
 0x5e3   : > { %7680 = vrcp.f32 %v5280_v26 }
 0x5ed   : > { %v7681_v57 = vpop.eup %7680 }
 0x5ee   : > { %v5283_v35 = vmul.f32 %v7681_v57, %v5265_v10 }
 0x5f0   : > { %5284 = vst [vmem:[#allocation2] sm:$0xff] %v5283_v35 }
 0x5f1 PF: > { %v7689_v59 = vld [vmem:[%s7912_s23] sm:$0xff]   ;;  %v7767_v29 = vmov 0.0   ;;  %v7690_v33 = vld [vmem:[%s7912_s23 + $0x8] sm:$0xff]   ;;  %vm7768_vm6 = vmmov 0   ;;  %v7769_v15 = vmov 0   ;;  %v7691_v39 = vld [vmem:[%s7912_s23 + $0x10] sm:$0xff]   ;;  %v5399_v31 = vlaneseq  ;;  %s10704_s2 = scalar_lea.vmem %s10513_s8, %s7906_s15 }
 0x5f2   : > { %6442 = vmatprep.subr.bf16.mxu0 %v7767_v29  ;;  %6458 = vmatprep.mubr.msk.bf16.mxu0 %vm7768_vm6, %v7767_v29  ;;  %v5404_v30 = vld [vmem:[%s10511_s6] sm:$0xff]  ;;  %v7693_v38 = vld [vmem:[%s7912_s23 + $0x20] sm:$0xff]   ;;  %v7694_v4 = vld [vmem:[%s7912_s23 + $0x28] sm:$0xff]   ;;  %s5835_s17 = sshll.u32 %s7845_s0, 7  ;;  %s5445_s15 = sshll.u32 %s7914_s24, 4  ;;  %s10462_s15 = int_to_ptr.vmem [resolvable:$true] %s5445_s15 }
 0x5f3   : > { %6443 = vmatpush3.bf16.msra.mxu0 %v7689_v59  ;;  %7688 = vset.pattern.permute.xlu0 %v7769_v15  ;;  %v7692_v49 = vld [vmem:[%s7912_s23 + $0x18] sm:$0xff]   ;;  %v7695_v25 = vld [vmem:[%s7912_s23 + $0x30] sm:$0xff]   ;;  %v5400_v46 = vand.u32 127, %v5399_v31  ;;  %v5402_v40 = vstv %s5835_s17  ;;  %s10460_s25 = scalar_lea.hbm %s10514_s9, %s5835_s17  ;;  %s5432_s27 = scalar_lea.sflag [#allocation6], %s7900_s29 }
 0x5f4   : > { %6444 = vmatprep.subr.bf16.mxu0 %v7767_v29  ;;  %5406 = vperm.xlu0 %7688, %v5404_v30   ;;  %v7696_v18 = vld [vmem:[%s7912_s23 + $0x38] sm:$0xff]   ;;  %s7699_s28 = scalar_lea.vmem %s10462_s15, 128  ;;  %s7770_s30 = smov [#allocation5]  }
 0x5f5   : > { %v5403_v9 = vadd.s32 %v5402_v40, %v5400_v46  ;;  %v5834_v13 = vld [vmem:[%s10704_s2] ss:$0 sm:$0xff]  ;;  %p7700_p1 = scmp.ne.s32.totalorder %s10462_s15, %s7699_s28  ;;  %s7703_s10 = sshll.u32 %s7770_s30, 4  ;;  %s7704_s10 = int_to_ptr.vmem [resolvable:$false] %s7703_s10 }
 0x5f6   : > { %s7705_s0 = scalar_lea.vmem %s7704_s10, 256  ;;  %p7706_p4 = scmp.lt.s32.totalorder %s10462_s15, %s7704_s10 }
 0x5f7   : > { %6445 = vmatpush3.bf16.msra.mxu0 %v7690_v33  ;;  %v5285_v53 = vld [vmem:[#allocation2] sm:$0xff]  ;;  %p7701_p2 = pnand %p7700_p1, %p7863_p6  ;;  %p7707_p5 = scmp.lt.s32.totalorder %s7705_s0, %s7699_s28 }
 0x5f8   : > { %6446 = vmatprep.subr.bf16.mxu0 %v7767_v29  ;;  %v5286_v21 = vpack.c.bf16 %v5285_v53, %v5285_v53 }
 0x5f9   : > { %p7702_p3 = pneg %p7701_p2  ;;  %p7708_p7 = por %p7707_p5, %p7706_p4 }
 0x5fb   : > { %6447 = vmatpush3.bf16.msra.mxu0 %v7691_v39  ;;  %p7709_p10 = pnand %p7708_p7, %p7702_p3 }
 0x5fc   : > { %6448 = vmatprep.subr.bf16.mxu0 %v7767_v29 }
 0x5ff   : > { %6449 = vmatpush3.bf16.msra.mxu0 %v7692_v49 }
 0x600   : > { %6450 = vmatprep.subr.bf16.mxu0 %v7767_v29 }
 0x603   : > { %6451 = vmatpush3.bf16.msra.mxu0 %v7693_v38 }
 0x604   : > { %6452 = vmatprep.subr.bf16.mxu0 %v7767_v29 }
 0x607   : > { %6453 = vmatpush3.bf16.msra.mxu0 %v7694_v4 }
 0x608   : > { %6454 = vmatprep.subr.bf16.mxu0 %v7767_v29 }
 0x60b   : > { %6455 = vmatpush3.bf16.msra.mxu0 %v7695_v25 }
 0x60c   : > { %6456 = vmatprep.subr.bf16.mxu0 %v7767_v29 }
 0x60f   : > { %6457 = vmatpush3.bf16.msra.mxu0 %v7696_v18 }
 0x612   : > { %6459 = vmatmul.mubr.bf16.vlgmr.msra.gmra.mrb[0].mxu0 %v5286_v21 }
 0x673   : > { %v5407_v43 = vpop.permute.xlu0 %5406 }
 0x674   : > { %vm5408_vm7 = vcmp.eq.s32.totalorder %v5403_v9, %v5407_v43 }
 0x6e5   : > { %v5385_v19 = vpop.f32.mrb[0].mxu0 }
 0x6e6   : > { %v5398_v2 = vmul.f32 %v5834_v13, %v5385_v19  ;;  %v6460_v37 = vpop.f32.mrb[1].mxu0 }
 0x6e7   : > { %v5388_v23 = vpop.f32.mrb[2].mxu0 }
 0x6e8   : > { %v6461_v36 = vpop.f32.mrb[3].mxu0  ;;  %v5409_v61 = vsel %vm5408_vm7, %v5398_v2, 0.0 }
 0x6e9   : > { %5410 = vadd.xlane.f32.xlu0 %v5409_v61 }
 0x776   : > { %v5411_v6 = vpop.xlane.xlu0 %5410 }
 0x777   : > { %v5412_v7 = vmul.f32 %v5411_v6, %v5411_v6  ;;  %v5422_v3 = vmul.f32 0.87758255, %v5411_v6  ;;  %v5836_v32 = vadd.f32 -0.23971277, %v5411_v6  ;;  %vm5425_vm10 = vcmp.gt.f32.partialorder %v5411_v6, -0.87758255 }
 0x779   : > { %v5413_v42 = vsub.f32 1.0, %v5412_v7 }
 0x77b   : > { %v5414_v60 = vmax.f32 %v5413_v42, 0.0 }
 0x77d   : > { %7697 = vrsqrt.f32 %v5414_v60  ;;  %vm5417_vm8 = vcmp.eq.f32.partialorder %v5414_v60, inf  ;;  %v5420_v41 = vand.u32 2147483648, %v5414_v60  ;;  %vm5419_vm9 = vcmp.eq.f32.partialorder %v5414_v60, 0.0 }
 0x787   : > { %v7698_v11 = vpop.eup %7697 }
 0x788   : > { %v5416_v48 = vmul.f32 %v7698_v11, %v5414_v60 }
 0x78a   : > { %v5418_v56 = vsel %vm5417_vm8, %v5414_v60, %v5416_v48 }
 0x78b   : > { %v5421_v34 = vsel %vm5419_vm9, %v5420_v41, %v5418_v56 }
 0x78c   : > { %v5423_v5 = vmul.f32 0.47942555, %v5421_v34 }
 0x78e   : > { %v5424_v8 = vsub.f32 %v5422_v3, %v5423_v5 }
 0x790   : > { %v5427_v51 = vsel %vm5425_vm10, %v5424_v8, %v5836_v32 }
 0x791   : > { %v5428_v27 = vsel %vm5408_vm7, %v5427_v51, %v5398_v2 }
 0x792   : > { %v5429_v44 = vmul.f32 30.0, %v5428_v27 }
 0x794   : > { %5430 = vst [vmem:[%s7914_s24] sm:$0xff] %v5429_v44 }
 0x795   : > { %7712 = shalt.err (!%p7709_p10)
}
 0x796   : > { %s7713_s29 = scalar_lea.hbm %s10460_s25, 128  ;;  %s7717_s18 = scalar_lea.hbm %s10514_s9, 256 }
 0x797   : > { %p7714_p11 = scmp.ne.s32.totalorder %s10460_s25, %s7713_s29  ;;  %p7718_p0 = scmp.lt.u32.totalorder %s10460_s25, %s10514_s9 }
 0x798   : > { %p7719_p1 = scmp.lt.u32.totalorder %s7717_s18, %s7713_s29  ;;  %p7721_p3 = scmp.lt.u32.totalorder %s7713_s29, %s10460_s25 }
 0x799   : > { %p7715_p12 = pnand %p7714_p11, %p7863_p6 }
 0x79a   : > { %p7720_p2 = por %p7719_p1, %p7718_p0 }
 0x79b   : > { %p7716_p13 = pneg %p7715_p12 }
 0x79c   : > { %p7722_p4 = por %p7721_p3, %p7720_p2 }
 0x79e   : > { %p7723_p5 = pnand %p7722_p4, %p7716_p13 }
 0x7a0   : > { %7726 = shalt.err (!%p7723_p5)
}
 0x7a1   : > { %6466 = dma.vmem_to_hbm [thread:$0]  (%p7863_p6), %s10462_s15, 128, %s10460_s25, %s5432_s27  }
 0x7a2 PF: > { %s5457_s23 = sand.u32 1, %s7749_s11   ;;  %p6469_p7 = pnand %p5521_p9, %p7867_p8 }
 0x7a3   : > { %s5458_s22 = scalar_lea.sflag [#allocation6], %s5457_s23 }
 0x7a4   : > { %7744 = dma.done.wait (!%p6469_p7), %s5458_s22, 128  }
 0x7a5   : > { %7746 = vsyncadd (!%p6469_p7), %s5458_s22, 4294967168  ;;  %p20_p10 = scmp.ge.s32.totalorder %s7849_s16, 4   ;;  %s10705_s11 = smov %s7753_s12 }
 0x7a6   : > { %s10706_s12 = smov %s7757_s13  ;;  %s10707_s13 = smov %s7861_s19 }
 0x7a7   : > { %s10708_s14 = smov %s7849_s16  ;;  %22 = sbr.rel (!%p20_p10) target bundleno = 6 (0x6), region = 144 }
 0x7ae   :  { %5463 = vsyncpa [#allocation6], 1 }
 0x7af   :  { %5465 = vsyncpa [#allocation6 + $0x1], 1 }

</bundles_post_ra>
